<compile_context>
chip_gen: v6e
topology: v6e:2x2x1
jax: 0.10.0
libtpu: 0.0.40
codegen_flags: <defaults>
</compile_context>

<pallas_src>
import functools

import jax
import jax.numpy as jnp
from jax.experimental import pallas as pl
from jax.experimental.pallas import tpu as pltpu


# ----------------------------- kernels -------------------------------------


def _conv_relu_pool_kernel(x_ref, w_ref, b_ref, o_ref, *, KH, Hc, Hp, Wp, Cout):
    """Fused valid-conv(KHx KW) + bias + ReLU + 2x2 max-pool for one image.

    x_ref: (1, H, W*Cin)        lane-dense input slab (bf16)
    w_ref: (KH, W*Cin, Wc*Cout) banded weight, one band per kh tap (bf16)
    b_ref: (1, Wp*Cout)         bias tiled over the pooled (w, cout) lane axis (f32)
    o_ref: (1, Hp, Wp*Cout)     lane-dense pooled output (bf16)
    """
    x = x_ref[0]                                    # (H, W*Cin)
    n_cols = w_ref.shape[-1]                        # Wc*Cout
    acc = jnp.zeros((Hc, n_cols), jnp.float32)
    for kh in range(KH):                            # KH matmuls into the f32 accumulator
        acc = acc + jnp.dot(x[kh:kh + Hc, :], w_ref[kh],
                            preferred_element_type=jnp.float32)

    # 2x2 max-pool (floor); bias+ReLU after the max (they commute -> 4x fewer VPU ops).
    y = acc[: 2 * Hp, : 2 * Wp * Cout]
    y = y.reshape(Hp, 2, 2 * Wp * Cout).max(axis=1)           # pool rows
    y = y.reshape(Hp, Wp, 2 * Cout)
    y = jnp.maximum(y[..., :Cout], y[..., Cout:])             # pool adjacent w columns
    y = y.reshape(Hp, Wp * Cout)
    o_ref[0] = jnp.maximum(y + b_ref[...], 0.0).astype(o_ref.dtype)


def _mlp_kernel(x_ref, w1_ref, b1_ref, w2_ref, b2_ref, o_ref, acc_ref):
    # K-tiled Linear(F,128)+ReLU+Linear(128,Opad); grid axis = reduction over F.
    k = pl.program_id(0)

    @pl.when(k == 0)
    def _():
        acc_ref[...] = jnp.zeros_like(acc_ref)

    acc_ref[...] += jnp.dot(x_ref[...], w1_ref[...],
                            preferred_element_type=jnp.float32)

    @pl.when(k == pl.num_programs(0) - 1)
    def _():
        h = jnp.maximum(acc_ref[...] + b1_ref[...], 0.0)
        o_ref[...] = jnp.dot(h.astype(w2_ref.dtype), w2_ref[...],
                             preferred_element_type=jnp.float32) + b2_ref[...]


# ----------------------------- wrappers ------------------------------------


def conv2d_relu_maxpool(x, w_banded, b_tiled, *, cout):
    # x: (N, H, W*Cin) lane-dense; w_banded: (KH, W*Cin, Wc*Cout); b_tiled: (1, Wp*Cout)
    N, H, WCin = x.shape
    KH, _, WcCout = w_banded.shape
    Wc = WcCout // cout
    Hc = H - KH + 1
    Hp, Wp = Hc // 2, Wc // 2
    WpCout = Wp * cout

    kernel = functools.partial(_conv_relu_pool_kernel,
                               KH=KH, Hc=Hc, Hp=Hp, Wp=Wp, Cout=cout)
    return pl.pallas_call(
        kernel,
        out_shape=jax.ShapeDtypeStruct((N, Hp, WpCout), jnp.bfloat16),
        grid=(N,),
        in_specs=[
            pl.BlockSpec((1, H, WCin), lambda n: (n, 0, 0)),
            pl.BlockSpec((KH, WCin, WcCout), lambda n: (0, 0, 0)),
            pl.BlockSpec((1, WpCout), lambda n: (0, 0)),
        ],
        out_specs=pl.BlockSpec((1, Hp, WpCout), lambda n: (n, 0, 0)),
        compiler_params=pltpu.CompilerParams(
            dimension_semantics=("parallel",),
            vmem_limit_bytes=32 * 1024 * 1024),
    )(x, w_banded, b_tiled)


def _pick_k_tile(F, max_tk=2048):
    """128-aligned K tile; never requires F to be an exact multiple (F gets zero-padded)."""
    f128 = ((F + 127) // 128) * 128
    if f128 <= max_tk:
        return f128
    for cand in range(max_tk, max_tk // 2 - 1, -128):   # prefer a divisor (no padding)
        if f128 % cand == 0:
            return cand
    return max_tk                                        # otherwise pad F up to max_tk mult


def mlp(x, w1, b1, w2p, b2p, *, n_out):
    # x: (N, F) bf16 (NHWC-flattened features); w1: (F,128) bf16; b1: (1,128) f32
    # w2p: (128, 128) bf16 zero-padded from (128,3); b2p: (1,128) f32 zero-padded
    N, F = x.shape
    H1 = w1.shape[1]
    OP = w2p.shape[1]
    M = ((max(N, 8) + 7) // 8) * 8                 # pad batch to full sublanes
    tk = _pick_k_tile(F)
    Fp = ((F + tk - 1) // tk) * tk
    nk = Fp // tk

    xp = jnp.pad(x, ((0, M - N), (0, Fp - F)))
    w1p = jnp.pad(w1, ((0, Fp - F), (0, 0))) if Fp != F else w1

    def _w1_map(k):
        return (k, 0)
    try:                                            # triple-buffer the streamed fc1 weight
        w1_spec = pl.BlockSpec((tk, H1), _w1_map, pipeline_mode=pl.Buffered(3))
    except (TypeError, AttributeError):             # older JAX without pipeline_mode
        w1_spec = pl.BlockSpec((tk, H1), _w1_map)

    out = pl.pallas_call(
        _mlp_kernel,
        out_shape=jax.ShapeDtypeStruct((M, OP), jnp.float32),
        grid=(nk,),
        in_specs=[
            pl.BlockSpec((M, tk), lambda k: (0, k)),
            w1_spec,
            pl.BlockSpec((1, H1), lambda k: (0, 0)),
            pl.BlockSpec((H1, OP), lambda k: (0, 0)),
            pl.BlockSpec((1, OP), lambda k: (0, 0)),
        ],
        out_specs=pl.BlockSpec((M, OP), lambda k: (0, 0)),
        scratch_shapes=[pltpu.VMEM((M, H1), jnp.float32)],
        compiler_params=pltpu.CompilerParams(
            dimension_semantics=("arbitrary",),
            vmem_limit_bytes=32 * 1024 * 1024),
    )(xp, w1p, b1, w2p, b2p)
    return out[:N, :n_out]


# --------------------------- weight preparation -----------------------------


def _banded_conv_weight(w_hwio, w_in, dtype=jnp.bfloat16):
    """Fold the kw taps of a valid conv into a banded matrix per kh tap.

    Returns (KH, w_in*Cin, Wc*Cout) with
      banded[kh, win*Cin + ci, wout*Cout + co] = w[kh, win - wout, ci, co]  (0 elsewhere),
    so conv row h is:  sum_kh  x[h+kh, :] @ banded[kh]   (lane-dense in, lane-dense out).
    """
    KH, KW, Cin, Cout = w_hwio.shape
    Wc = w_in - KW + 1
    eye = jnp.eye(Wc, dtype=jnp.float32)
    mats = []
    for kh in range(KH):
        m = jnp.zeros((w_in * Cin, Wc * Cout), jnp.float32)
        for kw in range(KW):
            blk = jnp.kron(eye, w_hwio[kh, kw])                        # (Wc*Cin, Wc*Cout)
            m = m + jnp.pad(blk, ((kw * Cin, (KW - 1 - kw) * Cin), (0, 0)))
        mats.append(m)
    return jnp.stack(mats).astype(dtype)


def init_params(key, h_in, w_in):
    ks = jax.random.split(key, 8)

    def uni(k, shape, fan_in):
        bound = 1.0 / (fan_in ** 0.5)
        return jax.random.uniform(k, shape, jnp.float32, -bound, bound)

    # conv weights generated in PyTorch layout (Cout, Cin, KH, KW) then moved to HWIO
    cw1 = uni(ks[0], (32, 3, 5, 5), 3 * 25).transpose(2, 3, 1, 0)
    cb1 = uni(ks[1], (32,), 3 * 25)
    cw2 = uni(ks[2], (64, 32, 5, 5), 32 * 25).transpose(2, 3, 1, 0)
    cb2 = uni(ks[3], (64,), 32 * 25)

    h1, w1 = h_in - 4, w_in - 4          # conv1 (5x5 valid)
    h2, w2 = h1 // 2, w1 // 2            # maxpool 2x2
    h3, w3 = h2 - 4, w2 - 4              # conv2 (5x5 valid)
    h4, w4 = h3 // 2, w3 // 2            # maxpool 2x2
    feat = 64 * h4 * w4                  # same formula as 64*189*189 in the module

    # fc1 generated in PyTorch (out, in) layout with NCHW-flatten in-features, then
    # transposed and row-permuted to NHWC-flatten order (deletes the runtime transpose).
    fw1_pt = uni(ks[4], (128, feat), feat).T                                # rows (c,h,w)
    fw1 = (fw1_pt.reshape(64, h4, w4, 128).transpose(1, 2, 0, 3).reshape(feat, 128))
    fb1 = uni(ks[5], (128,), feat)
    fw2 = uni(ks[6], (3, 128), 128).T
    fb2 = uni(ks[7], (3,), 128)

    # device layouts: banded bf16 conv weights, lane-tiled biases, padded/bf16 fc weights
    return dict(
        cw1b=_banded_conv_weight(cw1, w_in),                     # (5, w_in*3,  w1*32) bf16
        cb1t=jnp.tile(cb1, w1 // 2).reshape(1, -1),              # (1, Wp1*32) f32
        cw2b=_banded_conv_weight(cw2, w2),                       # (5, w2*32,  w3*64) bf16
        cb2t=jnp.tile(cb2, w3 // 2).reshape(1, -1),              # (1, Wp2*64) f32
        fw1=fw1.astype(jnp.bfloat16),                            # (feat, 128) bf16
        fb1=fb1.reshape(1, 128),                                 # (1, 128) f32
        fw2p=jnp.pad(fw2, ((0, 0), (0, 125))).astype(jnp.bfloat16),   # (128, 128) bf16
        fb2p=jnp.pad(fb2, (0, 125)).reshape(1, 128),             # (1, 128) f32
    )


# --------------------------- model wiring -----------------------------------


def lc_model_forward(x_nchw, p):
    n, cin, h, w = x_nchw.shape
    # NCHW (PyTorch) -> lane-dense (N, H, W*Cin): (w, cin) ride the 128-lane axis together.
    x = jnp.transpose(x_nchw, (0, 2, 3, 1)).reshape(n, h, w * cin).astype(jnp.bfloat16)
    x = conv2d_relu_maxpool(x, p["cw1b"], p["cb1t"], cout=32)   # Conv+ReLU+MaxPool fused
    x = conv2d_relu_maxpool(x, p["cw2b"], p["cb2t"], cout=64)   # Conv+ReLU+MaxPool fused
    x = x.reshape(n, -1)     # (h, w, c) flatten; NCHW permutation already folded into fw1
    return mlp(x, p["fw1"], p["fb1"], p["fw2p"], p["fb2p"], n_out=3)


if __name__ == "__main__":
    N, CIN, H, W = 2, 3, 36, 36          # small spatial size (module implies ~768x768)
    x = jax.random.normal(jax.random.PRNGKey(0), (N, CIN, H, W), jnp.float32)
    params = init_params(jax.random.PRNGKey(42), H, W)

    out = jax.block_until_ready(lc_model_forward(x, params))
    assert out.shape == (N, 3) and out.dtype == jnp.float32
    print("KERNEL_OK")
</pallas_src>

<mosaic_0001>
module attributes {stable_mosaic.version = 11 : i64} {
  func.func @_conv_relu_pool_kernel(%arg0: i32, %arg1: memref<1x36x108xbf16, #tpu.memory_space<vmem>>, %arg2: memref<5x108x1024xbf16, #tpu.memory_space<vmem>>, %arg3: memref<1x512xf32, #tpu.memory_space<vmem>>, %arg4: memref<1x16x512xbf16, #tpu.memory_space<vmem>>) attributes {dimension_semantics = [#tpu.dimension_semantics<parallel>], iteration_bounds = array<i64: 2>, scalar_prefetch = 0 : i64, scratch_operands = 0 : i64, tpu.core_type = #tpu.core_type<tc>, window_params = [{transform_indices = @transform_0, window_bounds = array<i64: 1, 36, 108>}, {pipeline_mode = #tpu.pipeline_mode<synchronous>, transform_indices = @transform_1, window_bounds = array<i64: 5, 108, 1024>}, {pipeline_mode = #tpu.pipeline_mode<synchronous>, transform_indices = @transform_2, window_bounds = array<i64: 1, 512>}, {transform_indices = @transform_3, window_bounds = array<i64: 1, 16, 512>}]} {
    %c0 = arith.constant 0 : index
    %c0_0 = arith.constant 0 : index
    %c0_1 = arith.constant 0 : index
    %0 = vector.load %arg1[%c0, %c0_0, %c0_1] : memref<1x36x108xbf16, #tpu.memory_space<vmem>>, vector<1x36x108xbf16>
    %1 = vector.shape_cast %0 : vector<1x36x108xbf16> to vector<36x108xbf16>
    %cst = arith.constant 0.000000e+00 : f32
    %2 = vector.broadcast %cst : f32 to vector<32x1024xf32>
    %3 = vector.extract_strided_slice %1 {offsets = [0, 0], sizes = [32, 108], strides = [1, 1]} : vector<36x108xbf16> to vector<32x108xbf16>
    %c0_2 = arith.constant 0 : index
    %c0_3 = arith.constant 0 : index
    %c0_4 = arith.constant 0 : index
    %4 = vector.load %arg2[%c0_2, %c0_3, %c0_4] : memref<5x108x1024xbf16, #tpu.memory_space<vmem>>, vector<1x108x1024xbf16>
    %5 = vector.shape_cast %4 : vector<1x108x1024xbf16> to vector<108x1024xbf16>
    %cst_5 = arith.constant dense<0.000000e+00> : vector<32x1024xf32>
    %6 = tpu.matmul %3, %5, %cst_5 {dimension_numbers = #tpu.dot_dimension_numbers<[1], [0], [0], [1], [0, 0, 1, 1], [], []>} : vector<32x108xbf16>, vector<108x1024xbf16>, vector<32x1024xf32> -> vector<32x1024xf32>
    %7 = arith.addf %2, %6 : vector<32x1024xf32>
    %8 = vector.extract_strided_slice %1 {offsets = [1, 0], sizes = [32, 108], strides = [1, 1]} : vector<36x108xbf16> to vector<32x108xbf16>
    %c1 = arith.constant 1 : index
    %c0_6 = arith.constant 0 : index
    %c0_7 = arith.constant 0 : index
    %9 = vector.load %arg2[%c1, %c0_6, %c0_7] : memref<5x108x1024xbf16, #tpu.memory_space<vmem>>, vector<1x108x1024xbf16>
    %10 = vector.shape_cast %9 : vector<1x108x1024xbf16> to vector<108x1024xbf16>
    %cst_8 = arith.constant dense<0.000000e+00> : vector<32x1024xf32>
    %11 = tpu.matmul %8, %10, %cst_8 {dimension_numbers = #tpu.dot_dimension_numbers<[1], [0], [0], [1], [0, 0, 1, 1], [], []>} : vector<32x108xbf16>, vector<108x1024xbf16>, vector<32x1024xf32> -> vector<32x1024xf32>
    %12 = arith.addf %7, %11 : vector<32x1024xf32>
    %13 = vector.extract_strided_slice %1 {offsets = [2, 0], sizes = [32, 108], strides = [1, 1]} : vector<36x108xbf16> to vector<32x108xbf16>
    %c2 = arith.constant 2 : index
    %c0_9 = arith.constant 0 : index
    %c0_10 = arith.constant 0 : index
    %14 = vector.load %arg2[%c2, %c0_9, %c0_10] : memref<5x108x1024xbf16, #tpu.memory_space<vmem>>, vector<1x108x1024xbf16>
    %15 = vector.shape_cast %14 : vector<1x108x1024xbf16> to vector<108x1024xbf16>
    %cst_11 = arith.constant dense<0.000000e+00> : vector<32x1024xf32>
    %16 = tpu.matmul %13, %15, %cst_11 {dimension_numbers = #tpu.dot_dimension_numbers<[1], [0], [0], [1], [0, 0, 1, 1], [], []>} : vector<32x108xbf16>, vector<108x1024xbf16>, vector<32x1024xf32> -> vector<32x1024xf32>
    %17 = arith.addf %12, %16 : vector<32x1024xf32>
    %18 = vector.extract_strided_slice %1 {offsets = [3, 0], sizes = [32, 108], strides = [1, 1]} : vector<36x108xbf16> to vector<32x108xbf16>
    %c3 = arith.constant 3 : index
    %c0_12 = arith.constant 0 : index
    %c0_13 = arith.constant 0 : index
    %19 = vector.load %arg2[%c3, %c0_12, %c0_13] : memref<5x108x1024xbf16, #tpu.memory_space<vmem>>, vector<1x108x1024xbf16>
    %20 = vector.shape_cast %19 : vector<1x108x1024xbf16> to vector<108x1024xbf16>
    %cst_14 = arith.constant dense<0.000000e+00> : vector<32x1024xf32>
    %21 = tpu.matmul %18, %20, %cst_14 {dimension_numbers = #tpu.dot_dimension_numbers<[1], [0], [0], [1], [0, 0, 1, 1], [], []>} : vector<32x108xbf16>, vector<108x1024xbf16>, vector<32x1024xf32> -> vector<32x1024xf32>
    %22 = arith.addf %17, %21 : vector<32x1024xf32>
    %23 = vector.extract_strided_slice %1 {offsets = [4, 0], sizes = [32, 108], strides = [1, 1]} : vector<36x108xbf16> to vector<32x108xbf16>
    %c4 = arith.constant 4 : index
    %c0_15 = arith.constant 0 : index
    %c0_16 = arith.constant 0 : index
    %24 = vector.load %arg2[%c4, %c0_15, %c0_16] : memref<5x108x1024xbf16, #tpu.memory_space<vmem>>, vector<1x108x1024xbf16>
    %25 = vector.shape_cast %24 : vector<1x108x1024xbf16> to vector<108x1024xbf16>
    %cst_17 = arith.constant dense<0.000000e+00> : vector<32x1024xf32>
    %26 = tpu.matmul %23, %25, %cst_17 {dimension_numbers = #tpu.dot_dimension_numbers<[1], [0], [0], [1], [0, 0, 1, 1], [], []>} : vector<32x108xbf16>, vector<108x1024xbf16>, vector<32x1024xf32> -> vector<32x1024xf32>
    %27 = arith.addf %22, %26 : vector<32x1024xf32>
    %28 = vector.shape_cast %27 : vector<32x1024xf32> to vector<16x2x1024xf32>
    %cst_18 = arith.constant dense<0xFF800000> : vector<16x1024xf32>
    %29 = vector.multi_reduction <maximumf>, %28, %cst_18 [1] : vector<16x2x1024xf32> to vector<16x1024xf32>
    %30 = vector.shape_cast %29 : vector<16x1024xf32> to vector<16x16x64xf32>
    %31 = vector.extract_strided_slice %30 {offsets = [0, 0, 0], sizes = [16, 16, 32], strides = [1, 1, 1]} : vector<16x16x64xf32> to vector<16x16x32xf32>
    %32 = vector.extract_strided_slice %30 {offsets = [0, 0, 32], sizes = [16, 16, 32], strides = [1, 1, 1]} : vector<16x16x64xf32> to vector<16x16x32xf32>
    %33 = arith.maximumf %31, %32 : vector<16x16x32xf32>
    %34 = vector.shape_cast %33 : vector<16x16x32xf32> to vector<16x512xf32>
    %c0_19 = arith.constant 0 : index
    %c0_20 = arith.constant 0 : index
    %35 = vector.load %arg3[%c0_19, %c0_20] : memref<1x512xf32, #tpu.memory_space<vmem>>, vector<1x512xf32>
    %36 = vector.broadcast %35 : vector<1x512xf32> to vector<16x512xf32>
    %37 = arith.addf %34, %36 : vector<16x512xf32>
    %cst_21 = arith.constant 0.000000e+00 : f32
    %38 = vector.broadcast %cst_21 : f32 to vector<16x512xf32>
    %39 = arith.maximumf %37, %38 : vector<16x512xf32>
    %40 = arith.truncf %39 : vector<16x512xf32> to vector<16x512xbf16>
    %c0_22 = arith.constant 0 : index
    %c0_23 = arith.constant 0 : index
    %c0_24 = arith.constant 0 : index
    %41 = vector.load %arg4[%c0_22, %c0_23, %c0_24] : memref<1x16x512xbf16, #tpu.memory_space<vmem>>, vector<1x16x512xbf16>
    %42 = vector.shape_cast %41 : vector<1x16x512xbf16> to vector<16x512xbf16>
    %43 = vector.shape_cast %40 : vector<16x512xbf16> to vector<1x16x512xbf16>
    tpu.vector_store %arg4[%c0_22, %c0_23, %c0_24], %43 {strides = array<i32>} : memref<1x16x512xbf16, #tpu.memory_space<vmem>>, vector<1x16x512xbf16>,
    return
  }
  func.func @transform_0(%arg0: i32) -> (i32, i32, i32) {
    %c0_i32 = arith.constant 0 : i32
    %c0_i32_0 = arith.constant 0 : i32
    %c0_i32_1 = arith.constant 0 : i32
    return %arg0, %c0_i32, %c0_i32_0 : i32, i32, i32
  }
  func.func @transform_1(%arg0: i32) -> (i32, i32, i32) {
    %c0_i32 = arith.constant 0 : i32
    %c0_i32_0 = arith.constant 0 : i32
    %c0_i32_1 = arith.constant 0 : i32
    %c0_i32_2 = arith.constant 0 : i32
    return %c0_i32, %c0_i32_0, %c0_i32_1 : i32, i32, i32
  }
  func.func @transform_2(%arg0: i32) -> (i32, i32) {
    %c0_i32 = arith.constant 0 : i32
    %c0_i32_0 = arith.constant 0 : i32
    %c0_i32_1 = arith.constant 0 : i32
    return %c0_i32, %c0_i32_0 : i32, i32
  }
  func.func @transform_3(%arg0: i32) -> (i32, i32, i32) {
    %c0_i32 = arith.constant 0 : i32
    %c0_i32_0 = arith.constant 0 : i32
    %c0_i32_1 = arith.constant 0 : i32
    return %arg0, %c0_i32, %c0_i32_0 : i32, i32, i32
  }
}

</mosaic_0001>

<bundles_post_ra>
// kernel: tpu_custom_call.1
= control target key start
LH: loop header
LB: loop body
LE: loop exit
PB: predicated region body
PF: predicated region fallthrough
CT: control target
= control target key end

     0   :  { %8 = vsyncpa [#allocation3], 0  ;;  %s11215_s0 = inlined_call_operand.vmem [shape: bf16[2,36,108], index: 0, kind: input, shape index: {}]   ;;  %s11216_s1 = inlined_call_operand.hbm [shape: bf16[5,108,1024], index: 1, kind: input, shape index: {}]   ;;  %s11217_s2 = inlined_call_operand.hbm [shape: f32[1,512], index: 2, kind: input, shape index: {}]   ;;  %s11218_s3 = inlined_call_operand.hbm [shape: bf16[2,16,512], index: 3, kind: output, shape index: {}]  }
   0x1   :  { %9 = vsyncpa [#allocation6], 0 }
   0x2   :  { %10 = vsyncpa [#allocation4], 0 }
   0x3   :  { %12 = vsyncpa [#allocation4 + $0x1], 0  ;;  %s8139_s12 = smov 0   ;;  %s8141_s13 = smov 0  }
   0x4   :  { %s8143_s14 = smov 0   ;;  %s8145_s15 = smov 0  }
   0x5 LB: > { %s8160_s16 = sadd.s32 4294967295, %s8104_s15   ;;  %s7508_s17 = sadd.s32 4294967294, %s8104_s15   ;;  %s8104_s15 = sphi %s8145_s15, %s11439_s15   ;;  %s8100_s14 = sphi %s8143_s14, %s11438_s14   ;;  %s8096_s13 = sphi %s8141_s13, %s11437_s13   ;;  %s8092_s12 = sphi %s8139_s12, %s11436_s12  }
   0x6   : > { %s8164_s18 = sadd.s32 1, %s8104_s15   ;;  %s93_s19 = sadd.s32 1, %s8100_s14 }
   0x7   : > { %s90_s20 = ssub.s32 %s8104_s15, %s8164_s18  ;;  %p103_p0 = scmp.ne.s32.totalorder %s8100_s14, %s8096_s13 }
   0x8   : > { %p91_p1 = scmp.eq.s32.totalorder %s90_s20, 0  ;;  %p104_p2 = scmp.eq.s32.totalorder %s8160_s16, 1 }
   0x9   : > { %p109_p3 = scmp.ne.s32.totalorder %s8096_s13, %s8092_s12  ;;  %p110_p4 = scmp.eq.s32.totalorder %s7508_s17, 1 }
   0xa   : > { %s8175_s21 = scalar_select %p91_p1, %s8100_s14, %s93_s19  }
   0xb   : > { %p8177_p5 = por %p104_p2, %p103_p0  ;;  %p8181_p6 = por %p110_p4, %p109_p3 }
   0xc   : > { %p7509_p7 = scmp.ge.s32.totalorder %s8104_s15, 1  ;;  %p117_p8 = scmp.lt.s32.totalorder %s8104_s15, 3 }
   0xd   : > { %s11264_s23 = scalar_select %p8181_p6, 1, 0 }
   0xe   : > { %p11219_p9 = scmp.eq.s32.totalorder %s8160_s16, 0  ;;  %p8188_p10 = pnand %p7509_p7, %p117_p8 }
   0xf   : > { %s8106_s25 = smov [#allocation2]   ;;  %s8107_s28 = smov [#allocation5]  }
  0x10   : > { %s129_s26 = sshll.u32 %s8106_s25, 4  ;;  %p7918_p11 = pneg %p8188_p10  ;;  %s130_s26 = int_to_ptr.vmem [resolvable:$true] %s129_s26 }
  0x11   : > { %s143_s29 = sshll.u32 %s8107_s28, 4  ;;  %s7995_s30 = scalar_lea.vmem %s130_s26, 35840  ;;  %s144_s29 = int_to_ptr.vmem [resolvable:$true] %s143_s29 }
  0x12   : > { %p8196_p12 = pnand %p11219_p9, %p7918_p11  ;;  %p7996_p0 = scmp.ne.s32.totalorder %s130_s26, %s7995_s30 }
  0x13   : > { %p8003_p3 = scmp.lt.s32.totalorder %s130_s26, %s130_s26  ;;  %p8004_p4 = scmp.lt.s32.totalorder %s7995_s30, %s7995_s30 }
  0x14   : > { %p7986_p13 = pneg %p8196_p12 }
  0x15   : > { %p8005_p7 = por %p8004_p4, %p8003_p3 }
  0x16   : > { %p7998_p1 = pnand %p7996_p0, %p7986_p13 }
  0x18   : > { %p7999_p2 = pneg %p7998_p1 }
  0x1a   : > { %p8006_p8 = pnand %p8005_p7, %p7999_p2 }
  0x1c   : > { %8009 = shalt.err (!%p8006_p8)
}
  0x1d   : > { %s8108_s4 = smov 512   ;;  %s8109_s5 = smov 32  }
  0x1e   : > { %7921 = dma.hbm_to_vmem [thread:$0]  (!%p8196_p12), %s11216_s1, 35840, %s130_s26, [#allocation3], %s8108_s4, %s8108_s4, %s8109_s5  }
  0x1f   : > { %s8021_s8 = scalar_lea.vmem %s144_s29, 64  ;;  %p8029_p9 = scmp.lt.s32.totalorder %s144_s29, %s144_s29 }
  0x20   : > { %p8022_p11 = scmp.ne.s32.totalorder %s144_s29, %s8021_s8  ;;  %p8030_p6 = scmp.lt.s32.totalorder %s8021_s8, %s8021_s8 }
  0x22   : > { %p8024_p0 = pnand %p8022_p11, %p7986_p13  ;;  %p8031_p3 = por %p8030_p6, %p8029_p9 }
  0x24   : > { %p8025_p1 = pneg %p8024_p0 }
  0x26   : > { %p8032_p2 = pnand %p8031_p3, %p8025_p1 }
  0x28   : > { %8035 = shalt.err (!%p8032_p2)
}
  0x29   : > { %7924 = dma.hbm_to_vmem [thread:$0]  (!%p8196_p12), %s11217_s2, 64, %s144_s29, [#allocation6]  }
  0x2a   : > { %164 = sbr.rel (%p8188_p10) target bundleno = 1369 (0x559), region = 32 }
  0x2f   : > { %p11267_p4 = scmp.eq.s32.totalorder %s8160_s16, 0 }
  0x31   : > { %8079 = dma.done.wait (%p11267_p4), [#allocation3], 35840   ;;  %p11268_p13 = pmov %p11267_p4 }
  0x32   : > { %p11269_p7 = pmov %p11267_p4 }
  0x33   : > { %8081 = vsyncadd (%p11268_p13), [#allocation3], 4294931456 }
  0x34   : > { %8083 = dma.done.wait (%p11269_p7), [#allocation6], 64   ;;  %p11270_p6 = pmov %p11267_p4 }
  0x35   : > { %v8110_v0 = vmov 0   ;;  %p192_p9 = scmp.lt.s32.totalorder %s8160_s16, 1  ;;  %v308_v1 = vld [vmem:[#allocation2 + $0x340] sm:$0xff]  ;;  %vm629_vm0 = vcmask 1045504   ;;  %v309_v3 = vld [vmem:[#allocation2 + $0x348] sm:$0xff]  ;;  %v310_v63 = vld [vmem:[#allocation2 + $0x350] sm:$0xff] }
  0x36   : > { %8085 = vsyncadd (%p11270_p6), [#allocation6], 4294967232  ;;  %686 = vmatprep.mubr.bf16.mxu0 %v8110_v0  ;;  %739 = vmatprep.mubr.bf16.mxu1 %v8110_v0  ;;  %v312_v2 = vld [vmem:[#allocation2 + $0x360] sm:$0x33]  ;;  %v313_v5 = vld [vmem:[#allocation2 + $0x368] sm:$0x33] }
  0x37   : > { %s8232_s11 = scalar_select %p192_p9, %s8160_s16, 1  ;;  %v7570_v4 = vcombine.high %v308_v1, %v312_v2  ;;  %v7569_v6 = vcombine.low %v308_v1, %v312_v2  ;;  %v300_v7 = vld [vmem:[#allocation2 + $0x300] sm:$0xff]  ;;  %v7572_v9 = vcombine.high %v309_v3, %v313_v5  ;;  %v7571_v10 = vcombine.low %v309_v3, %v313_v5  ;;  %v301_v12 = vld [vmem:[#allocation2 + $0x308] sm:$0xff]  ;;  %v314_v1 = vld [vmem:[#allocation2 + $0x370] sm:$0x33] }
  0x38   : > { %v304_v8 = vld [vmem:[#allocation2 + $0x320] sm:$0xff]  ;;  %v305_v13 = vld [vmem:[#allocation2 + $0x328] sm:$0xff]  ;;  %v311_v2 = vld [vmem:[#allocation2 + $0x358] sm:$0xff]  ;;  %vm329_vm1 = vsmask.f32 7424  ;;  %vm622_vm2 = vcmask 883712  }
  0x39   : > { %v7562_v11 = vcombine.high %v300_v7, %v304_v8  ;;  %v292_v14 = vld [vmem:[#allocation2 + $0x2c0] sm:$0xff]  ;;  %7577 = vmatprep.subr.msk.bf16.mxu0 %vm629_vm0, %v7570_v4  ;;  %v631_v15 = vsel %vm629_vm0, %v7569_v6, 0  ;;  %v7564_v16 = vcombine.high %v301_v12, %v305_v13  ;;  %v293_v18 = vld [vmem:[#allocation2 + $0x2c8] sm:$0xff]  ;;  %7580 = vmatprep.subr.msk.bf16.mxu1 %vm629_vm0, %v7572_v9  ;;  %v637_v20 = vsel %vm629_vm0, %v7571_v10, 0  ;;  %s7907_s17 = smul.u32 20, %s8232_s11  ;;  %s8112_s25 = smov 64  }
  0x3a   : > { %v296_v17 = vld [vmem:[#allocation2 + $0x2e0] sm:$0xff]  ;;  %v297_v19 = vld [vmem:[#allocation2 + $0x2e8] sm:$0xff]  ;;  %657 = vmatpush1.bf16.msra.mxu0 %v631_v15  ;;  %v7561_v21 = vcombine.low %v300_v7, %v304_v8  ;;  %710 = vmatpush1.bf16.msra.mxu1 %v637_v20  ;;  %v7563_v22 = vcombine.low %v301_v12, %v305_v13  ;;  %v315_v3 = vld [vmem:[#allocation2 + $0x378] sm:$0x33]  ;;  %v7574_v9 = vcombine.high %v310_v63, %v314_v1  ;;  %vm2044_vm3 = vsmask.f32 6400 }
  0x3b   : > { %658 = vmatprep.subr.bf16.mxu0 %v7562_v11  ;;  %v7554_v23 = vcombine.high %v292_v14, %v296_v17  ;;  %711 = vmatprep.subr.bf16.mxu1 %v7564_v16  ;;  %v7556_v24 = vcombine.high %v293_v18, %v297_v19  ;;  %v284_v25 = vld [vmem:[#allocation2 + $0x280] sm:$0xff]  ;;  %v285_v27 = vld [vmem:[#allocation2 + $0x288] sm:$0xff]  ;;  %v7553_v29 = vcombine.low %v292_v14, %v296_v17  ;;  %s8242_s24 = scalar_lea.vmem %s11215_s0, %s7907_s17  ;;  %v302_v13 = vld [vmem:[#allocation2 + $0x310] sm:$0xff]  ;;  %vm1435_vm4 = vcmask 1046528   ;;  %s8114_s26 = smov 96  }
  0x3c   : > { %v288_v26 = vld [vmem:[#allocation2 + $0x2a0] sm:$0xff]  ;;  %v289_v28 = vld [vmem:[#allocation2 + $0x2a8] sm:$0xff]  ;;  %v7555_v30 = vcombine.low %v293_v18, %v297_v19  ;;  %v8260_v7 = vld [vmem:[%s8242_s24 + $0x10] ss:$0 sps:$4 sm:$0x33]   ;;  %v7573_v10 = vcombine.low %v310_v63, %v314_v1  ;;  %v7576_v11 = vcombine.high %v311_v2, %v315_v3  ;;  %v7575_v12 = vcombine.low %v311_v2, %v315_v3  ;;  %s8115_s27 = smov 32  }
  0x3d   : > { %v7546_v31 = vcombine.high %v284_v25, %v288_v26  ;;  %v276_v32 = vld [vmem:[#allocation2 + $0x240] sm:$0xff]  ;;  %v7548_v33 = vcombine.high %v285_v27, %v289_v28  ;;  %v277_v35 = vld [vmem:[#allocation2 + $0x248] sm:$0xff]  ;;  %v7545_v37 = vcombine.low %v284_v25, %v288_v26  ;;  %v7547_v39 = vcombine.low %v285_v27, %v289_v28  ;;  %v306_v14 = vld [vmem:[#allocation2 + $0x330] sm:$0xff]  ;;  %s189_s28 = sand.u32 1, %s8096_s13   ;;  %s7906_s5 = sshll.u32 %s8160_s16, 9 }
  0x3e   : > { %659 = vmatpush1.bf16.msra.mxu0 %v7561_v21  ;;  %712 = vmatpush1.bf16.msra.mxu1 %v7563_v22  ;;  %v280_v34 = vld [vmem:[#allocation2 + $0x260] sm:$0xff]  ;;  %v281_v36 = vld [vmem:[#allocation2 + $0x268] sm:$0xff]  ;;  %v303_v15 = vld [vmem:[#allocation2 + $0x318] sm:$0xff]  ;;  %v346_v19 = vshll.u32 %v8260_v7, 16  ;;  %v643_v20 = vsel %vm629_vm0, %v7573_v10, 0  ;;  %v7566_v21 = vcombine.high %v302_v13, %v306_v14  ;;  %v649_v22 = vsel %vm629_vm0, %v7575_v12, 0  ;;  %s11170_s8 = scalar_lea.hbm %s11218_s3, %s7906_s5 }
  0x3f   : > { %660 = vmatprep.subr.bf16.mxu0 %v7554_v23  ;;  %713 = vmatprep.subr.bf16.mxu1 %v7556_v24  ;;  %v8245_v38 = vld [vmem:[%s8242_s24] sm:$0xff]   ;;  %v7538_v40 = vcombine.high %v276_v32, %v280_v34  ;;  %v7540_v41 = vcombine.high %v277_v35, %v281_v36  ;;  %v269_v44 = vld [vmem:[#allocation2 + $0x208] sm:$0xff]  ;;  %v7537_v46 = vcombine.low %v276_v32, %v280_v34  ;;  %v307_v16 = vld [vmem:[#allocation2 + $0x338] sm:$0xff]  ;;  %vm4205_vm5 = vcmask 1041408   ;;  %s7516_s29 = sshll.u32 %s189_s28, 5  ;;  %s11175_s9 = scalar_lea.sflag [#allocation4], %s189_s28 }
  0x40   : > { %v268_v42 = vld [vmem:[#allocation2 + $0x200] sm:$0xff]  ;;  %v273_v45 = vld [vmem:[#allocation2 + $0x228] sm:$0xff]  ;;  %v333_v48 = vshll.u32 %v8245_v38, 16  ;;  %v7539_v49 = vcombine.low %v277_v35, %v281_v36  ;;  %v331_v57 = vshrl.u32 %v8245_v38, 16  ;;  %v7568_v23 = vcombine.high %v303_v15, %v307_v16  ;;  %v294_v24 = vld [vmem:[#allocation2 + $0x2d0] sm:$0xff]  ;;  %s11079_s30 = scalar_lea.vmem [#allocation7], %s7516_s29 }
  0x41   : > { %v272_v43 = vld [vmem:[#allocation2 + $0x220] sm:$0xff]  ;;  %v8248_v47 = vld [vmem:[%s8242_s24 + $0x8] sm:$0xff]   ;;  %v7532_v51 = vcombine.high %v269_v44, %v273_v45  ;;  %v7531_v60 = vcombine.low %v269_v44, %v273_v45  ;;  %v298_v25 = vld [vmem:[#allocation2 + $0x2f0] sm:$0xff]  ;;  %v7565_v28 = vcombine.low %v302_v13, %v306_v14  ;;  %vm5487_vm6 = vcmask 1041409   ;;  %s7424_s4 = sshll.u32 %s11079_s30, 4  ;;  %s8116_s16 = smov [#allocation7]   ;;  %s11165_s4 = int_to_ptr.vmem [resolvable:$true] %s7424_s4 }
  0x42   : > { %661 = vmatpush1.bf16.msra.mxu0 %v7553_v29  ;;  %714 = vmatpush1.bf16.msra.mxu1 %v7555_v30  ;;  %v7530_v50 = vcombine.high %v268_v42, %v272_v43  ;;  %v260_v52 = vld [vmem:[#allocation2 + $0x1c0] sm:$0xff]  ;;  %v261_v54 = vld [vmem:[#allocation2 + $0x1c8] sm:$0xff]  ;;  %v7529_v56 = vcombine.low %v268_v42, %v272_v43  ;;  %v335_v58 = vrot.slane %v333_v48, 1  ;;  %v338_v59 = vshll.u32 %v8248_v47, 16  ;;  %v295_v26 = vld [vmem:[#allocation2 + $0x2d8] sm:$0xff]  ;;  %s8036_s10 = scalar_lea.vmem %s11165_s4, 512 }
  0x43   : > { %662 = vmatprep.subr.bf16.mxu0 %v7546_v31  ;;  %715 = vmatprep.subr.bf16.mxu1 %v7548_v33  ;;  %v264_v53 = vld [vmem:[#allocation2 + $0x1e0] sm:$0xff]  ;;  %v265_v55 = vld [vmem:[#allocation2 + $0x1e8] sm:$0xff]  ;;  %v342_v18 = vshrl.u32 %v8248_v47, 16  ;;  %v299_v27 = vld [vmem:[#allocation2 + $0x2f8] sm:$0xff]  ;;  %v348_v30 = vrot.slane %v346_v19, 1  ;;  %v7567_v31 = vcombine.low %v303_v15, %v307_v16  ;;  %v7558_v32 = vcombine.high %v294_v24, %v298_v25  ;;  %p8037_p10 = scmp.ne.s32.totalorder %s11165_s4, %s8036_s10  ;;  %s8040_s11 = sshll.u32 %s8116_s16, 4  ;;  %s8041_s11 = int_to_ptr.vmem [resolvable:$false] %s8040_s11 }
  0x44   : > { %v7522_v61 = vcombine.high %v260_v52, %v264_v53  ;;  %v7524_v62 = vcombine.high %v261_v54, %v265_v55  ;;  %v7521_v4 = vcombine.low %v260_v52, %v264_v53  ;;  %v336_v5 = vor.u32 %v335_v58, %v331_v57  ;;  %v286_v34 = vld [vmem:[#allocation2 + $0x290] sm:$0xff]  ;;  %v287_v36 = vld [vmem:[#allocation2 + $0x298] sm:$0xff]  ;;  %v251_v10 = vld [vmem:[#allocation2 + $0x180] sm:$0xff]  ;;  %s8042_s17 = scalar_lea.vmem %s8041_s11, 1024  ;;  %p8043_p11 = scmp.lt.s32.totalorder %s11165_s4, %s8041_s11 }
  0x45   : > { %v340_v6 = vrot.slane %v338_v59, 1  ;;  %v7523_v8 = vcombine.low %v261_v54, %v265_v55  ;;  %v7560_v33 = vcombine.high %v295_v26, %v299_v27  ;;  %v290_v35 = vld [vmem:[#allocation2 + $0x2b0] sm:$0xff]  ;;  %v275_v58 = vld [vmem:[#allocation2 + $0x238] sm:$0xff]  ;;  %v252_v12 = vld [vmem:[#allocation2 + $0x188] sm:$0xff]  ;;  %vm5490_vm7 = vcmask 1042434   ;;  %p8038_p12 = pnand %p8037_p10, %p8177_p5  ;;  %p8044_p0 = scmp.lt.s32.totalorder %s8042_s17, %s8036_s10 }
  0x46   : > { %663 = vmatpush1.bf16.msra.mxu0 %v7545_v37  ;;  %716 = vmatpush1.bf16.msra.mxu1 %v7547_v39  ;;  %v291_v37 = vld [vmem:[#allocation2 + $0x2b8] sm:$0xff]  ;;  %v7557_v39 = vcombine.low %v294_v24, %v298_v25  ;;  %v7550_v42 = vcombine.high %v286_v34, %v290_v35  ;;  %v278_v44 = vld [vmem:[#allocation2 + $0x250] sm:$0xff]  ;;  %v256_v13 = vld [vmem:[#allocation2 + $0x1a8] sm:$0x33]  ;;  %vm5493_vm8 = vcmask 1043459   ;;  %vm5496_vm9 = vcmask 1044484  }
  0x47   : > { %664 = vmatprep.subr.bf16.mxu0 %v7538_v40  ;;  %717 = vmatprep.subr.bf16.mxu1 %v7540_v41  ;;  %v8263_v17 = vsel %vm329_vm1, %v336_v5, %v340_v6  ;;  %v344_v29 = vor.u32 %v342_v18, %v340_v6  ;;  %v7559_v41 = vcombine.low %v295_v26, %v299_v27  ;;  %v282_v45 = vld [vmem:[#allocation2 + $0x270] sm:$0xff]  ;;  %v263_v3 = vld [vmem:[#allocation2 + $0x1d8] sm:$0xff]  ;;  %v247_v24 = vld [vmem:[#allocation2 + $0x160] sm:$0xff]  ;;  %vm5499_vm10 = vcmask 1045509   ;;  %p8039_p8 = pneg %p8038_p12  ;;  %p8045_p1 = por %p8044_p0, %p8043_p11 }
  0x48   : > { %v7552_v43 = vcombine.high %v287_v36, %v291_v37  ;;  %v7542_v52 = vcombine.high %v278_v44, %v282_v45  ;;  %v270_v54 = vld [vmem:[#allocation2 + $0x210] sm:$0xff]  ;;  %v244_v25 = vld [vmem:[#allocation2 + $0x148] sm:$0xff]  ;;  %vm5502_vm11 = vcmask 1046534   ;;  %vm5505_vm12 = vcmask 1047559  }
  0x49   : > { %v8282_v40 = vsel %vm329_vm1, %v344_v29, %v348_v30  ;;  %v274_v55 = vld [vmem:[#allocation2 + $0x230] sm:$0xff]  ;;  %v248_v26 = vld [vmem:[#allocation2 + $0x168] sm:$0xff]  ;;  %vm7317_vm13 = vcmask 261120   ;;  %vm7320_vm14 = vcmask 523264   ;;  %vm7323_vm15 = vcmask 785408   ;;  %p8046_p3 = pnand %p8045_p1, %p8039_p8 }
  0x4a   : > { %665 = vmatpush1.bf16.msra.mxu0 %v7537_v46  ;;  %718 = vmatpush1.bf16.msra.mxu1 %v7539_v49  ;;  %v279_v46 = vld [vmem:[#allocation2 + $0x258] sm:$0xff]  ;;  %v262_v1 = vld [vmem:[#allocation2 + $0x1d0] sm:$0xff]  ;;  %v7533_v5 = vcombine.low %v270_v54, %v274_v55  ;;  %v7632_v30 = vcombine.high %v244_v25, %v248_v26 }
  0x4b   : > { %666 = vmatprep.subr.bf16.mxu0 %v7530_v50  ;;  %719 = vmatprep.subr.bf16.mxu1 %v7532_v51  ;;  %v283_v49 = vld [vmem:[#allocation2 + $0x278] sm:$0xff]  ;;  %v7549_v50 = vcombine.low %v286_v34, %v290_v35  ;;  %v7551_v51 = vcombine.low %v287_v36, %v291_v37  ;;  %v266_v2 = vld [vmem:[#allocation2 + $0x1f0] sm:$0xff]  ;;  %v240_v34 = vld [vmem:[#allocation2 + $0x128] sm:$0xff]  ;;  %v7631_v36 = vcombine.low %v244_v25, %v248_v26 }
  0x4c   : > { %v7544_v53 = vcombine.high %v279_v46, %v283_v49  ;;  %v7525_v14 = vcombine.low %v262_v1, %v266_v2  ;;  %v254_v25 = vld [vmem:[#allocation2 + $0x198] sm:$0xff] }
  0x4d   : > { %v258_v26 = vld [vmem:[#allocation2 + $0x1b8] sm:$0x33] }
  0x4e   : > { %667 = vmatpush1.bf16.msra.mxu0 %v7529_v56  ;;  %720 = vmatpush1.bf16.msra.mxu1 %v7531_v60  ;;  %v271_v56 = vld [vmem:[#allocation2 + $0x218] sm:$0xff]  ;;  %v7541_v60 = vcombine.low %v278_v44, %v282_v45  ;;  %v232_v44 = vld [vmem:[#allocation2 + $0xe8] sm:$0xff] }
  0x4f   : > { %668 = vmatprep.subr.bf16.mxu0 %v7522_v61  ;;  %721 = vmatprep.subr.bf16.mxu1 %v7524_v62  ;;  %v7543_v61 = vcombine.low %v279_v46, %v283_v49  ;;  %v7534_v62 = vcombine.high %v270_v54, %v274_v55  ;;  %v7536_v63 = vcombine.high %v271_v56, %v275_v58  ;;  %v219_v54 = vld [vmem:[#allocation2 + $0x80] sm:$0xff] }
  0x50   : > { %v7535_v6 = vcombine.low %v271_v56, %v275_v58  ;;  %v223_v55 = vld [vmem:[#allocation2 + $0xa0] sm:$0xff]  ;;  %v224_v56 = vld [vmem:[#allocation2 + $0xa8] sm:$0xff] }
  0x52   : > { %669 = vmatpush1.bf16.msra.mxu0 %v7521_v4  ;;  %722 = vmatpush1.bf16.msra.mxu1 %v7523_v8  ;;  %v267_v4 = vld [vmem:[#allocation2 + $0x1f8] sm:$0xff]  ;;  %v7526_v8 = vcombine.high %v262_v1, %v266_v2  ;;  %v212_v1 = vld [vmem:[#allocation2 + $0x48] sm:$0xff] }
  0x53   : > { %7583 = vmatprep.subr.msk.bf16.mxu0 %vm629_vm0, %v7574_v9  ;;  %7586 = vmatprep.subr.msk.bf16.mxu1 %vm629_vm0, %v7576_v11  ;;  %v7528_v9 = vcombine.high %v263_v3, %v267_v4  ;;  %v255_v11 = vld [vmem:[#allocation2 + $0x1a0] sm:$0x33]  ;;  %v7527_v15 = vcombine.low %v263_v3, %v267_v4  ;;  %v216_v2 = vld [vmem:[#allocation2 + $0x68] sm:$0xff]  ;;  %v7605_v3 = vcombine.low %v219_v54, %v223_v55 }
  0x54   : > { %v7638_v16 = vcombine.high %v251_v10, %v255_v11 }
  0x55   : > { %7578 = vmatmul.mubr.msk.bf16.vlgmr.msra.gmra.mxu0 %vm622_vm2, %v8263_v17  ;;  %7581 = vmatmul.mubr.msk.bf16.vlgmr.msra.gmra.mxu1 %vm622_vm2, %v8263_v17 }
  0x56   : > { %763 = vmatpush1.bf16.msra.mxu0 %v643_v20  ;;  %816 = vmatpush1.bf16.msra.mxu1 %v649_v22  ;;  %v7637_v20 = vcombine.low %v251_v10, %v255_v11  ;;  %v7639_v22 = vcombine.low %v252_v12, %v256_v13  ;;  %v207_v10 = vld [vmem:[#allocation2 + $0x20] sm:$0xff]  ;;  %v204_v11 = vld [vmem:[#allocation2 + $0x8] sm:$0xff] }
  0x57   : > { %764 = vmatprep.subr.bf16.mxu0 %v7566_v21  ;;  %817 = vmatprep.subr.bf16.mxu1 %v7568_v23  ;;  %v7640_v21 = vcombine.high %v252_v12, %v256_v13  ;;  %v243_v23 = vld [vmem:[#allocation2 + $0x140] sm:$0xff]  ;;  %v208_v12 = vld [vmem:[#allocation2 + $0x28] sm:$0xff] }
  0x58   : > { %696 = vmatprep.mubr.bf16.mxu0 %v8110_v0  ;;  %749 = vmatprep.mubr.bf16.mxu1 %v8110_v0  ;;  %v1143_v27 = vsel %vm629_vm0, %v7637_v20, 0  ;;  %v1149_v29 = vsel %vm629_vm0, %v7639_v22, 0  ;;  %v7629_v35 = vcombine.low %v243_v23, %v247_v24  ;;  %v7592_v22 = vcombine.high %v204_v11, %v208_v12 }
  0x5a   : > { %765 = vmatpush1.bf16.msra.mxu0 %v7565_v28  ;;  %818 = vmatpush1.bf16.msra.mxu1 %v7567_v31  ;;  %v7630_v28 = vcombine.high %v243_v23, %v247_v24  ;;  %v235_v31 = vld [vmem:[#allocation2 + $0x100] sm:$0xff]  ;;  %v253_v23 = vld [vmem:[#allocation2 + $0x190] sm:$0xff] }
  0x5b   : > { %766 = vmatprep.subr.bf16.mxu0 %v7558_v32  ;;  %819 = vmatprep.subr.bf16.mxu1 %v7560_v33  ;;  %v239_v32 = vld [vmem:[#allocation2 + $0x120] sm:$0xff]  ;;  %v236_v33 = vld [vmem:[#allocation2 + $0x108] sm:$0xff]  ;;  %v257_v24 = vld [vmem:[#allocation2 + $0x1b0] sm:$0x33] }
  0x5c   : > { %v7622_v37 = vcombine.high %v235_v31, %v239_v32  ;;  %v7621_v45 = vcombine.low %v235_v31, %v239_v32  ;;  %v7623_v46 = vcombine.low %v236_v33, %v240_v34  ;;  %v7644_v31 = vcombine.high %v254_v25, %v258_v26 }
  0x5d   : > { %7579 = vmatmul.mubr.msk.bf16.gmra.mxu0 %vm622_vm2, %v8282_v40  ;;  %7582 = vmatmul.mubr.msk.bf16.gmra.mxu1 %vm622_vm2, %v8282_v40  ;;  %v7643_v32 = vcombine.low %v254_v25, %v258_v26  ;;  %v1428_v25 = vld [vmem:[#allocation2 + $0x508] sm:$0xff] }
  0x5e   : > { %767 = vmatpush1.bf16.msra.mxu0 %v7557_v39  ;;  %820 = vmatpush1.bf16.msra.mxu1 %v7559_v41  ;;  %v7624_v39 = vcombine.high %v236_v33, %v240_v34  ;;  %v227_v41 = vld [vmem:[#allocation2 + $0xc0] sm:$0xff]  ;;  %v245_v33 = vld [vmem:[#allocation2 + $0x150] sm:$0xff]  ;;  %v1432_v26 = vld [vmem:[#allocation2 + $0x528] sm:$0x33] }
  0x5f   : > { %768 = vmatprep.subr.bf16.mxu0 %v7550_v42  ;;  %821 = vmatprep.subr.bf16.mxu1 %v7552_v43  ;;  %v231_v42 = vld [vmem:[#allocation2 + $0xe0] sm:$0xff]  ;;  %v228_v43 = vld [vmem:[#allocation2 + $0xc8] sm:$0xff]  ;;  %v249_v34 = vld [vmem:[#allocation2 + $0x170] sm:$0xff] }
  0x60   : > { %792 = vmatprep.mubr.bf16.mxu0 %v8110_v0  ;;  %845 = vmatprep.mubr.bf16.mxu1 %v8110_v0  ;;  %v7614_v49 = vcombine.high %v227_v41, %v231_v42  ;;  %v7613_v58 = vcombine.low %v227_v41, %v231_v42  ;;  %v1161_v41 = vsel %vm629_vm0, %v7643_v32, 0  ;;  %v7707_v32 = vcombine.low %v1428_v25, %v1432_v26 }
  0x62   : > { %769 = vmatpush1.bf16.msra.mxu0 %v7549_v50  ;;  %822 = vmatpush1.bf16.msra.mxu1 %v7551_v51  ;;  %v2046_v50 = vrot.slane %v333_v48, 2  ;;  %v2049_v51 = vrot.slane %v338_v59, 2  ;;  %v7615_v48 = vcombine.low %v228_v43, %v232_v44  ;;  %v7606_v59 = vcombine.high %v219_v54, %v223_v55  ;;  %v230_v54 = vld [vmem:[#allocation2 + $0xd8] sm:$0xff] }
  0x63   : > { %770 = vmatprep.subr.bf16.mxu0 %v7542_v52  ;;  %823 = vmatprep.subr.bf16.mxu1 %v7544_v53  ;;  %v2048_v52 = vrot.slane %v342_v18, 1  ;;  %v7616_v53 = vcombine.high %v228_v43, %v232_v44  ;;  %v237_v43 = vld [vmem:[#allocation2 + $0x110] sm:$0xff]  ;;  %v234_v55 = vld [vmem:[#allocation2 + $0xf8] sm:$0xff] }
  0x64   : > { %v241_v44 = vld [vmem:[#allocation2 + $0x130] sm:$0xff] }
  0x66   : > { %771 = vmatpush1.bf16.msra.mxu0 %v7541_v60  ;;  %824 = vmatpush1.bf16.msra.mxu1 %v7543_v61  ;;  %v211_v60 = vld [vmem:[#allocation2 + $0x40] sm:$0xff] }
  0x67   : > { %772 = vmatprep.subr.bf16.mxu0 %v7534_v62  ;;  %825 = vmatprep.subr.bf16.mxu1 %v7536_v63  ;;  %v215_v61 = vld [vmem:[#allocation2 + $0x60] sm:$0xff]  ;;  %v2050_v63 = vor.u32 %v2049_v51, %v2048_v52  ;;  %v229_v52 = vld [vmem:[#allocation2 + $0xd0] sm:$0xff] }
  0x6a   : > { %773 = vmatpush1.bf16.msra.mxu0 %v7533_v5  ;;  %826 = vmatpush1.bf16.msra.mxu1 %v7535_v6  ;;  %v7598_v5 = vcombine.high %v211_v60, %v215_v61  ;;  %v2052_v6 = vshrl.u32 %v8260_v7, 16 }
  0x6b   : > { %774 = vmatprep.subr.bf16.mxu0 %v7526_v8  ;;  %827 = vmatprep.subr.bf16.mxu1 %v7528_v9  ;;  %v7600_v8 = vcombine.high %v212_v1, %v216_v2  ;;  %v203_v9 = vld [vmem:[#allocation2] sm:$0xff] }
  0x6c   : > { %v2054_v13 = vrot.slane %v2052_v6, 1  ;;  %v7590_v20 = vcombine.high %v203_v9, %v207_v10  ;;  %v218_v6 = vld [vmem:[#allocation2 + $0x78] sm:$0xff] }
  0x6e   : > { %775 = vmatpush1.bf16.msra.mxu0 %v7525_v14  ;;  %828 = vmatpush1.bf16.msra.mxu1 %v7527_v15  ;;  %v2055_v14 = vrot.slane %v346_v19, 2  ;;  %v7597_v15 = vcombine.low %v211_v60, %v215_v61  ;;  %v7591_v19 = vcombine.low %v204_v11, %v208_v12  ;;  %v222_v60 = vld [vmem:[#allocation2 + $0x98] sm:$0xff]  ;;  %v205_v12 = vld [vmem:[#allocation2 + $0x10] sm:$0xff] }
  0x6f   : > { %7645 = vmatprep.subr.msk.bf16.mxu0 %vm629_vm0, %v7638_v16  ;;  %7648 = vmatprep.subr.msk.bf16.mxu1 %vm629_vm0, %v7640_v21  ;;  %v7599_v16 = vcombine.low %v212_v1, %v216_v2  ;;  %v226_v61 = vld [vmem:[#allocation2 + $0xb8] sm:$0xff] }
  0x70   : > { %v2056_v21 = vor.u32 %v2055_v14, %v2054_v13  ;;  %v7612_v2 = vcombine.high %v222_v60, %v226_v61  ;;  %v209_v13 = vld [vmem:[#allocation2 + $0x30] sm:$0xff]  ;;  %v206_v14 = vld [vmem:[#allocation2 + $0x18] sm:$0xff] }
  0x71   : > { %7584 = vmatmul.mubr.msk.bf16.vlgmr.msra.gmra.mxu0 %vm622_vm2, %v8263_v17  ;;  %7587 = vmatmul.mubr.msk.bf16.vlgmr.msra.gmra.mxu1 %vm622_vm2, %v8263_v17  ;;  %v2045_v17 = vrot.slane %v331_v57, 1  ;;  %v220_v57 = vld [vmem:[#allocation2 + $0x88] sm:$0xff] }
  0x72   : > { %1169 = vmatpush1.bf16.msra.mxu0 %v1143_v27  ;;  %1222 = vmatpush1.bf16.msra.mxu1 %v1149_v29  ;;  %v7608_v18 = vcombine.high %v220_v57, %v224_v56  ;;  %v7607_v4 = vcombine.low %v220_v57, %v224_v56  ;;  %v8321_v27 = vsel %vm2044_vm3, %v2050_v63, %v2056_v21 }
  0x73   : > { %1170 = vmatprep.subr.bf16.mxu0 %v7630_v28  ;;  %1223 = vmatprep.subr.bf16.mxu1 %v7632_v30  ;;  %v2047_v62 = vor.u32 %v2046_v50, %v2045_v17  ;;  %v7589_v28 = vcombine.low %v203_v9, %v207_v10  ;;  %v7642_v29 = vcombine.high %v253_v23, %v257_v24  ;;  %v242_v17 = vld [vmem:[#allocation2 + $0x138] sm:$0xff] }
  0x74   : > { %802 = vmatprep.mubr.bf16.mxu0 %v8110_v0  ;;  %855 = vmatprep.mubr.bf16.mxu1 %v8110_v0  ;;  %v7641_v30 = vcombine.low %v253_v23, %v257_v24  ;;  %v7626_v50 = vcombine.high %v237_v43, %v241_v44  ;;  %v7625_v57 = vcombine.low %v237_v43, %v241_v44  ;;  %v1427_v23 = vld [vmem:[#allocation2 + $0x500] sm:$0xff] }
  0x75   : > { %v7611_v9 = vcombine.low %v222_v60, %v226_v61  ;;  %v7594_v21 = vcombine.high %v205_v12, %v209_v13  ;;  %v1431_v24 = vld [vmem:[#allocation2 + $0x520] sm:$0x33]  ;;  %v1396_v60 = vld [vmem:[#allocation2 + $0x408] sm:$0xff] }
  0x76   : > { %1171 = vmatpush1.bf16.msra.mxu0 %v7629_v35  ;;  %1224 = vmatpush1.bf16.msra.mxu1 %v7631_v36  ;;  %v246_v35 = vld [vmem:[#allocation2 + $0x158] sm:$0xff]  ;;  %v1411_v43 = vld [vmem:[#allocation2 + $0x480] sm:$0xff]  ;;  %v1400_v61 = vld [vmem:[#allocation2 + $0x428] sm:$0xff] }
  0x77   : > { %1172 = vmatprep.subr.bf16.mxu0 %v7622_v37  ;;  %1225 = vmatprep.subr.bf16.mxu1 %v7624_v39  ;;  %v250_v36 = vld [vmem:[#allocation2 + $0x178] sm:$0xff]  ;;  %v1155_v37 = vsel %vm629_vm0, %v7641_v30, 0  ;;  %v7634_v39 = vcombine.high %v245_v33, %v249_v34  ;;  %v7705_v30 = vcombine.low %v1427_v23, %v1431_v24  ;;  %v1415_v44 = vld [vmem:[#allocation2 + $0x4a0] sm:$0xff] }
  0x78   : > { %v7636_v42 = vcombine.high %v246_v35, %v250_v36 }
  0x79   : > { %7585 = vmatmul.mubr.msk.bf16.gmra.mxu0 %vm622_vm2, %v8282_v40  ;;  %7588 = vmatmul.mubr.msk.bf16.gmra.mxu1 %vm622_vm2, %v8282_v40  ;;  %v8315_v40 = vsel %vm2044_vm3, %v2047_v62, %v2050_v63  ;;  %v7619_v63 = vcombine.low %v230_v54, %v234_v55 }
  0x7a   : > { %1173 = vmatpush1.bf16.msra.mxu0 %v7621_v45  ;;  %1226 = vmatpush1.bf16.msra.mxu1 %v7623_v46  ;;  %v238_v45 = vld [vmem:[#allocation2 + $0x118] sm:$0xff]  ;;  %v7633_v46 = vcombine.low %v245_v33, %v249_v34  ;;  %v1419_v33 = vld [vmem:[#allocation2 + $0x4c0] sm:$0xff] }
  0x7b   : > { %1174 = vmatprep.subr.bf16.mxu0 %v7614_v49  ;;  %1227 = vmatprep.subr.bf16.mxu1 %v7616_v53  ;;  %v7635_v49 = vcombine.low %v246_v35, %v250_v36  ;;  %v7628_v51 = vcombine.high %v238_v45, %v242_v17  ;;  %v233_v53 = vld [vmem:[#allocation2 + $0xf0] sm:$0xff]  ;;  %v7627_v56 = vcombine.low %v238_v45, %v242_v17  ;;  %v1423_v34 = vld [vmem:[#allocation2 + $0x4e0] sm:$0xff]  ;;  %v1420_v35 = vld [vmem:[#allocation2 + $0x4c8] sm:$0xff] }
  0x7c   : > { %1198 = vmatprep.mubr.bf16.mxu0 %v8110_v0  ;;  %1251 = vmatprep.mubr.bf16.mxu1 %v8110_v0  ;;  %v7617_v62 = vcombine.low %v229_v52, %v233_v53  ;;  %v1424_v36 = vld [vmem:[#allocation2 + $0x4e8] sm:$0xff] }
  0x7d   : > { %v1412_v45 = vld [vmem:[#allocation2 + $0x488] sm:$0xff] }
  0x7e   : > { %1175 = vmatpush1.bf16.msra.mxu0 %v7613_v58  ;;  %1228 = vmatpush1.bf16.msra.mxu1 %v7615_v48  ;;  %v7618_v58 = vcombine.high %v229_v52, %v233_v53  ;;  %v7620_v48 = vcombine.high %v230_v54, %v234_v55  ;;  %v1416_v17 = vld [vmem:[#allocation2 + $0x4a8] sm:$0xff]  ;;  %v1403_v52 = vld [vmem:[#allocation2 + $0x440] sm:$0xff] }
  0x7f   : > { %1176 = vmatprep.subr.bf16.mxu0 %v7606_v59  ;;  %1229 = vmatprep.subr.bf16.mxu1 %v7608_v18  ;;  %v221_v59 = vld [vmem:[#allocation2 + $0x90] sm:$0xff]  ;;  %v1407_v53 = vld [vmem:[#allocation2 + $0x460] sm:$0xff]  ;;  %v1404_v54 = vld [vmem:[#allocation2 + $0x448] sm:$0xff] }
  0x80   : > { %v225_v18 = vld [vmem:[#allocation2 + $0xb0] sm:$0xff]  ;;  %v1408_v55 = vld [vmem:[#allocation2 + $0x468] sm:$0xff] }
  0x81   : > { %v7610_v1 = vcombine.high %v221_v59, %v225_v18 }
  0x82   : > { %1177 = vmatpush1.bf16.msra.mxu0 %v7605_v3  ;;  %1230 = vmatpush1.bf16.msra.mxu1 %v7607_v4  ;;  %v213_v3 = vld [vmem:[#allocation2 + $0x50] sm:$0xff] }
  0x83   : > { %1178 = vmatprep.subr.bf16.mxu0 %v7598_v5  ;;  %1231 = vmatprep.subr.bf16.mxu1 %v7600_v8  ;;  %v217_v4 = vld [vmem:[#allocation2 + $0x70] sm:$0xff]  ;;  %v214_v5 = vld [vmem:[#allocation2 + $0x58] sm:$0xff]  ;;  %v7609_v8 = vcombine.low %v221_v59, %v225_v18  ;;  %v1395_v59 = vld [vmem:[#allocation2 + $0x400] sm:$0xff] }
  0x84   : > { %v7602_v10 = vcombine.high %v213_v3, %v217_v4  ;;  %v7604_v11 = vcombine.high %v214_v5, %v218_v6  ;;  %v1399_v18 = vld [vmem:[#allocation2 + $0x420] sm:$0xff] }
  0x86   : > { %1179 = vmatpush1.bf16.msra.mxu0 %v7597_v15  ;;  %1232 = vmatpush1.bf16.msra.mxu1 %v7599_v16  ;;  %v210_v15 = vld [vmem:[#allocation2 + $0x38] sm:$0xff]  ;;  %v7601_v16 = vcombine.low %v213_v3, %v217_v4  ;;  %v1387_v3 = vld [vmem:[#allocation2 + $0x3c0] sm:$0xff] }
  0x87   : > { %1180 = vmatprep.subr.bf16.mxu0 %v7590_v20  ;;  %1233 = vmatprep.subr.bf16.mxu1 %v7592_v22  ;;  %v7603_v20 = vcombine.low %v214_v5, %v218_v6  ;;  %v7596_v22 = vcombine.high %v206_v14, %v210_v15  ;;  %v1391_v4 = vld [vmem:[#allocation2 + $0x3e0] sm:$0xff]  ;;  %v1388_v5 = vld [vmem:[#allocation2 + $0x3c8] sm:$0xff] }
  0x88   : > { %v1392_v6 = vld [vmem:[#allocation2 + $0x3e8] sm:$0xff] }
  0x8a   : > { %1181 = vmatpush1.bf16.msra.mxu0 %v7589_v28  ;;  %1234 = vmatpush1.bf16.msra.mxu1 %v7591_v19  ;;  %v7593_v28 = vcombine.low %v205_v12, %v209_v13  ;;  %v7595_v19 = vcombine.low %v206_v14, %v210_v15  ;;  %v1379_v12 = vld [vmem:[#allocation2 + $0x380] sm:$0xff]  ;;  %v1380_v14 = vld [vmem:[#allocation2 + $0x388] sm:$0xff] }
  0x8b   : > { %7651 = vmatprep.subr.msk.bf16.mxu0 %vm629_vm0, %v7642_v29  ;;  %7654 = vmatprep.subr.msk.bf16.mxu1 %vm629_vm0, %v7644_v31  ;;  %v7706_v29 = vcombine.high %v1427_v23, %v1431_v24  ;;  %v7708_v31 = vcombine.high %v1428_v25, %v1432_v26  ;;  %v1383_v13 = vld [vmem:[#allocation2 + $0x3a0] sm:$0xff]  ;;  %v1384_v15 = vld [vmem:[#allocation2 + $0x3a8] sm:$0xff]  ;;  %v1429_v23 = vld [vmem:[#allocation2 + $0x510] sm:$0xff] }
  0x8c   : > { %v1433_v24 = vld [vmem:[#allocation2 + $0x530] sm:$0x33]  ;;  %v1430_v25 = vld [vmem:[#allocation2 + $0x518] sm:$0xff] }
  0x8d   : > { %7646 = vmatmul.mubr.msk.bf16.vlgmr.msra.gmra.mxu0 %vm622_vm2, %v8245_v38  ;;  %7649 = vmatmul.mubr.msk.bf16.vlgmr.msra.gmra.mxu1 %vm622_vm2, %v8245_v38  ;;  %v1434_v26 = vld [vmem:[#allocation2 + $0x538] sm:$0x33] }
  0x8e   : > { %1275 = vmatpush1.bf16.msra.mxu0 %v1155_v37  ;;  %1328 = vmatpush1.bf16.msra.mxu1 %v1161_v41  ;;  %v1720_v37 = vsel %vm629_vm0, %v7705_v30, 0  ;;  %v1726_v41 = vsel %vm629_vm0, %v7707_v32, 0  ;;  %v7659_v30 = vcombine.low %v1380_v14, %v1384_v15  ;;  %v7709_v32 = vcombine.low %v1429_v23, %v1433_v24 }
  0x8f   : > { %1276 = vmatprep.subr.bf16.mxu0 %v7634_v39  ;;  %1329 = vmatprep.subr.bf16.mxu1 %v7636_v42  ;;  %v7698_v39 = vcombine.high %v1419_v33, %v1423_v34  ;;  %v7700_v42 = vcombine.high %v1420_v35, %v1424_v36 }
  0x90   : > { %1208 = vmatprep.mubr.bf16.mxu0 %v8110_v0  ;;  %1261 = vmatprep.mubr.bf16.mxu1 %v8110_v0 }
  0x92   : > { %1277 = vmatpush1.bf16.msra.mxu0 %v7633_v46  ;;  %1330 = vmatpush1.bf16.msra.mxu1 %v7635_v49  ;;  %v7697_v46 = vcombine.low %v1419_v33, %v1423_v34  ;;  %v7699_v49 = vcombine.low %v1420_v35, %v1424_v36  ;;  %v7712_v33 = vcombine.high %v1430_v25, %v1434_v26  ;;  %v1421_v35 = vld [vmem:[#allocation2 + $0x4d0] sm:$0xff] }
  0x93   : > { %1278 = vmatprep.subr.bf16.mxu0 %v7626_v50  ;;  %1331 = vmatprep.subr.bf16.mxu1 %v7628_v51  ;;  %v7690_v50 = vcombine.high %v1411_v43, %v1415_v44  ;;  %v7692_v51 = vcombine.high %v1412_v45, %v1416_v17  ;;  %v7711_v34 = vcombine.low %v1430_v25, %v1434_v26  ;;  %v1425_v36 = vld [vmem:[#allocation2 + $0x4f0] sm:$0xff]  ;;  %v2036_v25 = vld [vmem:[#allocation2 + $0x6c0] sm:$0xff] }
  0x94   : > { %v2040_v26 = vld [vmem:[#allocation2 + $0x6e0] sm:$0x33] }
  0x95   : > { %7647 = vmatmul.mubr.msk.bf16.gmra.mxu0 %vm622_vm2, %v8248_v47  ;;  %7650 = vmatmul.mubr.msk.bf16.gmra.mxu1 %vm622_vm2, %v8248_v47 }
  0x96   : > { %1279 = vmatpush1.bf16.msra.mxu0 %v7625_v57  ;;  %1332 = vmatpush1.bf16.msra.mxu1 %v7627_v56  ;;  %v7689_v57 = vcombine.low %v1411_v43, %v1415_v44  ;;  %v7691_v56 = vcombine.low %v1412_v45, %v1416_v17  ;;  %v1413_v44 = vld [vmem:[#allocation2 + $0x490] sm:$0xff]  ;;  %v1414_v17 = vld [vmem:[#allocation2 + $0x498] sm:$0xff] }
  0x97   : > { %1280 = vmatprep.subr.bf16.mxu0 %v7618_v58  ;;  %1333 = vmatprep.subr.bf16.mxu1 %v7620_v48  ;;  %v7682_v58 = vcombine.high %v1403_v52, %v1407_v53  ;;  %v7684_v48 = vcombine.high %v1404_v54, %v1408_v55  ;;  %v1417_v45 = vld [vmem:[#allocation2 + $0x4b0] sm:$0xff] }
  0x98   : > { %1304 = vmatprep.mubr.bf16.mxu0 %v8110_v0  ;;  %1357 = vmatprep.mubr.bf16.mxu1 %v8110_v0 }
  0x9a   : > { %1281 = vmatpush1.bf16.msra.mxu0 %v7617_v62  ;;  %1334 = vmatpush1.bf16.msra.mxu1 %v7619_v63  ;;  %v7681_v62 = vcombine.low %v1403_v52, %v1407_v53  ;;  %v7683_v63 = vcombine.low %v1404_v54, %v1408_v55  ;;  %v7694_v52 = vcombine.high %v1413_v44, %v1417_v45  ;;  %v1405_v54 = vld [vmem:[#allocation2 + $0x450] sm:$0xff] }
  0x9b   : > { %1282 = vmatprep.subr.bf16.mxu0 %v7610_v1  ;;  %1335 = vmatprep.subr.bf16.mxu1 %v7612_v2  ;;  %v7674_v1 = vcombine.high %v1395_v59, %v1399_v18  ;;  %v7676_v2 = vcombine.high %v1396_v60, %v1400_v61  ;;  %v1409_v55 = vld [vmem:[#allocation2 + $0x470] sm:$0xff] }
  0x9e   : > { %1283 = vmatpush1.bf16.msra.mxu0 %v7609_v8  ;;  %1336 = vmatpush1.bf16.msra.mxu1 %v7611_v9  ;;  %v7673_v8 = vcombine.low %v1395_v59, %v1399_v18  ;;  %v7675_v9 = vcombine.low %v1396_v60, %v1400_v61  ;;  %v7686_v59 = vcombine.high %v1405_v54, %v1409_v55  ;;  %v1397_v60 = vld [vmem:[#allocation2 + $0x410] sm:$0xff] }
  0x9f   : > { %1284 = vmatprep.subr.bf16.mxu0 %v7602_v10  ;;  %1337 = vmatprep.subr.bf16.mxu1 %v7604_v11  ;;  %v7666_v10 = vcombine.high %v1387_v3, %v1391_v4  ;;  %v7668_v11 = vcombine.high %v1388_v5, %v1392_v6  ;;  %v1401_v61 = vld [vmem:[#allocation2 + $0x430] sm:$0xff] }
  0xa2   : > { %1285 = vmatpush1.bf16.msra.mxu0 %v7601_v16  ;;  %1338 = vmatpush1.bf16.msra.mxu1 %v7603_v20  ;;  %v7665_v16 = vcombine.low %v1387_v3, %v1391_v4  ;;  %v7667_v20 = vcombine.low %v1388_v5, %v1392_v6  ;;  %v7678_v3 = vcombine.high %v1397_v60, %v1401_v61  ;;  %v1389_v5 = vld [vmem:[#allocation2 + $0x3d0] sm:$0xff] }
  0xa3   : > { %1286 = vmatprep.subr.bf16.mxu0 %v7594_v21  ;;  %1339 = vmatprep.subr.bf16.mxu1 %v7596_v22  ;;  %v7658_v21 = vcombine.high %v1379_v12, %v1383_v13  ;;  %v7660_v22 = vcombine.high %v1380_v14, %v1384_v15  ;;  %v1393_v6 = vld [vmem:[#allocation2 + $0x3f0] sm:$0xff] }
  0xa4   : > { %v1381_v14 = vld [vmem:[#allocation2 + $0x390] sm:$0xff] }
  0xa5   : > { %v1385_v15 = vld [vmem:[#allocation2 + $0x3b0] sm:$0xff] }
  0xa6   : > { %1287 = vmatpush1.bf16.msra.mxu0 %v7593_v28  ;;  %1340 = vmatpush1.bf16.msra.mxu1 %v7595_v19  ;;  %v7657_v28 = vcombine.low %v1379_v12, %v1383_v13  ;;  %v1436_v19 = vrot.slane %v8245_v38, 1  ;;  %v7670_v12 = vcombine.high %v1389_v5, %v1393_v6 }
  0xa7   : > { %7713 = vmatprep.subr.msk.bf16.mxu0 %vm629_vm0, %v7706_v29  ;;  %7716 = vmatprep.subr.msk.bf16.mxu1 %vm629_vm0, %v7708_v31  ;;  %v1437_v29 = vrot.slane %v8248_v47, 1  ;;  %v7710_v31 = vcombine.high %v1429_v23, %v1433_v24  ;;  %v7662_v23 = vcombine.high %v1381_v14, %v1385_v15 }
  0xa9   : > { %7652 = vmatmul.mubr.msk.bf16.vlgmr.msra.gmra.mxu0 %vm622_vm2, %v8245_v38  ;;  %7655 = vmatmul.mubr.msk.bf16.vlgmr.msra.gmra.mxu1 %vm622_vm2, %v8245_v38  ;;  %v1732_v38 = vsel %vm629_vm0, %v7709_v32, 0  ;;  %v7773_v32 = vcombine.low %v2036_v25, %v2040_v26 }
  0xaa   : > { %1746 = vmatpush1.bf16.msra.mxu0 %v1720_v37  ;;  %1799 = vmatpush1.bf16.msra.mxu1 %v1726_v41  ;;  %v1422_v37 = vld [vmem:[#allocation2 + $0x4d8] sm:$0xff]  ;;  %v8358_v41 = vsel %vm1435_vm4, %v1436_v19, %v1437_v29  ;;  %v2041_v19 = vld [vmem:[#allocation2 + $0x6e8] sm:$0x33] }
  0xab   : > { %1747 = vmatprep.subr.bf16.mxu0 %v7698_v39  ;;  %1800 = vmatprep.subr.bf16.mxu1 %v7700_v42  ;;  %v1426_v39 = vld [vmem:[#allocation2 + $0x4f8] sm:$0xff]  ;;  %v1738_v42 = vsel %vm629_vm0, %v7711_v34, 0 }
  0xac   : > { %1314 = vmatprep.mubr.bf16.mxu0 %v8110_v0  ;;  %1367 = vmatprep.mubr.bf16.mxu1 %v8110_v0  ;;  %v7704_v43 = vcombine.high %v1422_v37, %v1426_v39 }
  0xae   : > { %1748 = vmatpush1.bf16.msra.mxu0 %v7697_v46  ;;  %1801 = vmatpush1.bf16.msra.mxu1 %v7699_v49  ;;  %v1418_v46 = vld [vmem:[#allocation2 + $0x4b8] sm:$0xff]  ;;  %v7701_v49 = vcombine.low %v1421_v35, %v1425_v36 }
  0xaf   : > { %1749 = vmatprep.subr.bf16.mxu0 %v7690_v50  ;;  %1802 = vmatprep.subr.bf16.mxu1 %v7692_v51  ;;  %v1439_v50 = vrot.slane %v8260_v7, 1  ;;  %v7703_v51 = vcombine.low %v1422_v37, %v1426_v39  ;;  %v7696_v53 = vcombine.high %v1414_v17, %v1418_v46  ;;  %v7695_v7 = vcombine.low %v1414_v17, %v1418_v46  ;;  %v2029_v37 = vld [vmem:[#allocation2 + $0x688] sm:$0xff] }
  0xb0   : > { %v2033_v39 = vld [vmem:[#allocation2 + $0x6a8] sm:$0xff] }
  0xb1   : > { %7653 = vmatmul.mubr.msk.bf16.gmra.mxu0 %vm622_vm2, %v8248_v47  ;;  %7656 = vmatmul.mubr.msk.bf16.gmra.mxu1 %vm622_vm2, %v8248_v47  ;;  %v7702_v47 = vcombine.high %v1421_v35, %v1425_v36  ;;  %v2028_v35 = vld [vmem:[#allocation2 + $0x680] sm:$0xff]  ;;  %v2021_v17 = vld [vmem:[#allocation2 + $0x648] sm:$0xff] }
  0xb2   : > { %1750 = vmatpush1.bf16.msra.mxu0 %v7689_v57  ;;  %1803 = vmatpush1.bf16.msra.mxu1 %v7691_v56  ;;  %v1406_v57 = vld [vmem:[#allocation2 + $0x458] sm:$0xff]  ;;  %v2032_v36 = vld [vmem:[#allocation2 + $0x6a0] sm:$0xff]  ;;  %v2025_v46 = vld [vmem:[#allocation2 + $0x668] sm:$0xff] }
  0xb3   : > { %1751 = vmatprep.subr.bf16.mxu0 %v7682_v58  ;;  %1804 = vmatprep.subr.bf16.mxu1 %v7684_v48  ;;  %v1410_v56 = vld [vmem:[#allocation2 + $0x478] sm:$0xff]  ;;  %v8372_v58 = vsel %vm1435_vm4, %v1437_v29, %v1439_v50  ;;  %v7693_v48 = vcombine.low %v1413_v44, %v1417_v45  ;;  %v7661_v29 = vcombine.low %v1381_v14, %v1385_v15  ;;  %v2020_v44 = vld [vmem:[#allocation2 + $0x640] sm:$0xff]  ;;  %v1993_v14 = vld [vmem:[#allocation2 + $0x568] sm:$0xff] }
  0xb4   : > { %1775 = vmatprep.mubr.bf16.mxu0 %v8110_v0  ;;  %1828 = vmatprep.mubr.bf16.mxu1 %v8110_v0  ;;  %v7688_v18 = vcombine.high %v1406_v57, %v1410_v56  ;;  %v2024_v45 = vld [vmem:[#allocation2 + $0x660] sm:$0xff]  ;;  %v7767_v50 = vcombine.low %v2029_v37, %v2033_v39 }
  0xb6   : > { %1752 = vmatpush1.bf16.msra.mxu0 %v7681_v62  ;;  %1805 = vmatpush1.bf16.msra.mxu1 %v7683_v63  ;;  %v1398_v62 = vld [vmem:[#allocation2 + $0x418] sm:$0xff] }
  0xb7   : > { %1753 = vmatprep.subr.bf16.mxu0 %v7674_v1  ;;  %1806 = vmatprep.subr.bf16.mxu1 %v7676_v2  ;;  %v1402_v63 = vld [vmem:[#allocation2 + $0x438] sm:$0xff]  ;;  %v7685_v1 = vcombine.low %v1405_v54, %v1409_v55  ;;  %v7687_v2 = vcombine.low %v1406_v57, %v1410_v56  ;;  %v2016_v54 = vld [vmem:[#allocation2 + $0x620] sm:$0xff]  ;;  %v2013_v55 = vld [vmem:[#allocation2 + $0x608] sm:$0xff]  ;;  %v7757_v56 = vcombine.low %v2020_v44, %v2024_v45 }
  0xb8   : > { %v7680_v4 = vcombine.high %v1398_v62, %v1402_v63  ;;  %v2017_v57 = vld [vmem:[#allocation2 + $0x628] sm:$0xff] }
  0xba   : > { %1754 = vmatpush1.bf16.msra.mxu0 %v7673_v8  ;;  %1807 = vmatpush1.bf16.msra.mxu1 %v7675_v9  ;;  %v1390_v8 = vld [vmem:[#allocation2 + $0x3d8] sm:$0xff] }
  0xbb   : > { %1755 = vmatprep.subr.bf16.mxu0 %v7666_v10  ;;  %1808 = vmatprep.subr.bf16.mxu1 %v7668_v11  ;;  %v1394_v9 = vld [vmem:[#allocation2 + $0x3f8] sm:$0xff]  ;;  %v7677_v10 = vcombine.low %v1397_v60, %v1401_v61  ;;  %v7679_v11 = vcombine.low %v1398_v62, %v1402_v63  ;;  %v2005_v60 = vld [vmem:[#allocation2 + $0x5c8] sm:$0xff]  ;;  %v7751_v63 = vcombine.low %v2013_v55, %v2017_v57 }
  0xbc   : > { %v7672_v13 = vcombine.high %v1390_v8, %v1394_v9  ;;  %v2009_v61 = vld [vmem:[#allocation2 + $0x5e8] sm:$0xff] }
  0xbe   : > { %1756 = vmatpush1.bf16.msra.mxu0 %v7665_v16  ;;  %1809 = vmatpush1.bf16.msra.mxu1 %v7667_v20  ;;  %v1382_v16 = vld [vmem:[#allocation2 + $0x398] sm:$0xff] }
  0xbf   : > { %1757 = vmatprep.subr.bf16.mxu0 %v7658_v21  ;;  %1810 = vmatprep.subr.bf16.mxu1 %v7660_v22  ;;  %v1386_v20 = vld [vmem:[#allocation2 + $0x3b8] sm:$0xff]  ;;  %v7669_v21 = vcombine.low %v1389_v5, %v1393_v6  ;;  %v7671_v22 = vcombine.low %v1390_v8, %v1394_v9  ;;  %v1997_v5 = vld [vmem:[#allocation2 + $0x588] sm:$0xff] }
  0xc0   : > { %v7664_v24 = vcombine.high %v1382_v16, %v1386_v20  ;;  %v2001_v6 = vld [vmem:[#allocation2 + $0x5a8] sm:$0xff] }
  0xc2   : > { %1758 = vmatpush1.bf16.msra.mxu0 %v7657_v28  ;;  %1811 = vmatpush1.bf16.msra.mxu1 %v7659_v30  ;;  %v2037_v28 = vld [vmem:[#allocation2 + $0x6c8] sm:$0xff]  ;;  %v7663_v30 = vcombine.low %v1382_v16, %v1386_v20  ;;  %v7735_v16 = vcombine.low %v1997_v5, %v2001_v6 }
  0xc3   : > { %7719 = vmatprep.subr.msk.bf16.mxu0 %vm629_vm0, %v7710_v31  ;;  %7722 = vmatprep.subr.msk.bf16.mxu1 %vm629_vm0, %v7712_v33  ;;  %v7774_v31 = vcombine.high %v2036_v25, %v2040_v26  ;;  %v7776_v33 = vcombine.high %v2037_v28, %v2041_v19  ;;  %v7775_v34 = vcombine.low %v2037_v28, %v2041_v19  ;;  %v2043_v25 = vld [vmem:[#allocation2 + $0x6f8] sm:$0x33] }
  0xc5   : > { %7714 = vmatmul.mubr.msk.bf16.vlgmr.msra.gmra.mxu0 %vm622_vm2, %v8358_v41  ;;  %7717 = vmatmul.mubr.msk.bf16.vlgmr.msra.gmra.mxu1 %vm622_vm2, %v8358_v41 }
  0xc6   : > { %1852 = vmatpush1.bf16.msra.mxu0 %v1732_v38  ;;  %1905 = vmatpush1.bf16.msra.mxu1 %v1738_v42  ;;  %v2337_v38 = vsel %vm629_vm0, %v7773_v32, 0  ;;  %v2343_v42 = vsel %vm629_vm0, %v7775_v34, 0  ;;  %v2030_v32 = vld [vmem:[#allocation2 + $0x690] sm:$0xff]  ;;  %v2031_v34 = vld [vmem:[#allocation2 + $0x698] sm:$0xff] }
  0xc7   : > { %1853 = vmatprep.subr.bf16.mxu0 %v7702_v47  ;;  %1906 = vmatprep.subr.bf16.mxu1 %v7704_v43  ;;  %v7766_v47 = vcombine.high %v2028_v35, %v2032_v36  ;;  %v7768_v43 = vcombine.high %v2029_v37, %v2033_v39 }
  0xc8   : > { %1785 = vmatprep.mubr.bf16.mxu0 %v8110_v0  ;;  %1838 = vmatprep.mubr.bf16.mxu1 %v8110_v0 }
  0xca   : > { %1854 = vmatpush1.bf16.msra.mxu0 %v7701_v49  ;;  %1907 = vmatpush1.bf16.msra.mxu1 %v7703_v51  ;;  %v7765_v49 = vcombine.low %v2028_v35, %v2032_v36  ;;  %v7758_v51 = vcombine.high %v2020_v44, %v2024_v45  ;;  %v2035_v35 = vld [vmem:[#allocation2 + $0x6b8] sm:$0xff] }
  0xcb   : > { %1855 = vmatprep.subr.bf16.mxu0 %v7694_v52  ;;  %1908 = vmatprep.subr.bf16.mxu1 %v7696_v53  ;;  %v7760_v52 = vcombine.high %v2021_v17, %v2025_v46  ;;  %v2012_v53 = vld [vmem:[#allocation2 + $0x600] sm:$0xff]  ;;  %v2027_v44 = vld [vmem:[#allocation2 + $0x678] sm:$0xff] }
  0xcc   : > { %v7749_v62 = vcombine.low %v2012_v53, %v2016_v54 }
  0xcd   : > { %7715 = vmatmul.mubr.msk.bf16.gmra.mxu0 %vm622_vm2, %v8372_v58  ;;  %7718 = vmatmul.mubr.msk.bf16.gmra.mxu1 %vm622_vm2, %v8372_v58 }
  0xce   : > { %1856 = vmatpush1.bf16.msra.mxu0 %v7693_v48  ;;  %1909 = vmatpush1.bf16.msra.mxu1 %v7695_v7  ;;  %v7750_v48 = vcombine.high %v2012_v53, %v2016_v54  ;;  %v7752_v7 = vcombine.high %v2013_v55, %v2017_v57  ;;  %v2019_v53 = vld [vmem:[#allocation2 + $0x638] sm:$0xff] }
  0xcf   : > { %1857 = vmatprep.subr.bf16.mxu0 %v7686_v59  ;;  %1910 = vmatprep.subr.bf16.mxu1 %v7688_v18  ;;  %v2004_v59 = vld [vmem:[#allocation2 + $0x5c0] sm:$0xff] }
  0xd0   : > { %1881 = vmatprep.mubr.bf16.mxu0 %v8110_v0  ;;  %1934 = vmatprep.mubr.bf16.mxu1 %v8110_v0  ;;  %v2008_v18 = vld [vmem:[#allocation2 + $0x5e0] sm:$0xff] }
  0xd1   : > { %v7741_v8 = vcombine.low %v2004_v59, %v2008_v18 }
  0xd2   : > { %1858 = vmatpush1.bf16.msra.mxu0 %v7685_v1  ;;  %1911 = vmatpush1.bf16.msra.mxu1 %v7687_v2  ;;  %v7742_v1 = vcombine.high %v2004_v59, %v2008_v18  ;;  %v7744_v2 = vcombine.high %v2005_v60, %v2009_v61  ;;  %v2011_v59 = vld [vmem:[#allocation2 + $0x5f8] sm:$0xff] }
  0xd3   : > { %1859 = vmatprep.subr.bf16.mxu0 %v7678_v3  ;;  %1912 = vmatprep.subr.bf16.mxu1 %v7680_v4  ;;  %v1996_v3 = vld [vmem:[#allocation2 + $0x580] sm:$0xff] }
  0xd4   : > { %v2000_v4 = vld [vmem:[#allocation2 + $0x5a0] sm:$0xff] }
  0xd5   : > { %v7734_v9 = vcombine.high %v1996_v3, %v2000_v4  ;;  %v7733_v15 = vcombine.low %v1996_v3, %v2000_v4  ;;  %v2003_v3 = vld [vmem:[#allocation2 + $0x5b8] sm:$0xff] }
  0xd6   : > { %1860 = vmatpush1.bf16.msra.mxu0 %v7677_v10  ;;  %1913 = vmatpush1.bf16.msra.mxu1 %v7679_v11  ;;  %v7736_v10 = vcombine.high %v1997_v5, %v2001_v6  ;;  %v1988_v11 = vld [vmem:[#allocation2 + $0x540] sm:$0xff] }
  0xd7   : > { %1861 = vmatprep.subr.bf16.mxu0 %v7670_v12  ;;  %1914 = vmatprep.subr.bf16.mxu1 %v7672_v13  ;;  %v1992_v12 = vld [vmem:[#allocation2 + $0x560] sm:$0xff]  ;;  %v1989_v13 = vld [vmem:[#allocation2 + $0x548] sm:$0xff] }
  0xd8   : > { %v7726_v20 = vcombine.high %v1988_v11, %v1992_v12  ;;  %v7725_v26 = vcombine.low %v1988_v11, %v1992_v12  ;;  %v7727_v28 = vcombine.low %v1989_v13, %v1993_v14  ;;  %v1995_v11 = vld [vmem:[#allocation2 + $0x578] sm:$0xff] }
  0xda   : > { %1862 = vmatpush1.bf16.msra.mxu0 %v7669_v21  ;;  %1915 = vmatpush1.bf16.msra.mxu1 %v7671_v22  ;;  %v7728_v21 = vcombine.high %v1989_v13, %v1993_v14  ;;  %v2038_v22 = vld [vmem:[#allocation2 + $0x6d0] sm:$0xff] }
  0xdb   : > { %1863 = vmatprep.subr.bf16.mxu0 %v7662_v23  ;;  %1916 = vmatprep.subr.bf16.mxu1 %v7664_v24  ;;  %v2042_v23 = vld [vmem:[#allocation2 + $0x6f0] sm:$0x33]  ;;  %v2039_v24 = vld [vmem:[#allocation2 + $0x6d8] sm:$0xff] }
  0xdc   : > { %v7778_v19 = vcombine.high %v2038_v22, %v2042_v23 }
  0xde   : > { %1864 = vmatpush1.bf16.msra.mxu0 %v7661_v29  ;;  %1917 = vmatpush1.bf16.msra.mxu1 %v7663_v30  ;;  %v7777_v29 = vcombine.low %v2038_v22, %v2042_v23  ;;  %v7780_v30 = vcombine.high %v2039_v24, %v2043_v25  ;;  %v2658_v22 = vld [vmem:[#allocation2 + $0x8a8] sm:$0x33] }
  0xdf   : > { %7781 = vmatprep.subr.msk.bf16.mxu0 %vm629_vm0, %v7774_v31  ;;  %7784 = vmatprep.subr.msk.bf16.mxu1 %vm629_vm0, %v7776_v33  ;;  %v7779_v31 = vcombine.low %v2039_v24, %v2043_v25  ;;  %v2034_v33 = vld [vmem:[#allocation2 + $0x6b0] sm:$0xff] }
  0xe0   : > { %v2349_v36 = vsel %vm629_vm0, %v7777_v29, 0  ;;  %v7770_v37 = vcombine.high %v2030_v32, %v2034_v33  ;;  %v7769_v45 = vcombine.low %v2030_v32, %v2034_v33  ;;  %v2645_v29 = vld [vmem:[#allocation2 + $0x840] sm:$0xff]  ;;  %v2646_v32 = vld [vmem:[#allocation2 + $0x848] sm:$0xff] }
  0xe1   : > { %7720 = vmatmul.mubr.msk.bf16.vlgmr.msra.gmra.mxu0 %vm622_vm2, %v8358_v41  ;;  %7723 = vmatmul.mubr.msk.bf16.vlgmr.msra.gmra.mxu1 %vm622_vm2, %v8358_v41  ;;  %v7759_v41 = vcombine.low %v2021_v17, %v2025_v46  ;;  %v2355_v39 = vsel %vm629_vm0, %v7779_v31, 0  ;;  %v7771_v17 = vcombine.low %v2031_v34, %v2035_v35  ;;  %v2650_v33 = vld [vmem:[#allocation2 + $0x868] sm:$0xff] }
  0xe2   : > { %2363 = vmatpush1.bf16.msra.mxu0 %v2337_v38  ;;  %2416 = vmatpush1.bf16.msra.mxu1 %v2343_v42  ;;  %v7772_v38 = vcombine.high %v2031_v34, %v2035_v35  ;;  %v2026_v42 = vld [vmem:[#allocation2 + $0x670] sm:$0xff] }
  0xe3   : > { %2364 = vmatprep.subr.bf16.mxu0 %v7766_v47  ;;  %2417 = vmatprep.subr.bf16.mxu1 %v7768_v43  ;;  %v2022_v47 = vld [vmem:[#allocation2 + $0x650] sm:$0xff]  ;;  %v2023_v43 = vld [vmem:[#allocation2 + $0x658] sm:$0xff] }
  0xe4   : > { %1891 = vmatprep.mubr.bf16.mxu0 %v8110_v0  ;;  %1944 = vmatprep.mubr.bf16.mxu1 %v8110_v0  ;;  %v7762_v46 = vcombine.high %v2022_v47, %v2026_v42  ;;  %v7761_v54 = vcombine.low %v2022_v47, %v2026_v42  ;;  %v7763_v55 = vcombine.low %v2023_v43, %v2027_v44  ;;  %v2641_v47 = vld [vmem:[#allocation2 + $0x820] sm:$0xff] }
  0xe6   : > { %2365 = vmatpush1.bf16.msra.mxu0 %v7765_v49  ;;  %2418 = vmatpush1.bf16.msra.mxu1 %v7767_v50  ;;  %v7764_v49 = vcombine.high %v2023_v43, %v2027_v44  ;;  %v2014_v50 = vld [vmem:[#allocation2 + $0x610] sm:$0xff]  ;;  %v2638_v43 = vld [vmem:[#allocation2 + $0x808] sm:$0xff] }
  0xe7   : > { %2366 = vmatprep.subr.bf16.mxu0 %v7758_v51  ;;  %2419 = vmatprep.subr.bf16.mxu1 %v7760_v52  ;;  %v2018_v51 = vld [vmem:[#allocation2 + $0x630] sm:$0xff]  ;;  %v2015_v52 = vld [vmem:[#allocation2 + $0x618] sm:$0xff]  ;;  %v2642_v44 = vld [vmem:[#allocation2 + $0x828] sm:$0xff] }
  0xe8   : > { %v7754_v57 = vcombine.high %v2014_v50, %v2018_v51  ;;  %v7753_v18 = vcombine.low %v2014_v50, %v2018_v51  ;;  %v7828_v50 = vcombine.high %v2638_v43, %v2642_v44  ;;  %v2629_v51 = vld [vmem:[#allocation2 + $0x7c0] sm:$0xff] }
  0xe9   : > { %7721 = vmatmul.mubr.msk.bf16.gmra.mxu0 %vm622_vm2, %v8372_v58  ;;  %7724 = vmatmul.mubr.msk.bf16.gmra.mxu1 %vm622_vm2, %v8372_v58  ;;  %v7743_v58 = vcombine.low %v2005_v60, %v2009_v61  ;;  %v7755_v60 = vcombine.low %v2015_v52, %v2019_v53 }
  0xea   : > { %2367 = vmatpush1.bf16.msra.mxu0 %v7757_v56  ;;  %2420 = vmatpush1.bf16.msra.mxu1 %v7759_v41  ;;  %v7756_v56 = vcombine.high %v2015_v52, %v2019_v53  ;;  %v2006_v41 = vld [vmem:[#allocation2 + $0x5d0] sm:$0xff]  ;;  %v2633_v52 = vld [vmem:[#allocation2 + $0x7e0] sm:$0xff] }
  0xeb   : > { %2368 = vmatprep.subr.bf16.mxu0 %v7750_v48  ;;  %2421 = vmatprep.subr.bf16.mxu1 %v7752_v7  ;;  %v2010_v48 = vld [vmem:[#allocation2 + $0x5f0] sm:$0xff]  ;;  %v2007_v7 = vld [vmem:[#allocation2 + $0x5d8] sm:$0xff] }
  0xec   : > { %2392 = vmatprep.mubr.bf16.mxu0 %v8110_v0  ;;  %2445 = vmatprep.mubr.bf16.mxu1 %v8110_v0  ;;  %v7746_v61 = vcombine.high %v2006_v41, %v2010_v48  ;;  %v7745_v4 = vcombine.low %v2006_v41, %v2010_v48  ;;  %v7747_v5 = vcombine.low %v2007_v7, %v2011_v59 }
  0xed   : > { %v7818_v41 = vcombine.high %v2629_v51, %v2633_v52 }
  0xee   : > { %2369 = vmatpush1.bf16.msra.mxu0 %v7749_v62  ;;  %2422 = vmatpush1.bf16.msra.mxu1 %v7751_v63  ;;  %v7748_v62 = vcombine.high %v2007_v7, %v2011_v59  ;;  %v1998_v63 = vld [vmem:[#allocation2 + $0x590] sm:$0xff]  ;;  %v2621_v7 = vld [vmem:[#allocation2 + $0x780] sm:$0xff] }
  0xef   : > { %2370 = vmatprep.subr.bf16.mxu0 %v7742_v1  ;;  %2423 = vmatprep.subr.bf16.mxu1 %v7744_v2  ;;  %v2002_v1 = vld [vmem:[#allocation2 + $0x5b0] sm:$0xff]  ;;  %v1999_v2 = vld [vmem:[#allocation2 + $0x598] sm:$0xff]  ;;  %v2625_v59 = vld [vmem:[#allocation2 + $0x7a0] sm:$0xff] }
  0xf0   : > { %v7738_v6 = vcombine.high %v1998_v63, %v2002_v1  ;;  %v7737_v12 = vcombine.low %v1998_v63, %v2002_v1  ;;  %v7739_v13 = vcombine.low %v1999_v2, %v2003_v3  ;;  %v7817_v63 = vcombine.low %v2629_v51, %v2633_v52  ;;  %v2651_v51 = vld [vmem:[#allocation2 + $0x870] sm:$0xff] }
  0xf2   : > { %2371 = vmatpush1.bf16.msra.mxu0 %v7741_v8  ;;  %2424 = vmatpush1.bf16.msra.mxu1 %v7743_v58  ;;  %v7740_v8 = vcombine.high %v1999_v2, %v2003_v3  ;;  %v1990_v58 = vld [vmem:[#allocation2 + $0x550] sm:$0xff]  ;;  %v7810_v3 = vcombine.high %v2621_v7, %v2625_v59 }
  0xf3   : > { %2372 = vmatprep.subr.bf16.mxu0 %v7734_v9  ;;  %2425 = vmatprep.subr.bf16.mxu1 %v7736_v10  ;;  %v1994_v9 = vld [vmem:[#allocation2 + $0x570] sm:$0xff]  ;;  %v1991_v10 = vld [vmem:[#allocation2 + $0x558] sm:$0xff] }
  0xf4   : > { %v7730_v14 = vcombine.high %v1990_v58, %v1994_v9  ;;  %v7729_v23 = vcombine.low %v1990_v58, %v1994_v9  ;;  %v7731_v24 = vcombine.low %v1991_v10, %v1995_v11  ;;  %v2614_v58 = vld [vmem:[#allocation2 + $0x748] sm:$0xff] }
  0xf5   : > { %v2618_v9 = vld [vmem:[#allocation2 + $0x768] sm:$0xff] }
  0xf6   : > { %2373 = vmatpush1.bf16.msra.mxu0 %v7733_v15  ;;  %2426 = vmatpush1.bf16.msra.mxu1 %v7735_v16  ;;  %v7732_v15 = vcombine.high %v1991_v10, %v1995_v11  ;;  %v2653_v16 = vld [vmem:[#allocation2 + $0x880] sm:$0xff] }
  0xf7   : > { %2374 = vmatprep.subr.bf16.mxu0 %v7726_v20  ;;  %2427 = vmatprep.subr.bf16.mxu1 %v7728_v21  ;;  %v2657_v20 = vld [vmem:[#allocation2 + $0x8a0] sm:$0x33]  ;;  %v2654_v21 = vld [vmem:[#allocation2 + $0x888] sm:$0xff] }
  0xf8   : > { %v7842_v25 = vcombine.high %v2653_v16, %v2657_v20 }
  0xfa   : > { %2375 = vmatpush1.bf16.msra.mxu0 %v7725_v26  ;;  %2428 = vmatpush1.bf16.msra.mxu1 %v7727_v28  ;;  %v7841_v26 = vcombine.low %v2653_v16, %v2657_v20  ;;  %v7844_v28 = vcombine.high %v2654_v21, %v2658_v22  ;;  %v2609_v16 = vld [vmem:[#allocation2 + $0x720] sm:$0xff]  ;;  %v2606_v20 = vld [vmem:[#allocation2 + $0x708] sm:$0xff] }
  0xfb   : > { %7787 = vmatprep.subr.msk.bf16.mxu0 %vm629_vm0, %v7778_v19  ;;  %7790 = vmatprep.subr.msk.bf16.mxu1 %vm629_vm0, %v7780_v30  ;;  %v7843_v19 = vcombine.low %v2654_v21, %v2658_v22  ;;  %v2649_v30 = vld [vmem:[#allocation2 + $0x860] sm:$0xff]  ;;  %v2610_v21 = vld [vmem:[#allocation2 + $0x728] sm:$0xff] }
  0xfc   : > { %v2946_v35 = vsel %vm629_vm0, %v7841_v26, 0 }
  0xfd   : > { %7782 = vmatmul.mubr.msk.bf16.vlgmr.msra.gmra.mxu0 %vm622_vm2, %v8315_v40  ;;  %7785 = vmatmul.mubr.msk.bf16.vlgmr.msra.gmra.mxu1 %vm622_vm2, %v8315_v40 }
  0xfe   : > { %2469 = vmatpush1.bf16.msra.mxu0 %v2349_v36  ;;  %2522 = vmatpush1.bf16.msra.mxu1 %v2355_v39  ;;  %v7834_v36 = vcombine.high %v2645_v29, %v2649_v30  ;;  %v7836_v39 = vcombine.high %v2646_v32, %v2650_v33 }
  0xff   : > { %2470 = vmatprep.subr.bf16.mxu0 %v7770_v37  ;;  %2523 = vmatprep.subr.bf16.mxu1 %v7772_v38  ;;  %v2952_v37 = vsel %vm629_vm0, %v7843_v19, 0  ;;  %v2637_v38 = vld [vmem:[#allocation2 + $0x800] sm:$0xff]  ;;  %v2655_v19 = vld [vmem:[#allocation2 + $0x890] sm:$0xff] }
 0x100   : > { %2402 = vmatprep.mubr.bf16.mxu0 %v8110_v0  ;;  %2455 = vmatprep.mubr.bf16.mxu1 %v8110_v0 }
 0x102   : > { %2471 = vmatpush1.bf16.msra.mxu0 %v7769_v45  ;;  %2524 = vmatpush1.bf16.msra.mxu1 %v7771_v17  ;;  %v7833_v17 = vcombine.low %v2645_v29, %v2649_v30  ;;  %v2659_v29 = vld [vmem:[#allocation2 + $0x8b0] sm:$0x33]  ;;  %v2656_v30 = vld [vmem:[#allocation2 + $0x898] sm:$0xff] }
 0x103   : > { %2472 = vmatprep.subr.bf16.mxu0 %v7762_v46  ;;  %2525 = vmatprep.subr.bf16.mxu1 %v7764_v49  ;;  %v7835_v46 = vcombine.low %v2646_v32, %v2650_v33  ;;  %v7826_v49 = vcombine.high %v2637_v38, %v2641_v47  ;;  %v2660_v32 = vld [vmem:[#allocation2 + $0x8b8] sm:$0x33] }
 0x105   : > { %7783 = vmatmul.mubr.msk.bf16.gmra.mxu0 %vm622_vm2, %v8321_v27  ;;  %7786 = vmatmul.mubr.msk.bf16.gmra.mxu1 %vm622_vm2, %v8321_v27 }
 0x106   : > { %2473 = vmatpush1.bf16.msra.mxu0 %v7761_v54  ;;  %2526 = vmatpush1.bf16.msra.mxu1 %v7763_v55  ;;  %v2630_v54 = vld [vmem:[#allocation2 + $0x7c8] sm:$0xff] }
 0x107   : > { %2474 = vmatprep.subr.bf16.mxu0 %v7754_v57  ;;  %2527 = vmatprep.subr.bf16.mxu1 %v7756_v56  ;;  %v2634_v55 = vld [vmem:[#allocation2 + $0x7e8] sm:$0xff]  ;;  %v7827_v56 = vcombine.low %v2638_v43, %v2642_v44  ;;  %v7846_v43 = vcombine.high %v2655_v19, %v2659_v29  ;;  %v7845_v44 = vcombine.low %v2655_v19, %v2659_v29  ;;  %v2623_v29 = vld [vmem:[#allocation2 + $0x790] sm:$0xff] }
 0x108   : > { %2498 = vmatprep.mubr.bf16.mxu0 %v8110_v0  ;;  %2551 = vmatprep.mubr.bf16.mxu1 %v8110_v0  ;;  %v7820_v48 = vcombine.high %v2630_v54, %v2634_v55  ;;  %v7819_v2 = vcombine.low %v2630_v54, %v2634_v55  ;;  %v2648_v54 = vld [vmem:[#allocation2 + $0x858] sm:$0xff] }
 0x109   : > { %v2652_v55 = vld [vmem:[#allocation2 + $0x878] sm:$0xff] }
 0x10a   : > { %2475 = vmatpush1.bf16.msra.mxu0 %v7753_v18  ;;  %2528 = vmatpush1.bf16.msra.mxu1 %v7755_v60  ;;  %v2622_v60 = vld [vmem:[#allocation2 + $0x788] sm:$0xff] }
 0x10b   : > { %2476 = vmatprep.subr.bf16.mxu0 %v7746_v61  ;;  %2529 = vmatprep.subr.bf16.mxu1 %v7748_v62  ;;  %v2626_v61 = vld [vmem:[#allocation2 + $0x7a8] sm:$0xff] }
 0x10c   : > { %v7811_v11 = vcombine.low %v2622_v60, %v2626_v61 }
 0x10e   : > { %2477 = vmatpush1.bf16.msra.mxu0 %v7745_v4  ;;  %2530 = vmatpush1.bf16.msra.mxu1 %v7747_v5  ;;  %v7812_v5 = vcombine.high %v2622_v60, %v2626_v61  ;;  %v2639_v60 = vld [vmem:[#allocation2 + $0x810] sm:$0xff] }
 0x10f   : > { %2478 = vmatprep.subr.bf16.mxu0 %v7738_v6  ;;  %2531 = vmatprep.subr.bf16.mxu1 %v7740_v8  ;;  %v2613_v6 = vld [vmem:[#allocation2 + $0x740] sm:$0xff]  ;;  %v2643_v61 = vld [vmem:[#allocation2 + $0x830] sm:$0xff] }
 0x110   : > { %v2617_v8 = vld [vmem:[#allocation2 + $0x760] sm:$0xff] }
 0x111   : > { %v7801_v22 = vcombine.low %v2613_v6, %v2617_v8 }
 0x112   : > { %2479 = vmatpush1.bf16.msra.mxu0 %v7737_v12  ;;  %2532 = vmatpush1.bf16.msra.mxu1 %v7739_v13  ;;  %v7802_v12 = vcombine.high %v2613_v6, %v2617_v8  ;;  %v7983_v8 = vld [vmem:[%s8242_s24 + $0x10] ss:$0 sps:$4 sm:$0x33]  }
 0x113   : > { %2480 = vmatprep.subr.bf16.mxu0 %v7730_v14  ;;  %2533 = vmatprep.subr.bf16.mxu1 %v7732_v15  ;;  %v7804_v14 = vcombine.high %v2614_v58, %v2618_v9  ;;  %v2605_v15 = vld [vmem:[#allocation2 + $0x700] sm:$0xff] }
 0x114   : > { %v7793_v33 = vcombine.low %v2605_v15, %v2609_v16 }
 0x115   : > { %v8412_v31 = vpop.f32.mrf.mxu0  ;;  %v8414_v34 = vpop.f32.mrf.mxu1 }
 0x116   : > { %2481 = vmatpush1.bf16.msra.mxu0 %v7729_v23  ;;  %2534 = vmatpush1.bf16.msra.mxu1 %v7731_v24  ;;  %v7803_v24 = vcombine.low %v2614_v58, %v2618_v9  ;;  %v2665_v58 = vrot.slane %v7983_v8, 2  ;;  %v7839_v9 = vcombine.low %v2648_v54, %v2652_v55 }
 0x117   : > { %7849 = vmatprep.subr.msk.bf16.mxu0 %vm629_vm0, %v7842_v25  ;;  %7852 = vmatprep.subr.msk.bf16.mxu1 %vm629_vm0, %v7844_v28  ;;  %v8420_v42 = vpop.f32.mrf.mxu0  ;;  %v8424_v45 = vpop.f32.mrf.mxu1  ;;  %v7794_v25 = vcombine.high %v2605_v15, %v2609_v16  ;;  %v7796_v28 = vcombine.high %v2606_v20, %v2610_v21  ;;  %v2632_v16 = vld [vmem:[#allocation2 + $0x7d8] sm:$0xff] }
 0x119   : > { %7788 = vmatmul.mubr.msk.bf16.vlgmr.msra.gmra.mxu0 %vm622_vm2, %v8315_v40  ;;  %7791 = vmatmul.mubr.msk.bf16.vlgmr.msra.gmra.mxu1 %vm622_vm2, %v8315_v40  ;;  %v8429_v53 = vpop.f32.mrf.mxu0  ;;  %v8432_v57 = vpop.f32.mrf.mxu1  ;;  %v7825_v40 = vcombine.low %v2637_v38, %v2641_v47  ;;  %v7795_v47 = vcombine.low %v2606_v20, %v2610_v21  ;;  %v2636_v20 = vld [vmem:[#allocation2 + $0x7f8] sm:$0xff] }
 0x11a   : > { %2972 = vmatpush1.bf16.msra.mxu0 %v2946_v35  ;;  %3025 = vmatpush1.bf16.msra.mxu1 %v2952_v37  ;;  %v7981_v35 = vld [vmem:[%s8242_s24] sm:$0xff]   ;;  %v7982_v37 = vld [vmem:[%s8242_s24 + $0x8] sm:$0xff]   ;;  %v7824_v19 = vcombine.high %v2632_v16, %v2636_v20 }
 0x11b   : > { %2973 = vmatprep.subr.bf16.mxu0 %v7834_v36  ;;  %3026 = vmatprep.subr.bf16.mxu1 %v7836_v39  ;;  %v8434_v18 = vpop.f32.mrf.mxu0  ;;  %v8438_v62 = vpop.f32.mrf.mxu1  ;;  %v2662_v36 = vrot.slane %v7981_v35, 2  ;;  %v2663_v39 = vrot.slane %v7982_v37, 2  ;;  %v2628_v35 = vld [vmem:[#allocation2 + $0x7b8] sm:$0xff] }
 0x11c   : > { %2508 = vmatprep.mubr.bf16.mxu0 %v8110_v0  ;;  %2561 = vmatprep.mubr.bf16.mxu1 %v8110_v0 }
 0x11d   : > { %v8442_v1 = vpop.f32.mrf.mxu0  ;;  %v8444_v4 = vpop.f32.mrf.mxu1 }
 0x11e   : > { %2974 = vmatpush1.bf16.msra.mxu0 %v7833_v17  ;;  %3027 = vmatpush1.bf16.msra.mxu1 %v7835_v46  ;;  %v7848_v46 = vcombine.high %v2656_v30, %v2660_v32 }
 0x11f   : > { %2975 = vmatprep.subr.bf16.mxu0 %v7826_v49  ;;  %3028 = vmatprep.subr.bf16.mxu1 %v7828_v50  ;;  %v8448_v10 = vpop.f32.mrf.mxu0  ;;  %v8450_v13 = vpop.f32.mrf.mxu1  ;;  %v7847_v49 = vcombine.low %v2656_v30, %v2660_v32  ;;  %v2647_v50 = vld [vmem:[#allocation2 + $0x850] sm:$0xff] }
 0x120   : > { %v7837_v6 = vcombine.low %v2647_v50, %v2651_v51  ;;  %v2627_v30 = vld [vmem:[#allocation2 + $0x7b0] sm:$0xff] }
 0x121   : > { %7789 = vmatmul.mubr.msk.bf16.gmra.mxu0 %vm622_vm2, %v8321_v27  ;;  %7792 = vmatmul.mubr.msk.bf16.gmra.mxu1 %vm622_vm2, %v8321_v27  ;;  %v7809_v27 = vcombine.low %v2621_v7, %v2625_v59  ;;  %v8452_v23 = vpop.f32.mrf.mxu0  ;;  %v8454_v26 = vpop.f32.mrf.mxu1  ;;  %v2964_v7 = vsel %vm629_vm0, %v7847_v49, 0  ;;  %v7840_v59 = vcombine.high %v2648_v54, %v2652_v55  ;;  %v2615_v49 = vld [vmem:[#allocation2 + $0x750] sm:$0xff]  ;;  %v2620_v54 = vld [vmem:[#allocation2 + $0x778] sm:$0xff]  ;;  %v7813_v55 = vcombine.low %v2623_v29, %v2627_v30 }
 0x122   : > { %2976 = vmatpush1.bf16.msra.mxu0 %v7825_v40  ;;  %3029 = vmatpush1.bf16.msra.mxu1 %v7827_v56  ;;  %v8467_v56 = vsel %vm629_vm0, %v2662_v36, %v2663_v39 }
 0x123   : > { %2977 = vmatprep.subr.bf16.mxu0 %v7818_v41  ;;  %3030 = vmatprep.subr.bf16.mxu1 %v7820_v48  ;;  %v8458_v38 = vpop.f32.mrf.mxu0  ;;  %v8460_v17 = vpop.f32.mrf.mxu1  ;;  %v2958_v41 = vsel %vm629_vm0, %v7845_v44, 0  ;;  %v7838_v48 = vcombine.high %v2647_v50, %v2651_v51  ;;  %v2619_v50 = vld [vmem:[#allocation2 + $0x770] sm:$0xff]  ;;  %v2616_v51 = vld [vmem:[#allocation2 + $0x758] sm:$0xff] }
 0x124   : > { %3001 = vmatprep.mubr.bf16.mxu0 %v8110_v0  ;;  %3054 = vmatprep.mubr.bf16.mxu1 %v8110_v0  ;;  %v7805_v8 = vcombine.low %v2615_v49, %v2619_v50 }
 0x126   : > { %2978 = vmatpush1.bf16.msra.mxu0 %v7817_v63  ;;  %3031 = vmatpush1.bf16.msra.mxu1 %v7819_v2  ;;  %v2640_v2 = vld [vmem:[#allocation2 + $0x818] sm:$0xff] }
 0x127   : > { %2979 = vmatprep.subr.bf16.mxu0 %v7810_v3  ;;  %3032 = vmatprep.subr.bf16.mxu1 %v7812_v5  ;;  %v2644_v3 = vld [vmem:[#allocation2 + $0x838] sm:$0xff] }
 0x12a   : > { %2980 = vmatpush1.bf16.msra.mxu0 %v7809_v27  ;;  %3033 = vmatpush1.bf16.msra.mxu1 %v7811_v11  ;;  %v7830_v27 = vcombine.high %v2639_v60, %v2643_v61  ;;  %v7832_v11 = vcombine.high %v2640_v2, %v2644_v3 }
 0x12b   : > { %2981 = vmatprep.subr.bf16.mxu0 %v7802_v12  ;;  %3034 = vmatprep.subr.bf16.mxu1 %v7804_v14  ;;  %v2631_v12 = vld [vmem:[#allocation2 + $0x7d0] sm:$0xff] }
 0x12c   : > { %v2635_v14 = vld [vmem:[#allocation2 + $0x7f0] sm:$0xff] }
 0x12d   : > { %v7821_v37 = vcombine.low %v2631_v12, %v2635_v14 }
 0x12e   : > { %2982 = vmatpush1.bf16.msra.mxu0 %v7801_v22  ;;  %3035 = vmatpush1.bf16.msra.mxu1 %v7803_v24  ;;  %v8489_v22 = vsel %vm629_vm0, %v2663_v39, %v2665_v58  ;;  %v7829_v24 = vcombine.low %v2639_v60, %v2643_v61  ;;  %v7808_v60 = vcombine.high %v2616_v51, %v2620_v54  ;;  %v2607_v61 = vld [vmem:[#allocation2 + $0x710] sm:$0xff] }
 0x12f   : > { %2983 = vmatprep.subr.bf16.mxu0 %v7794_v25  ;;  %3036 = vmatprep.subr.bf16.mxu1 %v7796_v28  ;;  %v7831_v25 = vcombine.low %v2640_v2, %v2644_v3  ;;  %v7822_v28 = vcombine.high %v2631_v12, %v2635_v14  ;;  %v2611_v2 = vld [vmem:[#allocation2 + $0x730] sm:$0xff]  ;;  %v2608_v3 = vld [vmem:[#allocation2 + $0x718] sm:$0xff] }
 0x130   : > { %v7797_v14 = vcombine.low %v2607_v61, %v2611_v2 }
 0x131   : > { %v8462_v52 = vpop.f32.mrf.mxu0  ;;  %v8464_v40 = vpop.f32.mrf.mxu1 }
 0x132   : > { %2984 = vmatpush1.bf16.msra.mxu0 %v7793_v33  ;;  %3037 = vmatpush1.bf16.msra.mxu1 %v7795_v47  ;;  %v2624_v33 = vld [vmem:[#allocation2 + $0x798] sm:$0xff]  ;;  %v7823_v47 = vcombine.low %v2632_v16, %v2636_v20 }
 0x133   : > { %7855 = vmatprep.subr.msk.bf16.mxu0 %vm629_vm0, %v7846_v43  ;;  %7858 = vmatprep.subr.msk.bf16.mxu1 %vm629_vm0, %v7848_v46  ;;  %v8473_v63 = vpop.f32.mrf.mxu0  ;;  %v8477_v5 = vpop.f32.mrf.mxu1  ;;  %v7814_v43 = vcombine.high %v2623_v29, %v2627_v30  ;;  %v7816_v46 = vcombine.high %v2624_v33, %v2628_v35 }
 0x135   : > { %7850 = vmatmul.mubr.msk.bf16.vlgmr.msra.gmra.mxu0 %vm622_vm2, %v8467_v56  ;;  %7853 = vmatmul.mubr.msk.bf16.vlgmr.msra.gmra.mxu1 %vm622_vm2, %v8467_v56  ;;  %v8483_v15 = vpop.f32.mrf.mxu0  ;;  %v8486_v21 = vpop.f32.mrf.mxu1 }
 0x136   : > { %3078 = vmatpush1.bf16.msra.mxu0 %v2958_v41  ;;  %3131 = vmatpush1.bf16.msra.mxu1 %v2964_v7  ;;  %v7806_v7 = vcombine.high %v2615_v49, %v2619_v50 }
 0x137   : > { %3079 = vmatprep.subr.bf16.mxu0 %v7838_v48  ;;  %3132 = vmatprep.subr.bf16.mxu1 %v7840_v59  ;;  %v8491_v32 = vpop.f32.mrf.mxu0  ;;  %v8495_v36 = vpop.f32.mrf.mxu1  ;;  %v7815_v48 = vcombine.low %v2624_v33, %v2628_v35 }
 0x138   : > { %3011 = vmatprep.mubr.bf16.mxu0 %v8110_v0  ;;  %3064 = vmatprep.mubr.bf16.mxu1 %v8110_v0 }
 0x139   : > { %v8499_v39 = vpop.f32.mrf.mxu0  ;;  %v8501_v44 = vpop.f32.mrf.mxu1 }
 0x13a   : > { %3080 = vmatpush1.bf16.msra.mxu0 %v7837_v6  ;;  %3133 = vmatpush1.bf16.msra.mxu1 %v7839_v9  ;;  %v2612_v6 = vld [vmem:[#allocation2 + $0x738] sm:$0xff]  ;;  %v7807_v9 = vcombine.low %v2616_v51, %v2620_v54 }
 0x13b   : > { %3081 = vmatprep.subr.bf16.mxu0 %v7830_v27  ;;  %3134 = vmatprep.subr.bf16.mxu1 %v7832_v11  ;;  %v8505_v41 = vpop.f32.mrf.mxu0  ;;  %v8507_v59 = vpop.f32.mrf.mxu1  ;;  %v7798_v27 = vcombine.high %v2607_v61, %v2611_v2  ;;  %v7800_v12 = vcombine.high %v2608_v3, %v2612_v6  ;;  %v7799_v20 = vcombine.low %v2608_v3, %v2612_v6 }
 0x13d   : > { %7851 = vmatmul.mubr.msk.bf16.gmra.mxu0 %vm622_vm2, %v8489_v22  ;;  %7854 = vmatmul.mubr.msk.bf16.gmra.mxu1 %vm622_vm2, %v8489_v22  ;;  %v8509_v58 = vpop.f32.mrf.mxu0  ;;  %v8511_v11 = vpop.f32.mrf.mxu1 }
 0x13e   : > { %3082 = vmatpush1.bf16.msra.mxu0 %v7829_v24  ;;  %3135 = vmatpush1.bf16.msra.mxu1 %v7831_v25 }
 0x13f   : > { %3083 = vmatprep.subr.bf16.mxu0 %v7822_v28  ;;  %3136 = vmatprep.subr.bf16.mxu1 %v7824_v19  ;;  %v8513_v16 = vpop.f32.mrf.mxu0  ;;  %v8515_v24 = vpop.f32.mrf.mxu1 }
 0x140   : > { %3107 = vmatprep.mubr.bf16.mxu0 %v8110_v0  ;;  %3160 = vmatprep.mubr.bf16.mxu1 %v8110_v0 }
 0x142   : > { %3084 = vmatpush1.bf16.msra.mxu0 %v7821_v37  ;;  %3137 = vmatpush1.bf16.msra.mxu1 %v7823_v47 }
 0x143   : > { %3085 = vmatprep.subr.bf16.mxu0 %v7814_v43  ;;  %3138 = vmatprep.subr.bf16.mxu1 %v7816_v46 }
 0x146   : > { %3086 = vmatpush1.bf16.msra.mxu0 %v7813_v55  ;;  %3139 = vmatpush1.bf16.msra.mxu1 %v7815_v48 }
 0x147   : > { %3087 = vmatprep.subr.bf16.mxu0 %v7806_v7  ;;  %3140 = vmatprep.subr.bf16.mxu1 %v7808_v60 }
 0x14a   : > { %3088 = vmatpush1.bf16.msra.mxu0 %v7805_v8  ;;  %3141 = vmatpush1.bf16.msra.mxu1 %v7807_v9 }
 0x14b   : > { %3089 = vmatprep.subr.bf16.mxu0 %v7798_v27  ;;  %3142 = vmatprep.subr.bf16.mxu1 %v7800_v12 }
 0x14d   : > { %v1200_v25 = vpop.f32.mrf.mxu0  ;;  %v1253_v19 = vpop.f32.mrf.mxu1 }
 0x14e   : > { %v8518_v28 = vadd.f32 %v1200_v25, %v8412_v31  ;;  %3090 = vmatpush1.bf16.msra.mxu0 %v7797_v14  ;;  %v8521_v29 = vadd.f32 %v1253_v19, %v8414_v34  ;;  %3143 = vmatpush1.bf16.msra.mxu1 %v7799_v20 }
 0x14f   : > { %v1202_v30 = vpop.f32.mrf.mxu0  ;;  %v1255_v35 = vpop.f32.mrf.mxu1 }
 0x150   : > { %v8524_v33 = vadd.f32 %v1202_v30, %v8420_v42  ;;  %v8527_v37 = vadd.f32 %v1255_v35, %v8424_v45 }
 0x151   : > { %v1204_v47 = vpop.f32.mrf.mxu0  ;;  %7856 = vmatmul.mubr.msk.bf16.vlgmr.msra.gmra.mxu0 %vm622_vm2, %v8467_v56  ;;  %v1257_v43 = vpop.f32.mrf.mxu1  ;;  %7859 = vmatmul.mubr.msk.bf16.vlgmr.msra.gmra.mxu1 %vm622_vm2, %v8467_v56 }
 0x152   : > { %v8532_v31 = vadd.f32 %v1204_v47, %v8429_v53  ;;  %3117 = vmatprep.mubr.bf16.mxu0 %v8110_v0  ;;  %v8538_v34 = vadd.f32 %v1257_v43, %v8432_v57  ;;  %3170 = vmatprep.mubr.bf16.mxu1 %v8110_v0 }
 0x153   : > { %v1206_v42 = vpop.f32.mrf.mxu0  ;;  %v1259_v46 = vpop.f32.mrf.mxu1 }
 0x154   : > { %v1207_v45 = vadd.f32 %v1206_v42, %v8434_v18  ;;  %v1260_v49 = vadd.f32 %v1259_v46, %v8438_v62 }
 0x155   : > { %v1210_v50 = vpop.f32.mrf.mxu0  ;;  %v1263_v51 = vpop.f32.mrf.mxu1 }
 0x156   : > { %v1211_v53 = vadd.f32 %v1210_v50, %v8442_v1  ;;  %v1264_v54 = vadd.f32 %v1263_v51, %v8444_v4 }
 0x157   : > { %v1212_v56 = vpop.f32.mrf.mxu0  ;;  %v1265_v48 = vpop.f32.mrf.mxu1 }
 0x158   : > { %v1213_v55 = vadd.f32 %v1212_v56, %v8448_v10  ;;  %v1266_v57 = vadd.f32 %v1265_v48, %v8450_v13 }
 0x159   : > { %v1214_v7 = vpop.f32.mrf.mxu0  ;;  %7857 = vmatmul.mubr.msk.bf16.gmra.mxu0 %vm622_vm2, %v8489_v22  ;;  %v1267_v18 = vpop.f32.mrf.mxu1  ;;  %7860 = vmatmul.mubr.msk.bf16.gmra.mxu1 %vm622_vm2, %v8489_v22 }
 0x15a   : > { %v1215_v0 = vadd.f32 %v1214_v7, %v8452_v23  ;;  %v1268_v62 = vadd.f32 %v1267_v18, %v8454_v26 }
 0x15b   : > { %v1216_v1 = vpop.f32.mrf.mxu0  ;;  %v1269_v60 = vpop.f32.mrf.mxu1 }
 0x15c   : > { %v1217_v4 = vadd.f32 %v1216_v1, %v8458_v38  ;;  %v1270_v10 = vadd.f32 %v1269_v60, %v8460_v17 }
 0x169   : > { %v1306_v61 = vpop.f32.mrf.mxu0  ;;  %v1359_v2 = vpop.f32.mrf.mxu1 }
 0x16a   : > { %v1307_v13 = vadd.f32 %v1306_v61, %v8462_v52  ;;  %v1360_v3 = vadd.f32 %v1359_v2, %v8464_v40 }
 0x16b   : > { %v1308_v6 = vpop.f32.mrf.mxu0  ;;  %v1361_v8 = vpop.f32.mrf.mxu1 }
 0x16c   : > { %v1309_v23 = vadd.f32 %v1308_v6, %v8473_v63  ;;  %v1362_v22 = vadd.f32 %v1361_v8, %v8477_v5 }
 0x16d   : > { %v1310_v9 = vpop.f32.mrf.mxu0  ;;  %v1363_v27 = vpop.f32.mrf.mxu1 }
 0x16e   : > { %v1311_v26 = vadd.f32 %v1310_v9, %v8483_v15  ;;  %v1364_v38 = vadd.f32 %v1363_v27, %v8486_v21 }
 0x16f   : > { %v1312_v12 = vpop.f32.mrf.mxu0  ;;  %v1365_v14 = vpop.f32.mrf.mxu1 }
 0x170   : > { %v1313_v17 = vadd.f32 %v1312_v12, %v8491_v32  ;;  %v1366_v52 = vadd.f32 %v1365_v14, %v8495_v36 }
 0x171   : > { %v1316_v20 = vpop.f32.mrf.mxu0  ;;  %v1369_v25 = vpop.f32.mrf.mxu1 }
 0x172   : > { %v1317_v40 = vadd.f32 %v1316_v20, %v8499_v39  ;;  %v1370_v63 = vadd.f32 %v1369_v25, %v8501_v44 }
 0x173   : > { %v1318_v19 = vpop.f32.mrf.mxu0  ;;  %v1371_v30 = vpop.f32.mrf.mxu1 }
 0x174   : > { %v1319_v5 = vadd.f32 %v1318_v19, %v8505_v41  ;;  %v1372_v15 = vadd.f32 %v1371_v30, %v8507_v59 }
 0x175   : > { %v1320_v35 = vpop.f32.mrf.mxu0  ;;  %v1373_v47 = vpop.f32.mrf.mxu1 }
 0x176   : > { %v1321_v21 = vadd.f32 %v1320_v35, %v8509_v58  ;;  %v1374_v32 = vadd.f32 %v1373_v47, %v8511_v11 }
 0x177   : > { %v1322_v43 = vpop.f32.mrf.mxu0  ;;  %v1375_v42 = vpop.f32.mrf.mxu1 }
 0x178   : > { %v1323_v36 = vadd.f32 %v1322_v43, %v8513_v16  ;;  %v1376_v39 = vadd.f32 %v1375_v42, %v8515_v24 }
 0x185   : > { %v8571_v46 = vpop.f32.mrf.mxu0  ;;  %v8573_v44 = vpop.f32.mrf.mxu1 }
 0x187   : > { %v8575_v41 = vpop.f32.mrf.mxu0  ;;  %v8577_v50 = vpop.f32.mrf.mxu1 }
 0x189   : > { %v1781_v59 = vpop.f32.mrf.mxu0  ;;  %v1834_v51 = vpop.f32.mrf.mxu1 }
 0x18a   : > { %v1963_v58 = vadd.f32 %v1781_v59, %v8532_v31  ;;  %v1965_v11 = vadd.f32 %v1834_v51, %v8538_v34 }
 0x18b   : > { %v1783_v56 = vpop.f32.mrf.mxu0  ;;  %v1836_v16 = vpop.f32.mrf.mxu1 }
 0x18c   : > { %v1964_v48 = vadd.f32 %v1783_v56, %v1207_v45  ;;  %v1966_v7 = vadd.f32 %v1836_v16, %v1260_v49 }
 0x18d   : > { %v1787_v18 = vpop.f32.mrf.mxu0  ;;  %v1840_v1 = vpop.f32.mrf.mxu1 }
 0x18e   : > { %v1971_v24 = vadd.f32 %v1787_v18, %v1211_v53  ;;  %v1973_v60 = vadd.f32 %v1840_v1, %v1264_v54 }
 0x18f   : > { %v1789_v61 = vpop.f32.mrf.mxu0  ;;  %v1842_v6 = vpop.f32.mrf.mxu1 }
 0x190   : > { %v1972_v2 = vadd.f32 %v1789_v61, %v1213_v55  ;;  %v1974_v8 = vadd.f32 %v1842_v6, %v1266_v57 }
 0x191   : > { %v1791_v9 = vpop.f32.mrf.mxu0  ;;  %v1844_v12 = vpop.f32.mrf.mxu1 }
 0x192   : > { %v1979_v27 = vadd.f32 %v1791_v9, %v1215_v0  ;;  %v1981_v14 = vadd.f32 %v1844_v12, %v1268_v62 }
 0x193   : > { %v1793_v31 = vpop.f32.mrf.mxu0  ;;  %v1846_v25 = vpop.f32.mrf.mxu1 }
 0x194   : > { %v1980_v20 = vadd.f32 %v1793_v31, %v1217_v4  ;;  %v1982_v34 = vadd.f32 %v1846_v25, %v1270_v10 }
 0x1a1   : > { %v1883_v19 = vpop.f32.mrf.mxu0  ;;  %v1936_v30 = vpop.f32.mrf.mxu1 }
 0x1a2   : > { %v1959_v45 = vadd.f32 %v1883_v19, %v1307_v13  ;;  %v1961_v49 = vadd.f32 %v1936_v30, %v1360_v3 }
 0x1a3   : > { %v1885_v35 = vpop.f32.mrf.mxu0  ;;  %v1938_v47 = vpop.f32.mrf.mxu1 }
 0x1a4   : > { %v1960_v53 = vadd.f32 %v1885_v35, %v1309_v23  ;;  %v1962_v54 = vadd.f32 %v1938_v47, %v1362_v22 }
 0x1a5   : > { %v1887_v43 = vpop.f32.mrf.mxu0  ;;  %v1940_v42 = vpop.f32.mrf.mxu1 }
 0x1a6   : > { %v1967_v55 = vadd.f32 %v1887_v43, %v1311_v26  ;;  %v1969_v57 = vadd.f32 %v1940_v42, %v1364_v38 }
 0x1a7   : > { %v1889_v59 = vpop.f32.mrf.mxu0  ;;  %v1942_v51 = vpop.f32.mrf.mxu1 }
 0x1a8   : > { %v1968_v0 = vadd.f32 %v1889_v59, %v1313_v17  ;;  %v1970_v62 = vadd.f32 %v1942_v51, %v1366_v52 }
 0x1a9   : > { %v1893_v56 = vpop.f32.mrf.mxu0  ;;  %v1946_v16 = vpop.f32.mrf.mxu1 }
 0x1aa   : > { %v1975_v4 = vadd.f32 %v1893_v56, %v1317_v40  ;;  %v1977_v10 = vadd.f32 %v1946_v16, %v1370_v63 }
 0x1ab   : > { %v1895_v18 = vpop.f32.mrf.mxu0  ;;  %v1948_v1 = vpop.f32.mrf.mxu1 }
 0x1ac   : > { %v1976_v13 = vadd.f32 %v1895_v18, %v1319_v5  ;;  %v1978_v3 = vadd.f32 %v1948_v1, %v1372_v15 }
 0x1ad   : > { %v1897_v61 = vpop.f32.mrf.mxu0  ;;  %v1950_v6 = vpop.f32.mrf.mxu1 }
 0x1ae   : > { %v1983_v23 = vadd.f32 %v1897_v61, %v1321_v21  ;;  %v1985_v22 = vadd.f32 %v1950_v6, %v1374_v32 }
 0x1af   : > { %v1899_v9 = vpop.f32.mrf.mxu0  ;;  %v1952_v12 = vpop.f32.mrf.mxu1 }
 0x1b0   : > { %v1984_v26 = vadd.f32 %v1899_v9, %v1323_v36  ;;  %v1986_v38 = vadd.f32 %v1952_v12, %v1376_v39 }
 0x1bd   : > { %v8581_v31 = vpop.f32.mrf.mxu0  ;;  %v8583_v17 = vpop.f32.mrf.mxu1 }
 0x1bf   : > { %v8585_v52 = vpop.f32.mrf.mxu0  ;;  %v8587_v40 = vpop.f32.mrf.mxu1 }
 0x1c1   : > { %v2398_v63 = vpop.f32.mrf.mxu0  ;;  %v2451_v15 = vpop.f32.mrf.mxu1 }
 0x1c2   : > { %v8589_v5 = vadd.f32 %v2398_v63, %v1963_v58  ;;  %v8591_v25 = vadd.f32 %v2451_v15, %v1965_v11 }
 0x1c3   : > { %v2400_v21 = vpop.f32.mrf.mxu0  ;;  %v2453_v36 = vpop.f32.mrf.mxu1 }
 0x1c4   : > { %v8593_v32 = vadd.f32 %v2400_v21, %v1964_v48  ;;  %v8595_v19 = vadd.f32 %v2453_v36, %v1966_v7 }
 0x1c5   : > { %v2404_v39 = vpop.f32.mrf.mxu0  ;;  %v2457_v35 = vpop.f32.mrf.mxu1 }
 0x1c6   : > { %v8597_v30 = vadd.f32 %v2404_v39, %v1971_v24  ;;  %v8599_v47 = vadd.f32 %v2457_v35, %v1973_v60 }
 0x1c7   : > { %v2406_v43 = vpop.f32.mrf.mxu0  ;;  %v2459_v58 = vpop.f32.mrf.mxu1 }
 0x1c8   : > { %v8601_v42 = vadd.f32 %v2406_v43, %v1972_v2  ;;  %v8603_v59 = vadd.f32 %v2459_v58, %v1974_v8 }
 0x1c9   : > { %v2408_v11 = vpop.f32.mrf.mxu0  ;;  %v2461_v48 = vpop.f32.mrf.mxu1 }
 0x1ca   : > { %v8605_v51 = vadd.f32 %v2408_v11, %v1979_v27  ;;  %v8607_v56 = vadd.f32 %v2461_v48, %v1981_v14 }
 0x1cb   : > { %v2410_v7 = vpop.f32.mrf.mxu0  ;;  %v2463_v24 = vpop.f32.mrf.mxu1 }
 0x1cc   : > { %v8609_v16 = vadd.f32 %v2410_v7, %v1980_v20  ;;  %v8611_v18 = vadd.f32 %v2463_v24, %v1982_v34 }
 0x1d9   : > { %v2500_v60 = vpop.f32.mrf.mxu0  ;;  %v2553_v2 = vpop.f32.mrf.mxu1 }
 0x1da   : > { %v8613_v1 = vadd.f32 %v2500_v60, %v1959_v45  ;;  %v8615_v61 = vadd.f32 %v2553_v2, %v1961_v49  ;;  %v3252_v60 = vlaneseq }
 0x1db   : > { %v2502_v8 = vpop.f32.mrf.mxu0  ;;  %v2555_v27 = vpop.f32.mrf.mxu1 }
 0x1dc   : > { %v8617_v6 = vadd.f32 %v2502_v8, %v1960_v53  ;;  %v8619_v9 = vadd.f32 %v2555_v27, %v1962_v54  ;;  %v8649_v2 = vshrl.u32 %v3252_v60, 7 }
 0x1dd   : > { %v2504_v14 = vpop.f32.mrf.mxu0  ;;  %v2557_v20 = vpop.f32.mrf.mxu1 }
 0x1de   : > { %v8621_v12 = vadd.f32 %v2504_v14, %v1967_v55  ;;  %v8623_v63 = vadd.f32 %v2557_v20, %v1969_v57  ;;  %11271 = vst [vmem:[#allocation11_spill] sm:$0xff] %v8649_v2 }
 0x1df   : > { %v2506_v34 = vpop.f32.mrf.mxu0  ;;  %v2559_v45 = vpop.f32.mrf.mxu1 }
 0x1e0   : > { %v8625_v15 = vadd.f32 %v2506_v34, %v1968_v0  ;;  %v8627_v21 = vadd.f32 %v2559_v45, %v1970_v62 }
 0x1e1   : > { %v2510_v49 = vpop.f32.mrf.mxu0  ;;  %v2563_v53 = vpop.f32.mrf.mxu1 }
 0x1e2   : > { %v8629_v36 = vadd.f32 %v2510_v49, %v1975_v4  ;;  %v8631_v39 = vadd.f32 %v2563_v53, %v1977_v10  ;;  %v8111_v10 = vmov 1983009808  }
 0x1e3   : > { %v2512_v54 = vpop.f32.mrf.mxu0  ;;  %v2565_v55 = vpop.f32.mrf.mxu1  ;;  %v3250_v24 = vunpack.c.l.s4 %v8111_v10 }
 0x1e4   : > { %v8633_v35 = vadd.f32 %v2512_v54, %v1976_v13  ;;  %v8635_v43 = vadd.f32 %v2565_v55, %v1978_v3  ;;  %v1955_v13 = vadd.f32 %v8571_v46, %v8518_v28  ;;  %v1956_v3 = vadd.f32 %v8575_v41, %v8524_v33 }
 0x1e5   : > { %v2514_v57 = vpop.f32.mrf.mxu0  ;;  %v2567_v0 = vpop.f32.mrf.mxu1 }
 0x1e6   : > { %v8637_v58 = vadd.f32 %v2514_v57, %v1983_v23  ;;  %v8639_v11 = vadd.f32 %v2567_v0, %v1985_v22  ;;  %v3251_v23 = vunpack.c.0.s8 %v3250_v24  ;;  %v1957_v22 = vadd.f32 %v8573_v44, %v8521_v29 }
 0x1e7   : > { %v2516_v62 = vpop.f32.mrf.mxu0  ;;  %v2569_v4 = vpop.f32.mrf.mxu1  ;;  %v2572_v8 = vadd.f32 %v8581_v31, %v1955_v13  ;;  %v2573_v27 = vadd.f32 %v8585_v52, %v1956_v3 }
 0x1e8   : > { %v8641_v48 = vadd.f32 %v2516_v62, %v1984_v26  ;;  %v8643_v7 = vadd.f32 %v2569_v4, %v1986_v38  ;;  %v1958_v26 = vadd.f32 %v8577_v50, %v8527_v37  ;;  %v2574_v28 = vadd.f32 %v8583_v17, %v1957_v22 }
 0x1e9   : > { %v8660_v34 = vsub.s32 %v3251_v23, %v8649_v2 }
 0x1ea   : > { %v2575_v46 = vadd.f32 %v8587_v40, %v1958_v26 }
 0x1f5   : > { %v3003_v38 = vpop.f32.mrf.mxu0  ;;  %v3056_v14 = vpop.f32.mrf.mxu1 }
 0x1f6   : > { %v3181_v41 = vadd.f32 %v3003_v38, %v2572_v8  ;;  %v3183_v44 = vadd.f32 %v3056_v14, %v2574_v28 }
 0x1f7   : > { %v3005_v33 = vpop.f32.mrf.mxu0  ;;  %v3058_v29 = vpop.f32.mrf.mxu1 }
 0x1f8   : > { %v3182_v20 = vadd.f32 %v3005_v33, %v2573_v27  ;;  %v3184_v45 = vadd.f32 %v3058_v29, %v2575_v46 }
 0x1f9   : > { %v3007_v37 = vpop.f32.mrf.mxu0  ;;  %v3060_v31 = vpop.f32.mrf.mxu1 }
 0x1fa   : > { %v3245_v50 = vcombine.low %v3181_v41, %v3182_v20  ;;  %v3246_v49 = vcombine.high %v3181_v41, %v3182_v20  ;;  %v3247_v53 = vcombine.low %v3183_v44, %v3184_v45  ;;  %v3248_v52 = vcombine.high %v3183_v44, %v3184_v45 }
 0x1fb   : > { %v3009_v54 = vpop.f32.mrf.mxu0  ;;  %v3189_v55 = vadd.f32 %v3007_v37, %v8589_v5  ;;  %v3062_v0 = vpop.f32.mrf.mxu1 }
 0x1fc   : > { %v8663_v17 = vrot.slane %v3245_v50, %v8660_v34  ;;  %v8666_v40 = vrot.slane %v3246_v49, %v8660_v34  ;;  %v3190_v57 = vadd.f32 %v3009_v54, %v8593_v32  ;;  %v8671_v62 = vrot.slane %v3247_v53, %v8660_v34 }
 0x1fd   : > { %v8674_v4 = vrot.slane %v3248_v52, %v8660_v34  ;;  %v3192_v10 = vadd.f32 %v3062_v0, %v8595_v19  ;;  %v3013_v24 = vpop.f32.mrf.mxu0  ;;  %v3066_v3 = vpop.f32.mrf.mxu1  ;;  %v3191_v32 = vadd.f32 %v3060_v31, %v8591_v25 }
 0x1fe   : > { %v3317_v60 = vcombine.low %v3189_v55, %v3190_v57  ;;  %v3318_v13 = vcombine.high %v3189_v55, %v3190_v57  ;;  %v3278_v23 = vcombine.high %v8663_v17, %v8671_v62  ;;  %v3197_v38 = vadd.f32 %v3013_v24, %v8597_v30 }
 0x1ff   : > { %v3280_v5 = vcombine.high %v8666_v40, %v8674_v4  ;;  %v3015_v22 = vpop.f32.mrf.mxu0  ;;  %v3068_v8 = vpop.f32.mrf.mxu1  ;;  %v3319_v27 = vcombine.low %v3191_v32, %v3192_v10  ;;  %v3320_v14 = vcombine.high %v3191_v32, %v3192_v10  ;;  %v3199_v33 = vadd.f32 %v3066_v3, %v8599_v47 }
 0x200   : > { %v8683_v26 = vrot.slane %v3317_v60, %v8660_v34  ;;  %v8687_v19 = vrot.slane %v3318_v13, %v8660_v34  ;;  %v3198_v28 = vadd.f32 %v3015_v22, %v8601_v42  ;;  %v3200_v41 = vadd.f32 %v3068_v8, %v8603_v59 }
 0x201   : > { %v3017_v46 = vpop.f32.mrf.mxu0  ;;  %v3070_v25 = vpop.f32.mrf.mxu1  ;;  %v3279_v20 = vcombine.low %v8666_v40, %v8674_v4  ;;  %v3277_v30 = vcombine.low %v8663_v17, %v8671_v62  ;;  %v8697_v29 = vrot.slane %v3319_v27, %v8660_v34  ;;  %v8700_v44 = vrot.slane %v3320_v14, %v8660_v34 }
 0x202   : > { %v3389_v45 = vcombine.low %v3197_v38, %v3198_v28  ;;  %v3390_v42 = vcombine.high %v3197_v38, %v3198_v28  ;;  %v3391_v50 = vcombine.low %v3199_v33, %v3200_v41  ;;  %v3392_v47 = vcombine.high %v3199_v33, %v3200_v41 }
 0x203   : > { %v3019_v37 = vpop.f32.mrf.mxu0  ;;  %v3072_v54 = vpop.f32.mrf.mxu1  ;;  %v3205_v17 = vadd.f32 %v3017_v46, %v8605_v51  ;;  %v3207_v40 = vadd.f32 %v3070_v25, %v8607_v56  ;;  %v8727_v51 = vrot.slane %v3279_v20, %v8660_v34  ;;  %v7863_v27 = vcombine.high %v8671_v62, %v8671_v62 }
 0x204   : > { %v3206_v59 = vadd.f32 %v3019_v37, %v8609_v16  ;;  %v8714_v16 = vrot.slane %v3389_v45, %v8660_v34  ;;  %v8717_v55 = vrot.slane %v3390_v42, %v8660_v34  ;;  %v8720_v57 = vrot.slane %v3391_v50, %v8660_v34 }
 0x205   : > { %v8723_v0 = vrot.slane %v3392_v47, %v8660_v34  ;;  %v3208_v60 = vadd.f32 %v3072_v54, %v8611_v18  ;;  %v4318_v14 = vsel %vm4205_vm5, %v8727_v51, -inf  ;;  %v8748_v28 = vrot.slane %v3277_v30, %v8660_v34 }
 0x206   : > { %v3461_v10 = vcombine.low %v3205_v17, %v3206_v59  ;;  %v3462_v24 = vcombine.high %v3205_v17, %v3206_v59  ;;  %v8751_v46 = vrot.slane %v3280_v5, %v8660_v34  ;;  %v4319_v25 = vrot.slane %v4318_v14, 4 }
 0x207   : > { %v3463_v38 = vcombine.low %v3207_v40, %v3208_v60  ;;  %v3464_v8 = vcombine.high %v3207_v40, %v3208_v60  ;;  %v8760_v20 = vrot.slane %v3278_v23, %v8660_v34  ;;  %v4206_v45 = vsel %vm4205_vm5, %v8748_v28, -inf }
 0x208   : > { %v8738_v22 = vrot.slane %v3461_v10, %v8660_v34  ;;  %v8741_v18 = vrot.slane %v3462_v24, %v8660_v34  ;;  %v4374_v30 = vsel %vm4205_vm5, %v8751_v46, -inf  ;;  %v8775_v23 = vrot.slane %v7863_v27, %v8660_v34 }
 0x209   : > { %v8754_v33 = vrot.slane %v3463_v38, %v8660_v34  ;;  %v8757_v41 = vrot.slane %v3464_v8, %v8660_v34  ;;  %v4320_v47 = vmax.f32 %v4318_v14, %v4319_v25  ;;  %v4207_v59 = vrot.slane %v4206_v45, 4 }
 0x20a   : > { %v4375_v17 = vrot.slane %v4374_v30, 4  ;;  %v4262_v40 = vsel %vm4205_vm5, %v8760_v20, -inf  ;;  %v7861_v10 = vcombine.low %v8671_v62, %v8671_v62  ;;  %v4276_v3 = vsel %vm4205_vm5, %v8775_v23, -inf }
 0x20b   : > { %v4263_v60 = vrot.slane %v4262_v40, 4  ;;  %v4321_v38 = vrot.slane %v4320_v47, 2  ;;  %v4208_v8 = vmax.f32 %v4206_v45, %v4207_v59 }
 0x20c   : > { %v4376_v5 = vmax.f32 %v4374_v30, %v4375_v17 }
 0x20d   : > { %v4264_v42 = vmax.f32 %v4262_v40, %v4263_v60  ;;  %v4322_v32 = vmax.f32 %v4320_v47, %v4321_v38  ;;  %v4209_v56 = vrot.slane %v4208_v8, 2 }
 0x20e   : > { %v4377_v13 = vrot.slane %v4376_v5, 2 }
 0x211   : > { %v3109_v54 = vpop.f32.mrf.mxu0  ;;  %v3162_v24 = vpop.f32.mrf.mxu1 }
 0x212   : > { %v3185_v37 = vadd.f32 %v3109_v54, %v8613_v1  ;;  %v3187_v27 = vadd.f32 %v3162_v24, %v8615_v61  ;;  %v4265_v1 = vrot.slane %v4264_v42, 2  ;;  %v8788_v61 = vrot.slane %v7861_v10, %v8660_v34 }
 0x213   : > { %v3111_v50 = vpop.f32.mrf.mxu0  ;;  %v3164_v25 = vpop.f32.mrf.mxu1  ;;  %v4378_v24 = vmax.f32 %v4376_v5, %v4377_v13 }
 0x214   : > { %v3186_v14 = vadd.f32 %v3111_v50, %v8617_v6  ;;  %v3188_v62 = vadd.f32 %v3164_v25, %v8619_v9  ;;  %v4323_v6 = vrot.slane %v4322_v32, 1  ;;  %v4210_v50 = vmax.f32 %v4208_v8, %v4209_v56 }
 0x215   : > { %v3113_v53 = vpop.f32.mrf.mxu0  ;;  %v3166_v30 = vpop.f32.mrf.mxu1  ;;  %v4379_v8 = vrot.slane %v4378_v24, 1 }
 0x216   : > { %v3281_v45 = vcombine.low %v3185_v37, %v3186_v14  ;;  %v3282_v59 = vcombine.high %v3185_v37, %v3186_v14  ;;  %v3283_v54 = vcombine.low %v3187_v27, %v3188_v62  ;;  %v3284_v17 = vcombine.high %v3187_v27, %v3188_v62 }
 0x217   : > { %v3115_v40 = vpop.f32.mrf.mxu0  ;;  %v4266_v37 = vmax.f32 %v4264_v42, %v4265_v1  ;;  %v3168_v60 = vpop.f32.mrf.mxu1  ;;  %v4324_v38 = vmax.f32 %v4322_v32, %v4323_v6  ;;  %v4211_v14 = vrot.slane %v4210_v50, 1  ;;  %v4277_v62 = vrot.slane %v4276_v3, 4 }
 0x218   : > { %v8791_v47 = vrot.slane %v3281_v45, %v8660_v34  ;;  %v8794_v9 = vrot.slane %v3282_v59, %v8660_v34  ;;  %v8797_v10 = vrot.slane %v3283_v54, %v8660_v34  ;;  %v8800_v56 = vrot.slane %v3284_v17, %v8660_v34 }
 0x219   : > { %v4267_v27 = vrot.slane %v4266_v37, 1  ;;  %v3194_v25 = vadd.f32 %v3115_v40, %v8625_v15  ;;  %v7865_v45 = vcombine.low %v8674_v4, %v8674_v4  ;;  %5122 = vrot.lane.b32.xlu1 %v4324_v38, %s8112_s25  ;;  %v4212_v13 = vmax.f32 %v4210_v50, %v4211_v14  ;;  %v3119_v42 = vpop.f32.mrf.mxu0  ;;  %v3172_v54 = vpop.f32.mrf.mxu1 }
 0x21a   : > { %v3193_v1 = vadd.f32 %v3113_v53, %v8621_v12  ;;  %v4220_v6 = vsel %vm4205_vm5, %v8788_v61, -inf  ;;  %v5489_v50 = vrot.slane %v4324_v38, 6  ;;  %v4380_v17 = vmax.f32 %v4378_v24, %v4379_v8 }
 0x21b   : > { %5118 = vrot.lane.b32.xlu0 %v4212_v13, %s8112_s25  ;;  %v4268_v40 = vmax.f32 %v4266_v37, %v4267_v27  ;;  %v3195_v14 = vadd.f32 %v3166_v30, %v8623_v63  ;;  %v3196_v59 = vadd.f32 %v3168_v60, %v8627_v21  ;;  %v4278_v52 = vmax.f32 %v4276_v3, %v4277_v62  ;;  %v3121_v38 = vpop.f32.mrf.mxu0  ;;  %v3174_v37 = vpop.f32.mrf.mxu1 }
 0x21c   : > { %v3353_v32 = vcombine.low %v3193_v1, %v3194_v25  ;;  %v3354_v5 = vcombine.high %v3193_v1, %v3194_v25  ;;  %v7867_v15 = vcombine.high %v8674_v4, %v8674_v4  ;;  %v5492_v12 = vrot.slane %v4380_v17, 5 }
 0x21d   : > { %5124 = vrot.lane.b32.xlu1 %v4380_v17, %s8112_s25  ;;  %v5486_v53 = vrot.slane %v4268_v40, 7  ;;  %v4221_v49 = vrot.slane %v4220_v6, 4  ;;  %v3355_v63 = vcombine.low %v3195_v14, %v3196_v59  ;;  %v3356_v30 = vcombine.high %v3195_v14, %v3196_v59 }
 0x21e   : > { %v8824_v31 = vrot.slane %v3353_v32, %v8660_v34  ;;  %v8827_v24 = vrot.slane %v3354_v5, %v8660_v34  ;;  %v4279_v4 = vrot.slane %v4278_v52, 2  ;;  %v3201_v60 = vadd.f32 %v3119_v42, %v8629_v36 }
 0x21f   : > { %5120 = vrot.lane.b32.xlu0 %v4268_v40, %s8112_s25  ;;  %v5488_v21 = vsel %vm5487_vm6, %v5486_v53, %v4212_v13  ;;  %v4222_v3 = vmax.f32 %v4220_v6, %v4221_v49  ;;  %v8834_v27 = vrot.slane %v3355_v63, %v8660_v34  ;;  %v8837_v25 = vrot.slane %v3356_v30, %v8660_v34  ;;  %v3123_v30 = vpop.f32.mrf.mxu0 }
 0x220   : > { %v5491_v8 = vsel %vm5490_vm7, %v5489_v50, %v5488_v21  ;;  %v3202_v62 = vadd.f32 %v3121_v38, %v8633_v35  ;;  %v4280_v5 = vmax.f32 %v4278_v52, %v4279_v4  ;;  %v3204_v13 = vadd.f32 %v3174_v37, %v8635_v43  ;;  %v3176_v37 = vpop.f32.mrf.mxu1 }
 0x221   : > { %v8841_v32 = vsel %vm5493_vm8, %v5492_v12, %v5491_v8  ;;  %v4223_v59 = vrot.slane %v4222_v3, 2  ;;  %v7869_v35 = vcombine.low %v8697_v29, %v8697_v29  ;;  %v7871_v52 = vcombine.high %v8697_v29, %v8697_v29 }
 0x222   : > { %v3548_v43 = vcombine.high %v8748_v28, %v8748_v28  ;;  %v3203_v6 = vadd.f32 %v3172_v54, %v8631_v39  ;;  %v4281_v50 = vrot.slane %v4280_v5, 1  ;;  %v3425_v40 = vcombine.low %v3201_v60, %v3202_v62 }
 0x223   : > { %v4224_v17 = vmax.f32 %v4222_v3, %v4223_v59  ;;  %v3426_v14 = vcombine.high %v3201_v60, %v3202_v62  ;;  %v8860_v38 = vrot.slane %v7867_v15, %v8660_v34  ;;  %v8863_v63 = vrot.slane %v7865_v45, %v8660_v34 }
 0x224   : > { %v3427_v12 = vcombine.low %v3203_v6, %v3204_v13  ;;  %v3428_v53 = vcombine.high %v3203_v6, %v3204_v13  ;;  %v4282_v21 = vmax.f32 %v4280_v5, %v4281_v50  ;;  %v8866_v28 = vrot.slane %v3425_v40, %v8660_v34  ;;  %v3125_v40 = vpop.f32.mrf.mxu0 }
 0x225   : > { %v4225_v4 = vrot.slane %v4224_v17, 1  ;;  %v8869_v39 = vrot.slane %v3426_v14, %v8660_v34  ;;  %v4388_v45 = vsel %vm4205_vm5, %v8860_v38, -inf  ;;  %v4332_v15 = vsel %vm4205_vm5, %v8863_v63, -inf  ;;  %v3178_v14 = vpop.f32.mrf.mxu1 }
 0x226   : > { %v8872_v54 = vrot.slane %v3427_v12, %v8660_v34  ;;  %v8875_v3 = vrot.slane %v3428_v53, %v8660_v34  ;;  %v5605_v60 = vrot.slane %v4282_v21, 7  ;;  %5216 = vrot.lane.b32.xlu1 %v4282_v21, %s8112_s25  ;;  %v4389_v62 = vrot.slane %v4388_v45, 4 }
 0x227   : > { %v4226_v8 = vmax.f32 %v4224_v17, %v4225_v4  ;;  %v4333_v5 = vrot.slane %v4332_v15, 4  ;;  %v3616_v50 = vcombine.high %v8727_v51, %v8727_v51  ;;  %v3209_v1 = vadd.f32 %v3123_v30, %v8637_v58 }
 0x228   : > { %11272 = vst [vmem:[#allocation12_spill] sm:$0xff] %v8875_v3  ;;  %v4390_v6 = vmax.f32 %v4388_v45, %v4389_v62  ;;  %v3211_v49 = vadd.f32 %v3176_v37, %v8639_v11  ;;  %v3210_v42 = vadd.f32 %v3125_v40, %v8641_v48  ;;  %v3212_v36 = vadd.f32 %v3178_v14, %v8643_v7 }
 0x229   : > { %v5606_v21 = vsel %vm5487_vm6, %v5605_v60, %v4226_v8  ;;  %5214 = vrot.lane.b32.xlu0 %v4226_v8, %s8112_s25  ;;  %v4334_v59 = vmax.f32 %v4332_v15, %v4333_v5  ;;  %v3582_v8 = vcombine.high %v8760_v20, %v8760_v20  ;;  %v4213_v53 = vsel %vm4205_vm5, %v3548_v43, -inf }
 0x22a   : > { %v4391_v13 = vrot.slane %v4390_v6, 2  ;;  %v3497_v4 = vcombine.low %v3209_v1, %v3210_v42  ;;  %v3498_v12 = vcombine.high %v3209_v1, %v3210_v42  ;;  %v3499_v51 = vcombine.low %v3211_v49, %v3212_v36 }
 0x22b   : > { %v4335_v60 = vrot.slane %v4334_v59, 2  ;;  %v3500_v45 = vcombine.high %v3211_v49, %v3212_v36  ;;  %v4269_v58 = vsel %vm4205_vm5, %v3582_v8, -inf  ;;  %v4214_v11 = vrot.slane %v4213_v53, 4 }
 0x22c   : > { %v4392_v15 = vmax.f32 %v4390_v6, %v4391_v13  ;;  %v8911_v48 = vrot.slane %v3497_v4, %v8660_v34  ;;  %v8914_v7 = vrot.slane %v3498_v12, %v8660_v34  ;;  %v8917_v30 = vrot.slane %v3499_v51, %v8660_v34 }
 0x22d   : > { %v4336_v62 = vmax.f32 %v4334_v59, %v4335_v60  ;;  %v8920_v20 = vrot.slane %v3500_v45, %v8660_v34  ;;  %v4270_v36 = vrot.slane %v4269_v58, 4  ;;  %v4215_v49 = vmax.f32 %v4213_v53, %v4214_v11 }
 0x22e   : > { %11273 = vst [vmem:[#allocation13_spill] sm:$0xff] %v8911_v48  ;;  %11274 = vst [vmem:[#allocation14_spill] sm:$0xff] %v8914_v7  ;;  %v4393_v42 = vrot.slane %v4392_v15, 1  ;;  %v3650_v45 = vcombine.high %v8751_v46, %v8751_v46  ;;  %v3549_v59 = vcombine.high %v8788_v61, %v8788_v61 }
 0x22f   : > { %11275 = vst [vmem:[#allocation15_spill] sm:$0xff] %v8917_v30  ;;  %11276 = vst [vmem:[#allocation16_spill] sm:$0xff] %v8920_v20  ;;  %v4337_v1 = vrot.slane %v4336_v62, 1  ;;  %v4271_v4 = vmax.f32 %v4269_v58, %v4270_v36  ;;  %v4216_v60 = vrot.slane %v4215_v49, 2  ;;  %v3583_v58 = vcombine.high %v8775_v23, %v8775_v23 }
 0x230   : > { %v8934_v40 = vmax.f32 %v4392_v15, %v4393_v42  ;;  %v4325_v15 = vsel %vm4205_vm5, %v3616_v50, -inf  ;;  %v4381_v36 = vsel %vm4205_vm5, %v3650_v45, -inf }
 0x231   : > { %v4338_v14 = vmax.f32 %v4336_v62, %v4337_v1  ;;  %v4272_v62 = vrot.slane %v4271_v4, 2  ;;  %v4217_v11 = vmax.f32 %v4215_v49, %v4216_v60  ;;  %v4326_v42 = vrot.slane %v4325_v15, 4 }
 0x232   : > { %v5609_v8 = vrot.slane %v8934_v40, 5  ;;  %5220 = vrot.lane.b32.xlu1 %v8934_v40, %s8112_s25  ;;  %v4382_v50 = vrot.slane %v4381_v36, 4  ;;  %v4283_v49 = vsel %vm4205_vm5, %v3583_v58, -inf  ;;  %v4227_v60 = vsel %vm4205_vm5, %v3549_v59, -inf }
 0x233   : > { %v5607_v51 = vrot.slane %v4338_v14, 6  ;;  %5218 = vrot.lane.b32.xlu0 %v4338_v14, %s8112_s25  ;;  %v3651_v14 = vcombine.high %v8860_v38, %v8860_v38  ;;  %v4273_v46 = vmax.f32 %v4271_v4, %v4272_v62  ;;  %v4218_v5 = vrot.slane %v4217_v11, 1 }
 0x234   : > { %v4327_v37 = vmax.f32 %v4325_v15, %v4326_v42  ;;  %v4383_v43 = vmax.f32 %v4381_v36, %v4382_v50  ;;  %v4284_v12 = vrot.slane %v4283_v49, 4  ;;  %v4228_v53 = vrot.slane %v4227_v60, 4 }
 0x235   : > { %v8950_v1 = vsel %vm5490_vm7, %v5607_v51, %v5606_v21  ;;  %v4395_v23 = vsel %vm4205_vm5, %v3651_v14, -inf  ;;  %v3617_v21 = vcombine.high %v8863_v63, %v8863_v63  ;;  %v4274_v51 = vrot.slane %v4273_v46, 1 }
 0x236   : > { %v4219_v45 = vmax.f32 %v4217_v11, %v4218_v5  ;;  %v4328_v61 = vrot.slane %v4327_v37, 2  ;;  %v4396_v38 = vrot.slane %v4395_v23, 4  ;;  %v4384_v15 = vrot.slane %v4383_v43, 2 }
 0x237   : > { %v4339_v4 = vsel %vm4205_vm5, %v3617_v21, -inf  ;;  %v4275_v62 = vmax.f32 %v4273_v46, %v4274_v51  ;;  %v4285_v58 = vmax.f32 %v4283_v49, %v4284_v12  ;;  %v4229_v14 = vmax.f32 %v4227_v60, %v4228_v53 }
 0x238   : > { %5166 = vrot.lane.b32.xlu0 %v4219_v45, %s8112_s25  ;;  %v4329_v42 = vmax.f32 %v4327_v37, %v4328_v61  ;;  %v4340_v59 = vrot.slane %v4339_v4, 4  ;;  %v4397_v13 = vmax.f32 %v4395_v23, %v4396_v38  ;;  %v11277_v63 = vcombine.high %v8683_v26, %v8697_v29 }
 0x239   : > { %5168 = vrot.lane.b32.xlu1 %v4275_v62, %s8112_s25  ;;  %v5549_v11 = vrot.slane %v4275_v62, 7  ;;  %v4385_v36 = vmax.f32 %v4383_v43, %v4384_v15  ;;  %v4286_v21 = vrot.slane %v4285_v58, 2  ;;  %v4230_v51 = vrot.slane %v4229_v14, 2 }
 0x23a   : > { %v8968_v5 = vrot.slane %v11277_v63, %v8660_v34  ;;  %v4330_v50 = vrot.slane %v4329_v42, 1  ;;  %v4341_v46 = vmax.f32 %v4339_v4, %v4340_v59  ;;  %v4398_v6 = vrot.slane %v4397_v13, 2 }
 0x23b   : > { %v5550_v12 = vsel %vm5487_vm6, %v5549_v11, %v4219_v45  ;;  %v4386_v53 = vrot.slane %v4385_v36, 1  ;;  %v4287_v23 = vmax.f32 %v4285_v58, %v4286_v21  ;;  %v4231_v61 = vmax.f32 %v4229_v14, %v4230_v51 }
 0x23c   : > { %v4486_v37 = vsel %vm4205_vm5, %v8968_v5, -inf  ;;  %v4331_v49 = vmax.f32 %v4329_v42, %v4330_v50  ;;  %v4342_v60 = vrot.slane %v4341_v46, 2  ;;  %v4399_v38 = vmax.f32 %v4397_v13, %v4398_v6 }
 0x23d   : > { %v4487_v63 = vrot.slane %v4486_v37, 4  ;;  %v8974_v17 = vmax.f32 %v4385_v36, %v4386_v53  ;;  %v11278_v62 = vcombine.low %v8683_v26, %v8697_v29  ;;  %v4288_v45 = vrot.slane %v4287_v23, 1 }
 0x23e   : > { %v5551_v43 = vrot.slane %v4331_v49, 6  ;;  %5170 = vrot.lane.b32.xlu0 %v4331_v49, %s8112_s25  ;;  %v4343_v4 = vmax.f32 %v4341_v46, %v4342_v60  ;;  %v4232_v59 = vrot.slane %v4231_v61, 1  ;;  %v4400_v42 = vrot.slane %v4399_v38, 1 }
 0x23f   : > { %v8981_v15 = vrot.slane %v11278_v62, %v8660_v34  ;;  %v4488_v11 = vmax.f32 %v4486_v37, %v4487_v63  ;;  %5172 = vrot.lane.b32.xlu1 %v8974_v17, %s8112_s25  ;;  %v4289_v36 = vmax.f32 %v4287_v23, %v4288_v45  ;;  %v11279_v37 = vcombine.high %v8687_v19, %v8700_v44 }
 0x240   : > { %v8987_v13 = vsel %vm5490_vm7, %v5551_v43, %v5550_v12  ;;  %v4344_v6 = vrot.slane %v4343_v4, 1  ;;  %v4233_v26 = vmax.f32 %v4231_v61, %v4232_v59  ;;  %v8991_v50 = vmax.f32 %v4399_v38, %v4400_v42 }
 0x241   : > { %v4430_v14 = vsel %vm4205_vm5, %v8981_v15, -inf  ;;  %v4489_v46 = vrot.slane %v4488_v11, 2  ;;  %v8997_v53 = vrot.slane %v11279_v37, %v8660_v34  ;;  %v11280_v12 = vcombine.low %v8687_v19, %v8700_v44 }
 0x242   : > { %v4345_v21 = vmax.f32 %v4343_v4, %v4344_v6  ;;  %v4431_v51 = vrot.slane %v4430_v14, 4  ;;  %v5661_v60 = vrot.slane %v4289_v36, 7  ;;  %5262 = vrot.lane.b32.xlu0 %v4233_v26, %s8112_s25  ;;  %v9011_v38 = vrot.slane %v7871_v52, %v8660_v34 }
 0x243   : > { %v9003_v49 = vrot.slane %v11280_v12, %v8660_v34  ;;  %v4490_v61 = vmax.f32 %v4488_v11, %v4489_v46  ;;  %5264 = vrot.lane.b32.xlu1 %v4289_v36, %s8112_s25  ;;  %v4598_v19 = vsel %vm4205_vm5, %v8997_v53, -inf  ;;  %v9039_v29 = vsel %vm5493_vm8, %v5609_v8, %v8950_v1 }
 0x244   : > { %v5663_v63 = vrot.slane %v4345_v21, 6  ;;  %v4432_v43 = vmax.f32 %v4430_v14, %v4431_v51  ;;  %v5662_v62 = vsel %vm5487_vm6, %v5661_v60, %v4233_v26  ;;  %v4599_v59 = vrot.slane %v4598_v19, 4 }
 0x245   : > { %v4542_v4 = vsel %vm4205_vm5, %v9003_v49, -inf  ;;  %v4491_v45 = vrot.slane %v4490_v61, 1  ;;  %v4500_v6 = vsel %vm4205_vm5, %v9011_v38, -inf  ;;  %v9028_v14 = vrot.slane %v7869_v35, %v8660_v34 }
 0x246   : > { %v4543_v42 = vrot.slane %v4542_v4, 4  ;;  %v9020_v11 = vsel %vm5490_vm7, %v5663_v63, %v5662_v62  ;;  %v4433_v52 = vrot.slane %v4432_v43, 2  ;;  %5266 = vrot.lane.b32.xlu0 %v4345_v21, %s8112_s25  ;;  %v4600_v26 = vmax.f32 %v4598_v19, %v4599_v59 }
 0x247   : > { %v4492_v36 = vmax.f32 %v4490_v61, %v4491_v45  ;;  %v4501_v51 = vrot.slane %v4500_v6, 4  ;;  %5268 = vrot.lane.b32.xlu1 %v8991_v50, %s8112_s25  ;;  %v4444_v12 = vsel %vm4205_vm5, %v9028_v14, -inf  ;;  %v11281_v35 = vcombine.high %v8700_v44, %v8700_v44 }
 0x248   : > { %v4544_v46 = vmax.f32 %v4542_v4, %v4543_v42  ;;  %v4434_v37 = vmax.f32 %v4432_v43, %v4433_v52  ;;  %v4601_v61 = vrot.slane %v4600_v26, 2  ;;  %v4445_v4 = vrot.slane %v4444_v12, 4 }
 0x249   : > { %v9045_v21 = vrot.slane %v11281_v35, %v8660_v34  ;;  %v5498_v60 = vrot.slane %v4492_v36, 3  ;;  %v4502_v43 = vmax.f32 %v4500_v6, %v4501_v51  ;;  %v11282_v40 = vcombine.low %v8700_v44, %v8700_v44 }
 0x24a   : > { %v4545_v63 = vrot.slane %v4544_v46, 2  ;;  %v4435_v19 = vrot.slane %v4434_v37, 1  ;;  %v4602_v1 = vmax.f32 %v4600_v26, %v4601_v61  ;;  %v4446_v35 = vmax.f32 %v4444_v12, %v4445_v4 }
 0x24b   : > { %v4612_v62 = vsel %vm4205_vm5, %v9045_v21, -inf  ;;  %v9053_v8 = vrot.slane %v11282_v40, %v8660_v34  ;;  %v4503_v59 = vrot.slane %v4502_v43, 2  ;;  %5128 = vrot.lane.b32.xlu1 %v4492_v36, %s8112_s25  ;;  %v3718_v51 = vcombine.high %v8968_v5, %v8968_v5 }
 0x24c   : > { %v4546_v45 = vmax.f32 %v4544_v46, %v4545_v63  ;;  %v4613_v42 = vrot.slane %v4612_v62, 4  ;;  %v4436_v52 = vmax.f32 %v4434_v37, %v4435_v19  ;;  %v4603_v23 = vrot.slane %v4602_v1, 1 }
 0x24d   : > { %v4556_v6 = vsel %vm4205_vm5, %v9053_v8, -inf  ;;  %v4504_v2 = vmax.f32 %v4502_v43, %v4503_v59  ;;  %v4447_v26 = vrot.slane %v4446_v35, 2  ;;  %v4493_v61 = vsel %vm4205_vm5, %v3718_v51, -inf }
 0x24e   : > { %v4547_v58 = vrot.slane %v4546_v45, 1  ;;  %v4614_v44 = vmax.f32 %v4612_v62, %v4613_v42  ;;  %v5495_v40 = vrot.slane %v4436_v52, 4  ;;  %5126 = vrot.lane.b32.xlu0 %v4436_v52, %s8112_s25  ;;  %v4557_v46 = vrot.slane %v4556_v6, 4 }
 0x24f   : > { %v4604_v36 = vmax.f32 %v4602_v1, %v4603_v23  ;;  %v4505_v12 = vrot.slane %v4504_v2, 1  ;;  %v4448_v4 = vmax.f32 %v4446_v35, %v4447_v26  ;;  %v4494_v7 = vrot.slane %v4493_v61, 4 }
 0x250   : > { %v4548_v37 = vmax.f32 %v4546_v45, %v4547_v58  ;;  %v4615_v63 = vrot.slane %v4614_v44, 2  ;;  %v5497_v19 = vsel %vm5496_vm9, %v5495_v40, %v8841_v32  ;;  %v4558_v5 = vmax.f32 %v4556_v6, %v4557_v46 }
 0x251   : > { %v5504_v48 = vrot.slane %v4604_v36, 1  ;;  %5132 = vrot.lane.b32.xlu1 %v4604_v36, %s8112_s25  ;;  %v5500_v43 = vsel %vm5499_vm10, %v5498_v60, %v5497_v19  ;;  %v4506_v59 = vmax.f32 %v4504_v2, %v4505_v12  ;;  %v4449_v42 = vrot.slane %v4448_v4, 1 }
 0x252   : > { %v5501_v62 = vrot.slane %v4548_v37, 2  ;;  %5130 = vrot.lane.b32.xlu0 %v4548_v37, %s8112_s25  ;;  %v4616_v23 = vmax.f32 %v4614_v44, %v4615_v63  ;;  %v4559_v58 = vrot.slane %v4558_v5, 2  ;;  %v4495_v1 = vmax.f32 %v4493_v61, %v4494_v7 }
 0x253   : > { %v5613_v52 = vrot.slane %v4506_v59, 3  ;;  %v3684_v32 = vcombine.high %v8981_v15, %v8981_v15  ;;  %v11283_v35 = vrot.slane %v8974_v17, 5  ;;  %v4450_v60 = vmax.f32 %v4448_v4, %v4449_v42 }
 0x254   : > { %v5503_v45 = vsel %vm5502_vm11, %v5501_v62, %v5500_v43  ;;  %v4617_v51 = vrot.slane %v4616_v23, 1  ;;  %v4560_v44 = vmax.f32 %v4558_v5, %v4559_v58  ;;  %v4496_v7 = vrot.slane %v4495_v1, 2 }
 0x255   : > { %v9074_v6 = vsel %vm5493_vm8, %v11283_v35, %v8987_v13  ;;  %v9077_v2 = vsel %vm5505_vm12, %v5504_v48, %v5503_v45  ;;  %5224 = vrot.lane.b32.xlu1 %v4506_v59, %s8112_s25  ;;  %v4437_v40 = vsel %vm4205_vm5, %v3684_v32, -inf  ;;  %v3786_v15 = vcombine.high %v8997_v53, %v8997_v53 }
 0x256   : > { %11284 = vst [vmem:[#allocation17_spill] sm:$0xff] %v9077_v2  ;;  %v3752_v17 = vcombine.high %v9003_v49, %v9003_v49  ;;  %v5611_v26 = vrot.slane %v4450_v60, 4  ;;  %5222 = vrot.lane.b32.xlu0 %v4450_v60, %s8112_s25  ;;  %v4618_v13 = vmax.f32 %v4616_v23, %v4617_v51  ;;  %v4561_v48 = vrot.slane %v4560_v44, 1 }
 0x257   : > { %v4438_v46 = vrot.slane %v4437_v40, 4  ;;  %v4497_v61 = vmax.f32 %v4495_v1, %v4496_v7  ;;  %v4605_v36 = vsel %vm4205_vm5, %v3786_v15, -inf  ;;  %v3719_v12 = vcombine.high %v9011_v38, %v9011_v38 }
 0x258   : > { %v4549_v37 = vsel %vm4205_vm5, %v3752_v17, -inf  ;;  %v5612_v53 = vsel %vm5496_vm9, %v5611_v26, %v9039_v29  ;;  %v5617_v63 = vrot.slane %v4618_v13, 1  ;;  %v4562_v19 = vmax.f32 %v4560_v44, %v4561_v48 }
 0x259   : > { %v4439_v49 = vmax.f32 %v4437_v40, %v4438_v46  ;;  %5228 = vrot.lane.b32.xlu1 %v4618_v13, %s8112_s25  ;;  %v5614_v4 = vsel %vm5499_vm10, %v5613_v52, %v5612_v53  ;;  %v4498_v5 = vrot.slane %v4497_v61, 1  ;;  %v4606_v43 = vrot.slane %v4605_v36, 4 }
 0x25a   : > { %v4550_v62 = vrot.slane %v4549_v37, 4  ;;  %v5615_v59 = vrot.slane %v4562_v19, 2  ;;  %5226 = vrot.lane.b32.xlu0 %v4562_v19, %s8112_s25  ;;  %v4507_v23 = vsel %vm4205_vm5, %v3719_v12, -inf  ;;  %v3685_v38 = vcombine.high %v9028_v14, %v9028_v14 }
 0x25b   : > { %v4440_v42 = vrot.slane %v4439_v49, 2  ;;  %v4499_v29 = vmax.f32 %v4497_v61, %v4498_v5  ;;  %v4607_v58 = vmax.f32 %v4605_v36, %v4606_v43  ;;  %v4508_v45 = vrot.slane %v4507_v23, 4 }
 0x25c   : > { %v4551_v1 = vmax.f32 %v4549_v37, %v4550_v62  ;;  %v5616_v32 = vsel %vm5502_vm11, %v5615_v59, %v5614_v4  ;;  %v4451_v52 = vsel %vm4205_vm5, %v3685_v38, -inf  ;;  %v11285_v60 = vrot.slane %v8991_v50, 5 }
 0x25d   : > { %v4441_v35 = vmax.f32 %v4439_v49, %v4440_v42  ;;  %v9107_v44 = vsel %vm5505_vm12, %v5617_v63, %v5616_v32  ;;  %v5557_v7 = vrot.slane %v4499_v29, 3  ;;  %5176 = vrot.lane.b32.xlu1 %v4499_v29, %s8112_s25  ;;  %v4608_v14 = vrot.slane %v4607_v58, 2 }
 0x25e   : > { %v9104_v51 = vsel %vm5493_vm8, %v11285_v60, %v9020_v11  ;;  %11286 = vst [vmem:[#allocation18_spill] sm:$0xff] %v9107_v44  ;;  %v4552_v40 = vrot.slane %v4551_v1, 2  ;;  %v4509_v17 = vmax.f32 %v4507_v23, %v4508_v45  ;;  %v4452_v26 = vrot.slane %v4451_v52, 4 }
 0x25f   : > { %v4442_v15 = vrot.slane %v4441_v35, 1  ;;  %v3787_v13 = vcombine.high %v9045_v21, %v9045_v21  ;;  %v4609_v48 = vmax.f32 %v4607_v58, %v4608_v14  ;;  %v3753_v50 = vcombine.high %v9053_v8, %v9053_v8 }
 0x260   : > { %v4553_v46 = vmax.f32 %v4551_v1, %v4552_v40  ;;  %v11287_v11 = vcombine.high %v8714_v16, %v8720_v57  ;;  %v4510_v37 = vrot.slane %v4509_v17, 2  ;;  %v4453_v12 = vmax.f32 %v4451_v52, %v4452_v26 }
 0x261   : > { %v4443_v36 = vmax.f32 %v4441_v35, %v4442_v15  ;;  %v4619_v53 = vsel %vm4205_vm5, %v3787_v13, -inf  ;;  %v4610_v63 = vrot.slane %v4609_v48, 1  ;;  %v4563_v21 = vsel %vm4205_vm5, %v3753_v50, -inf }
 0x262   : > { %v9118_v61 = vrot.slane %v11287_v11, %v8660_v34  ;;  %v4554_v19 = vrot.slane %v4553_v46, 1  ;;  %v4620_v49 = vrot.slane %v4619_v53, 4  ;;  %v4511_v8 = vmax.f32 %v4509_v17, %v4510_v37 }
 0x263   : > { %v5555_v4 = vrot.slane %v4443_v36, 4  ;;  %5174 = vrot.lane.b32.xlu0 %v4443_v36, %s8112_s25  ;;  %v4454_v5 = vrot.slane %v4453_v12, 2  ;;  %v4564_v43 = vrot.slane %v4563_v21, 4  ;;  %v4611_v62 = vmax.f32 %v4609_v48, %v4610_v63 }
 0x264   : > { %v4555_v59 = vmax.f32 %v4553_v46, %v4554_v19  ;;  %v4621_v42 = vmax.f32 %v4619_v53, %v4620_v49  ;;  %v4710_v23 = vsel %vm4205_vm5, %v9118_v61, -inf  ;;  %v4512_v29 = vrot.slane %v4511_v8, 1 }
 0x265   : > { %v5556_v38 = vsel %vm5496_vm9, %v5555_v4, %v9074_v6  ;;  %v4455_v58 = vmax.f32 %v4453_v12, %v4454_v5  ;;  %v4565_v1 = vmax.f32 %v4563_v21, %v4564_v43  ;;  %v5561_v45 = vrot.slane %v4611_v62, 1  ;;  %5180 = vrot.lane.b32.xlu1 %v4611_v62, %s8112_s25 }
 0x266   : > { %v5559_v32 = vrot.slane %v4555_v59, 2  ;;  %v5558_v35 = vsel %vm5499_vm10, %v5557_v7, %v5556_v38  ;;  %v4622_v52 = vrot.slane %v4621_v42, 2  ;;  %v4513_v60 = vmax.f32 %v4511_v8, %v4512_v29 }
 0x267   : > { %5178 = vrot.lane.b32.xlu0 %v4555_v59, %s8112_s25  ;;  %v4456_v14 = vrot.slane %v4455_v58, 1  ;;  %v4566_v40 = vrot.slane %v4565_v1, 2  ;;  %v4711_v15 = vrot.slane %v4710_v23, 4  ;;  %v11288_v6 = vcombine.low %v8714_v16, %v8720_v57 }
 0x268   : > { %v5560_v17 = vsel %vm5502_vm11, %v5559_v32, %v5558_v35  ;;  %v4623_v26 = vmax.f32 %v4621_v42, %v4622_v52  ;;  %v11289_v7 = vcombine.high %v8717_v55, %v8723_v0  ;;  %v5669_v50 = vrot.slane %v4513_v60, 3 }
 0x269   : > { %v9135_v13 = vrot.slane %v11288_v6, %v8660_v34  ;;  %v9144_v46 = vsel %vm5505_vm12, %v5561_v45, %v5560_v17  ;;  %v4457_v11 = vmax.f32 %v4455_v58, %v4456_v14  ;;  %v4567_v36 = vmax.f32 %v4565_v1, %v4566_v40  ;;  %5272 = vrot.lane.b32.xlu1 %v4513_v60, %s8112_s25 }
 0x26a   : > { %v9141_v48 = vrot.slane %v11289_v7, %v8660_v34  ;;  %11290 = vst [vmem:[#allocation19_spill] sm:$0xff] %v9144_v46  ;;  %v4624_v12 = vrot.slane %v4623_v26, 1  ;;  %v4712_v53 = vmax.f32 %v4710_v23, %v4711_v15  ;;  %v11291_v42 = vcombine.low %v8717_v55, %v8723_v0 }
 0x26b   : > { %v5667_v63 = vrot.slane %v4457_v11, 4  ;;  %5270 = vrot.lane.b32.xlu0 %v4457_v11, %s8112_s25  ;;  %v4568_v19 = vrot.slane %v4567_v36, 1  ;;  %v4654_v49 = vsel %vm4205_vm5, %v9135_v13, -inf  ;;  %v11292_v38 = vcombine.high %v8720_v57, %v8720_v57 }
 0x26c   : > { %v4822_v21 = vsel %vm4205_vm5, %v9141_v48, -inf  ;;  %v4625_v4 = vmax.f32 %v4623_v26, %v4624_v12  ;;  %v4713_v8 = vrot.slane %v4712_v53, 2  ;;  %v4655_v5 = vrot.slane %v4654_v49, 4 }
 0x26d   : > { %v4823_v43 = vrot.slane %v4822_v21, 4  ;;  %v5668_v62 = vsel %vm5496_vm9, %v5667_v63, %v9104_v51  ;;  %v4569_v59 = vmax.f32 %v4567_v36, %v4568_v19  ;;  %v9162_v23 = vrot.slane %v11291_v42, %v8660_v34 }
 0x26e   : > { %v9168_v29 = vrot.slane %v11292_v38, %v8660_v34  ;;  %v5673_v58 = vrot.slane %v4625_v4, 1  ;;  %5276 = vrot.lane.b32.xlu1 %v4625_v4, %s8112_s25  ;;  %v5670_v1 = vsel %vm5499_vm10, %v5669_v50, %v5668_v62  ;;  %v4714_v45 = vmax.f32 %v4712_v53, %v4713_v8 }
 0x26f   : > { %v4656_v51 = vmax.f32 %v4654_v49, %v4655_v5  ;;  %v5671_v32 = vrot.slane %v4569_v59, 2  ;;  %5274 = vrot.lane.b32.xlu0 %v4569_v59, %s8112_s25  ;;  %v4824_v35 = vmax.f32 %v4822_v21, %v4823_v43  ;;  %v4766_v55 = vsel %vm4205_vm5, %v9162_v23, -inf }
 0x270   : > { %v4724_v52 = vsel %vm4205_vm5, %v9168_v29, -inf  ;;  %v4715_v60 = vrot.slane %v4714_v45, 1  ;;  %v4767_v40 = vrot.slane %v4766_v55, 4  ;;  %v11293_v6 = vcombine.low %v8720_v57, %v8720_v57 }
 0x271   : > { %v4657_v14 = vrot.slane %v4656_v51, 2  ;;  %v4725_v15 = vrot.slane %v4724_v52, 4  ;;  %v5672_v17 = vsel %vm5502_vm11, %v5671_v32, %v5670_v1  ;;  %v4825_v26 = vrot.slane %v4824_v35, 2 }
 0x272   : > { %v9182_v7 = vrot.slane %v11293_v6, %v8660_v34  ;;  %v11294_v50 = vcombine.high %v8723_v0, %v8723_v0  ;;  %v9191_v36 = vsel %vm5505_vm12, %v5673_v58, %v5672_v17  ;;  %v4716_v12 = vmax.f32 %v4714_v45, %v4715_v60 }
 0x273   : > { %11295 = vst [vmem:[#allocation20_spill] sm:$0xff] %v9191_v36  ;;  %v4658_v53 = vmax.f32 %v4656_v51, %v4657_v14  ;;  %v4768_v63 = vmax.f32 %v4766_v55, %v4767_v40  ;;  %v4826_v49 = vmax.f32 %v4824_v35, %v4825_v26  ;;  %v4726_v21 = vmax.f32 %v4724_v52, %v4725_v15 }
 0x274   : > { %v9188_v11 = vrot.slane %v11294_v50, %v8660_v34  ;;  %v5507_v4 = vrot.slane %v4716_v12, 7  ;;  %5136 = vrot.lane.b32.xlu1 %v4716_v12, %s8112_s25  ;;  %v4668_v43 = vsel %vm4205_vm5, %v9182_v7, -inf  ;;  %v11296_v51 = vcombine.low %v8723_v0, %v8723_v0 }
 0x275   : > { %v4659_v8 = vrot.slane %v4658_v53, 1  ;;  %v4769_v5 = vrot.slane %v4768_v63, 2  ;;  %v4827_v62 = vrot.slane %v4826_v49, 1  ;;  %v4727_v59 = vrot.slane %v4726_v21, 2 }
 0x276   : > { %v4669_v42 = vrot.slane %v4668_v43, 4  ;;  %v4836_v38 = vsel %vm4205_vm5, %v9188_v11, -inf  ;;  %v9206_v32 = vrot.slane %v11296_v51, %v8660_v34  ;;  %v3854_v60 = vcombine.high %v9118_v61, %v9118_v61 }
 0x277   : > { %v4660_v58 = vmax.f32 %v4658_v53, %v4659_v8  ;;  %v4770_v1 = vmax.f32 %v4768_v63, %v4769_v5  ;;  %v4837_v45 = vrot.slane %v4836_v38, 4  ;;  %v9208_v35 = vmax.f32 %v4826_v49, %v4827_v62 }
 0x278   : > { %v4728_v55 = vmax.f32 %v4726_v21, %v4727_v59  ;;  %v4670_v52 = vmax.f32 %v4668_v43, %v4669_v42  ;;  %v4780_v17 = vsel %vm4205_vm5, %v9206_v32, -inf  ;;  %v7889_v0 = vcombine.low %v8757_v41, %v8757_v41 }
 0x279   : > { %v5508_v14 = vsel %vm5487_vm6, %v5507_v4, %v4660_v58  ;;  %5134 = vrot.lane.b32.xlu0 %v4660_v58, %s8112_s25  ;;  %v4771_v40 = vrot.slane %v4770_v1, 1  ;;  %v4838_v15 = vmax.f32 %v4836_v38, %v4837_v45  ;;  %5140 = vrot.lane.b32.xlu1 %v9208_v35, %s8112_s25  ;;  %v4781_v50 = vrot.slane %v4780_v17, 4 }
 0x27a   : > { %v4729_v26 = vrot.slane %v4728_v55, 1  ;;  %v4671_v6 = vrot.slane %v4670_v52, 2  ;;  %v4717_v53 = vsel %vm4205_vm5, %v3854_v60, -inf  ;;  %v3820_v63 = vcombine.high %v9135_v13, %v9135_v13 }
 0x27b   : > { %v4772_v12 = vmax.f32 %v4770_v1, %v4771_v40  ;;  %v4839_v61 = vrot.slane %v4838_v15, 2  ;;  %v4782_v4 = vmax.f32 %v4780_v17, %v4781_v50  ;;  %v4718_v8 = vrot.slane %v4717_v53, 4 }
 0x27c   : > { %v4730_v49 = vmax.f32 %v4728_v55, %v4729_v26  ;;  %v4672_v21 = vmax.f32 %v4670_v52, %v4671_v6  ;;  %v4661_v62 = vsel %vm4205_vm5, %v3820_v63, -inf  ;;  %v3922_v59 = vcombine.high %v9141_v48, %v9141_v48 }
 0x27d   : > { %v5509_v5 = vrot.slane %v4772_v12, 6  ;;  %5138 = vrot.lane.b32.xlu0 %v4772_v12, %s8112_s25  ;;  %v4840_v43 = vmax.f32 %v4838_v15, %v4839_v61  ;;  %v4783_v58 = vrot.slane %v4782_v4, 2  ;;  %v4719_v1 = vmax.f32 %v4717_v53, %v4718_v8 }
 0x27e   : > { %v5619_v42 = vrot.slane %v4730_v49, 7  ;;  %5232 = vrot.lane.b32.xlu1 %v4730_v49, %s8112_s25  ;;  %v4673_v38 = vrot.slane %v4672_v21, 1  ;;  %v4662_v51 = vrot.slane %v4661_v62, 4  ;;  %v4829_v55 = vsel %vm4205_vm5, %v3922_v59, -inf }
 0x27f   : > { %v9229_v13 = vsel %vm5490_vm7, %v5509_v5, %v5508_v14  ;;  %v4841_v45 = vrot.slane %v4840_v43, 1  ;;  %v4784_v60 = vmax.f32 %v4782_v4, %v4783_v58  ;;  %v4720_v40 = vrot.slane %v4719_v1, 2 }
 0x280   : > { %v4674_v52 = vmax.f32 %v4672_v21, %v4673_v38  ;;  %v4830_v15 = vrot.slane %v4829_v55, 4  ;;  %v4663_v48 = vmax.f32 %v4661_v62, %v4662_v51  ;;  %v3888_v26 = vcombine.high %v9162_v23, %v9162_v23 }
 0x281   : > { %v9232_v17 = vmax.f32 %v4840_v43, %v4841_v45  ;;  %v3855_v6 = vcombine.high %v9168_v29, %v9168_v29  ;;  %v4785_v50 = vrot.slane %v4784_v60, 1  ;;  %v4721_v12 = vmax.f32 %v4719_v1, %v4720_v40 }
 0x282   : > { %v5620_v14 = vsel %vm5487_vm6, %v5619_v42, %v4674_v52  ;;  %5230 = vrot.lane.b32.xlu0 %v4674_v52, %s8112_s25  ;;  %v4831_v61 = vmax.f32 %v4829_v55, %v4830_v15  ;;  %v7891_v53 = vcombine.high %v8757_v41, %v8757_v41  ;;  %v4664_v63 = vrot.slane %v4663_v48, 2 }
 0x283   : > { %5236 = vrot.lane.b32.xlu1 %v9232_v17, %s8112_s25  ;;  %v4773_v49 = vsel %vm4205_vm5, %v3888_v26, -inf  ;;  %v4731_v23 = vsel %vm4205_vm5, %v3855_v6, -inf  ;;  %v4786_v21 = vmax.f32 %v4784_v60, %v4785_v50  ;;  %v4722_v29 = vrot.slane %v4721_v12, 1 }
 0x284   : > { %v4832_v4 = vrot.slane %v4831_v61, 2  ;;  %v4774_v8 = vrot.slane %v4773_v49, 4  ;;  %v4665_v5 = vmax.f32 %v4663_v48, %v4664_v63  ;;  %v4732_v43 = vrot.slane %v4731_v23, 4 }
 0x285   : > { %v3821_v62 = vcombine.high %v9182_v7, %v9182_v7  ;;  %v3923_v59 = vcombine.high %v9188_v11, %v9188_v11  ;;  %v5621_v42 = vrot.slane %v4786_v21, 6  ;;  %v4723_v38 = vmax.f32 %v4721_v12, %v4722_v29 }
 0x286   : > { %5234 = vrot.lane.b32.xlu0 %v4786_v21, %s8112_s25  ;;  %v4833_v58 = vmax.f32 %v4831_v61, %v4832_v4  ;;  %v4775_v1 = vmax.f32 %v4773_v49, %v4774_v8  ;;  %v4666_v45 = vrot.slane %v4665_v5, 1  ;;  %v4733_v51 = vmax.f32 %v4731_v23, %v4732_v43 }
 0x287   : > { %v4675_v55 = vsel %vm4205_vm5, %v3821_v62, -inf  ;;  %v4843_v52 = vsel %vm4205_vm5, %v3923_v59, -inf  ;;  %v9254_v60 = vsel %vm5490_vm7, %v5621_v42, %v5620_v14  ;;  %v5563_v40 = vrot.slane %v4723_v38, 7  ;;  %5184 = vrot.lane.b32.xlu1 %v4723_v38, %s8112_s25 }
 0x288   : > { %v4834_v7 = vrot.slane %v4833_v58, 1  ;;  %v4776_v11 = vrot.slane %v4775_v1, 2  ;;  %v4667_v15 = vmax.f32 %v4665_v5, %v4666_v45  ;;  %v4734_v48 = vrot.slane %v4733_v51, 2 }
 0x289   : > { %v4676_v26 = vrot.slane %v4675_v55, 4  ;;  %v4844_v6 = vrot.slane %v4843_v52, 4  ;;  %v3889_v61 = vcombine.high %v9206_v32, %v9206_v32  ;;  %v11297_v14 = vcombine.high %v8738_v22, %v8754_v33 }
 0x28a   : > { %v9257_v50 = vmax.f32 %v4833_v58, %v4834_v7  ;;  %v4777_v12 = vmax.f32 %v4775_v1, %v4776_v11  ;;  %v5564_v49 = vsel %vm5487_vm6, %v5563_v40, %v4667_v15  ;;  %5182 = vrot.lane.b32.xlu0 %v4667_v15, %s8112_s25  ;;  %v4735_v23 = vmax.f32 %v4733_v51, %v4734_v48 }
 0x28b   : > { %v9265_v63 = vrot.slane %v11297_v14, %v8660_v34  ;;  %v4677_v21 = vmax.f32 %v4675_v55, %v4676_v26  ;;  %v4845_v29 = vmax.f32 %v4843_v52, %v4844_v6  ;;  %v5511_v4 = vrot.slane %v9208_v35, 5 }
 0x28c   : > { %5188 = vrot.lane.b32.xlu1 %v9257_v50, %s8112_s25  ;;  %v4778_v8 = vrot.slane %v4777_v12, 1  ;;  %v4787_v32 = vsel %vm4205_vm5, %v3889_v61, -inf  ;;  %v4736_v43 = vrot.slane %v4735_v23, 1  ;;  %v11298_v1 = vcombine.low %v8738_v22, %v8754_v33 }
 0x28d   : > { %v4934_v5 = vsel %vm4205_vm5, %v9265_v63, -inf  ;;  %v4678_v62 = vrot.slane %v4677_v21, 2  ;;  %v4846_v59 = vrot.slane %v4845_v29, 2  ;;  %v4788_v42 = vrot.slane %v4787_v32, 4 }
 0x28e   : > { %v4779_v38 = vmax.f32 %v4777_v12, %v4778_v8  ;;  %v4935_v58 = vrot.slane %v4934_v5, 4  ;;  %v9279_v35 = vrot.slane %v11298_v1, %v8660_v34  ;;  %v9283_v45 = vsel %vm5493_vm8, %v5511_v4, %v9229_v13 }
 0x28f   : > { %v4737_v51 = vmax.f32 %v4735_v23, %v4736_v43  ;;  %v4679_v55 = vmax.f32 %v4677_v21, %v4678_v62  ;;  %v4847_v52 = vmax.f32 %v4845_v29, %v4846_v59  ;;  %v4789_v40 = vmax.f32 %v4787_v32, %v4788_v42 }
 0x290   : > { %v5565_v7 = vrot.slane %v4779_v38, 6  ;;  %5186 = vrot.lane.b32.xlu0 %v4779_v38, %s8112_s25  ;;  %v4936_v11 = vmax.f32 %v4934_v5, %v4935_v58  ;;  %v4878_v15 = vsel %vm4205_vm5, %v9279_v35, -inf  ;;  %v11299_v22 = vcombine.high %v8741_v18, %v8757_v41  ;;  %v9314_v38 = vpop.permute.xlu0 %5118 }
 0x291   : > { %v5675_v26 = vrot.slane %v4737_v51, 7  ;;  %5280 = vrot.lane.b32.xlu1 %v4737_v51, %s8112_s25  ;;  %v4680_v13 = vrot.slane %v4679_v55, 1  ;;  %v4848_v6 = vrot.slane %v4847_v52, 1  ;;  %v4790_v12 = vrot.slane %v4789_v40, 2 }
 0x292   : > { %v9292_v48 = vrot.slane %v11299_v22, %v8660_v34  ;;  %v9296_v61 = vsel %vm5490_vm7, %v5565_v7, %v5564_v49  ;;  %v4937_v14 = vrot.slane %v4936_v11, 2  ;;  %v4879_v23 = vrot.slane %v4878_v15, 4 }
 0x293   : > { %v4681_v29 = vmax.f32 %v4679_v55, %v4680_v13  ;;  %v9300_v4 = vmax.f32 %v4847_v52, %v4848_v6  ;;  %v4791_v8 = vmax.f32 %v4789_v40, %v4790_v12  ;;  %v11300_v62 = vcombine.low %v8741_v18, %v8757_v41 }
 0x294   : > { %v5046_v21 = vsel %vm4205_vm5, %v9292_v48, -inf  ;;  %v4938_v5 = vmax.f32 %v4936_v11, %v4937_v14  ;;  %v4880_v43 = vmax.f32 %v4878_v15, %v4879_v23  ;;  %v11301_v49 = vcombine.high %v8754_v33, %v8754_v33  ;;  %v9325_v11 = vpop.permute.xlu1 %5122 }
 0x295   : > { %v5047_v32 = vrot.slane %v5046_v21, 4  ;;  %v9306_v59 = vrot.slane %v11300_v62, %v8660_v34  ;;  %v5623_v58 = vrot.slane %v9232_v17, 5  ;;  %v5676_v1 = vsel %vm5487_vm6, %v5675_v26, %v4681_v29  ;;  %5278 = vrot.lane.b32.xlu0 %v4681_v29, %s8112_s25  ;;  %5284 = vrot.lane.b32.xlu1 %v9300_v4, %s8112_s25 }
 0x296   : > { %v9312_v42 = vrot.slane %v11301_v49, %v8660_v34  ;;  %v4792_v18 = vrot.slane %v4791_v8, 1  ;;  %v4939_v55 = vrot.slane %v4938_v5, 1  ;;  %v4881_v52 = vrot.slane %v4880_v43, 2 }
 0x297   : > { %v5048_v51 = vmax.f32 %v5046_v21, %v5047_v32  ;;  %v4990_v40 = vsel %vm4205_vm5, %v9306_v59, -inf  ;;  %v11302_v12 = vcombine.low %v8754_v33, %v8754_v33  ;;  %v9335_v23 = vsel %vm5493_vm8, %v5623_v58, %v9254_v60  ;;  %v9347_v60 = vpop.permute.xlu0 %5120 }
 0x298   : > { %v4948_v7 = vsel %vm4205_vm5, %v9312_v42, -inf  ;;  %v4793_v17 = vmax.f32 %v4791_v8, %v4792_v18  ;;  %v4991_v22 = vrot.slane %v4990_v40, 4  ;;  %v4940_v13 = vmax.f32 %v4938_v5, %v4939_v55 }
 0x299   : > { %v5049_v15 = vrot.slane %v5048_v51, 2  ;;  %v4949_v26 = vrot.slane %v4948_v7, 4  ;;  %v4882_v6 = vmax.f32 %v4880_v43, %v4881_v52  ;;  %v9331_v14 = vrot.slane %v11302_v12, %v8660_v34 }
 0x29a   : > { %v5677_v21 = vrot.slane %v4793_v17, 6  ;;  %5282 = vrot.lane.b32.xlu0 %v4793_v17, %s8112_s25  ;;  %v4992_v8 = vmax.f32 %v4990_v40, %v4991_v22  ;;  %v5515_v62 = vrot.slane %v4940_v13, 3  ;;  %5144 = vrot.lane.b32.xlu1 %v4940_v13, %s8112_s25  ;;  %v9345_v33 = vrot.slane %v7891_v53, %v8660_v34  ;;  %v9360_v53 = vpop.permute.xlu1 %5124 }
 0x29b   : > { %v5050_v29 = vmax.f32 %v5048_v51, %v5049_v15  ;;  %v4950_v32 = vmax.f32 %v4948_v7, %v4949_v26  ;;  %v4883_v5 = vrot.slane %v4882_v6, 1  ;;  %v4892_v43 = vsel %vm4205_vm5, %v9331_v14, -inf }
 0x29c   : > { %v9350_v49 = vsel %vm5490_vm7, %v5677_v21, %v5676_v1  ;;  %v4993_v18 = vrot.slane %v4992_v8, 2  ;;  %v4893_v52 = vrot.slane %v4892_v43, 4  ;;  %v5060_v40 = vsel %vm4205_vm5, %v9345_v33, -inf }
 0x29d   : > { %v5051_v58 = vrot.slane %v5050_v29, 1  ;;  %v4951_v51 = vrot.slane %v4950_v32, 2  ;;  %v4884_v55 = vmax.f32 %v4882_v6, %v4883_v5  ;;  %v9358_v7 = vrot.slane %v7889_v0, %v8660_v34 }
 0x29e   : > { %v4994_v15 = vmax.f32 %v4992_v8, %v4993_v18  ;;  %v5061_v22 = vrot.slane %v5060_v40, 4  ;;  %v4894_v13 = vmax.f32 %v4892_v43, %v4893_v52  ;;  %v3990_v12 = vcombine.high %v9265_v63, %v9265_v63 }
 0x29f   : > { %v5052_v17 = vmax.f32 %v5050_v29, %v5051_v58  ;;  %v4952_v1 = vmax.f32 %v4950_v32, %v4951_v51  ;;  %v5513_v26 = vrot.slane %v4884_v55, 4  ;;  %5142 = vrot.lane.b32.xlu0 %v4884_v55, %s8112_s25  ;;  %v5004_v6 = vsel %vm4205_vm5, %v9358_v7, -inf  ;;  %v9372_v58 = vpop.permute.xlu0 %5214 }
 0x2a0   : > { %v5567_v41 = vrot.slane %v9257_v50, 5  ;;  %v4995_v0 = vrot.slane %v4994_v15, 1  ;;  %v5062_v29 = vmax.f32 %v5060_v40, %v5061_v22  ;;  %v4895_v32 = vrot.slane %v4894_v13, 2  ;;  %v9377_v22 = vpop.permute.xlu1 %5216 }
 0x2a1   : > { %5148 = vrot.lane.b32.xlu1 %v5052_v17, %s8112_s25  ;;  %v4953_v21 = vrot.slane %v4952_v1, 1  ;;  %v5514_v8 = vsel %vm5496_vm9, %v5513_v26, %v9283_v45  ;;  %v5005_v5 = vrot.slane %v5004_v6, 4  ;;  %v4941_v43 = vsel %vm4205_vm5, %v3990_v12, -inf }
 0x2a2   : > { %v4996_v18 = vmax.f32 %v4994_v15, %v4995_v0  ;;  %v5516_v51 = vsel %vm5499_vm10, %v5515_v62, %v5514_v8  ;;  %v5063_v55 = vrot.slane %v5062_v29, 2  ;;  %v4896_v50 = vmax.f32 %v4894_v13, %v4895_v32 }
 0x2a3   : > { %v4954_v63 = vmax.f32 %v4952_v1, %v4953_v21  ;;  %v5006_v52 = vmax.f32 %v5004_v6, %v5005_v5  ;;  %v4942_v57 = vrot.slane %v4941_v43, 4  ;;  %v3956_v40 = vcombine.high %v9279_v35, %v9279_v35 }
 0x2a4   : > { %v5519_v45 = vrot.slane %v5052_v17, 1  ;;  %v5517_v26 = vrot.slane %v4996_v18, 2  ;;  %5146 = vrot.lane.b32.xlu0 %v4996_v18, %s8112_s25  ;;  %v5064_v12 = vmax.f32 %v5062_v29, %v5063_v55  ;;  %v9383_v62 = vsel %vm5493_vm8, %v5567_v41, %v9296_v61 }
 0x2a5   : > { %5240 = vrot.lane.b32.xlu1 %v4954_v63, %s8112_s25  ;;  %v4897_v15 = vrot.slane %v4896_v50, 1  ;;  %v5007_v1 = vrot.slane %v5006_v52, 2  ;;  %v4943_v13 = vmax.f32 %v4941_v43, %v4942_v57  ;;  %v4885_v6 = vsel %vm4205_vm5, %v3956_v40, -inf  ;;  %v9390_v18 = vpop.permute.xlu0 %5218  ;;  %v9397_v40 = vpop.permute.xlu1 %5220 }
 0x2a6   : > { %v5518_v35 = vsel %vm5502_vm11, %v5517_v26, %v5516_v51  ;;  %v5627_v0 = vrot.slane %v4954_v63, 3  ;;  %v5065_v21 = vrot.slane %v5064_v12, 1  ;;  %v4886_v17 = vrot.slane %v4885_v6, 4 }
 0x2a7   : > { %v9388_v8 = vsel %vm5505_vm12, %v5519_v45, %v5518_v35  ;;  %v4898_v32 = vmax.f32 %v4896_v50, %v4897_v15  ;;  %v5008_v5 = vmax.f32 %v5006_v52, %v5007_v1  ;;  %v4944_v29 = vrot.slane %v4943_v13, 2 }
 0x2a8   : > { %11303 = vst [vmem:[#allocation21_spill] sm:$0xff] %v9388_v8  ;;  %v5066_v61 = vmax.f32 %v5064_v12, %v5065_v21  ;;  %v4887_v41 = vmax.f32 %v4885_v6, %v4886_v17  ;;  %v4058_v57 = vcombine.high %v9292_v48, %v9292_v48  ;;  %v4024_v43 = vcombine.high %v9306_v59, %v9306_v59 }
 0x2a9   : > { %v5625_v51 = vrot.slane %v4898_v32, 4  ;;  %5238 = vrot.lane.b32.xlu0 %v4898_v32, %s8112_s25  ;;  %v5009_v63 = vrot.slane %v5008_v5, 1  ;;  %v4945_v55 = vmax.f32 %v4943_v13, %v4944_v29  ;;  %v3991_v17 = vcombine.high %v9312_v42, %v9312_v42 }
 0x2aa   : > { %5244 = vrot.lane.b32.xlu1 %v5066_v61, %s8112_s25  ;;  %v4888_v50 = vrot.slane %v4887_v41, 2  ;;  %v5053_v52 = vsel %vm4205_vm5, %v4058_v57, -inf  ;;  %v4997_v45 = vsel %vm4205_vm5, %v4024_v43, -inf  ;;  %v9408_v32 = vpop.permute.xlu0 %5166  ;;  %v5631_v29 = vrot.slane %v5066_v61, 1 }
 0x2ab   : > { %v5626_v48 = vsel %vm5496_vm9, %v5625_v51, %v9335_v23  ;;  %v5010_v26 = vmax.f32 %v5008_v5, %v5009_v63  ;;  %v4946_v12 = vrot.slane %v4945_v55, 1  ;;  %v5054_v59 = vrot.slane %v5053_v52, 4  ;;  %v9415_v63 = vpop.permute.xlu1 %5168 }
 0x2ac   : > { %v5628_v15 = vsel %vm5499_vm10, %v5627_v0, %v5626_v48  ;;  %v4889_v1 = vmax.f32 %v4887_v41, %v4888_v50  ;;  %v4998_v6 = vrot.slane %v4997_v45, 4  ;;  %v3957_v5 = vcombine.high %v9331_v14, %v9331_v14 }
 0x2ad   : > { %v5629_v13 = vrot.slane %v5010_v26, 2  ;;  %5242 = vrot.lane.b32.xlu0 %v5010_v26, %s8112_s25  ;;  %v4947_v35 = vmax.f32 %v4945_v55, %v4946_v12  ;;  %v5055_v21 = vmax.f32 %v5053_v52, %v5054_v59  ;;  %v5679_v0 = vrot.slane %v9300_v4, 5 }
 0x2ae   : > { %v4890_v57 = vrot.slane %v4889_v1, 1  ;;  %v4999_v23 = vmax.f32 %v4997_v45, %v4998_v6  ;;  %v4955_v50 = vsel %vm4205_vm5, %v3991_v17, -inf  ;;  %v4899_v14 = vsel %vm4205_vm5, %v3957_v5, -inf }
 0x2af   : > { %v5630_v41 = vsel %vm5502_vm11, %v5629_v13, %v5628_v15  ;;  %v5571_v43 = vrot.slane %v4947_v35, 3  ;;  %5192 = vrot.lane.b32.xlu1 %v4947_v35, %s8112_s25  ;;  %v5056_v51 = vrot.slane %v5055_v21, 2  ;;  %v4956_v45 = vrot.slane %v4955_v50, 4 }
 0x2b0   : > { %v9418_v42 = vsel %vm5505_vm12, %v5631_v29, %v5630_v41  ;;  %v4891_v55 = vmax.f32 %v4889_v1, %v4890_v57  ;;  %v5000_v61 = vrot.slane %v4999_v23, 2  ;;  %v9424_v4 = vsel %vm5493_vm8, %v5679_v0, %v9350_v49  ;;  %v9431_v13 = vpop.permute.xlu0 %5170 }
 0x2b1   : > { %11304 = vst [vmem:[#allocation22_spill] sm:$0xff] %v9418_v42  ;;  %v5057_v52 = vmax.f32 %v5055_v21, %v5056_v51  ;;  %v4900_v12 = vrot.slane %v4899_v14, 4  ;;  %v4957_v15 = vmax.f32 %v4955_v50, %v4956_v45  ;;  %v4059_v1 = vcombine.high %v9345_v33, %v9345_v33  ;;  %v9437_v5 = vpop.permute.xlu1 %5172 }
 0x2b2   : > { %v5569_v48 = vrot.slane %v4891_v55, 4  ;;  %5190 = vrot.lane.b32.xlu0 %v4891_v55, %s8112_s25  ;;  %v5001_v26 = vmax.f32 %v4999_v23, %v5000_v61  ;;  %v4025_v6 = vcombine.high %v9358_v7, %v9358_v7 }
 0x2b3   : > { %v5058_v59 = vrot.slane %v5057_v52, 1  ;;  %v4901_v21 = vmax.f32 %v4899_v14, %v4900_v12  ;;  %v4958_v57 = vrot.slane %v4957_v15, 2  ;;  %v5067_v23 = vsel %vm4205_vm5, %v4059_v1, -inf }
 0x2b4   : > { %v5570_v35 = vsel %vm5496_vm9, %v5569_v48, %v9383_v62  ;;  %v5002_v49 = vrot.slane %v5001_v26, 1  ;;  %v5068_v41 = vrot.slane %v5067_v23, 4  ;;  %v5011_v7 = vsel %vm4205_vm5, %v4025_v6, -inf }
 0x2b5   : > { %v5059_v17 = vmax.f32 %v5057_v52, %v5058_v59  ;;  %v5572_v29 = vsel %vm5499_vm10, %v5571_v43, %v5570_v35  ;;  %v4902_v33 = vrot.slane %v4901_v21, 2  ;;  %v4959_v51 = vmax.f32 %v4957_v15, %v4958_v57  ;;  %v9442_v52 = vpop.permute.xlu0 %5262  ;;  %v9456_v15 = vpop.permute.xlu1 %5264 }
 0x2b6   : > { %v5003_v0 = vmax.f32 %v5001_v26, %v5002_v49  ;;  %v5012_v55 = vrot.slane %v5011_v7, 4  ;;  %v5069_v43 = vmax.f32 %v5067_v23, %v5068_v41  ;;  %v11305_v48 = vcombine.high %v8791_v47, %v8797_v10 }
 0x2b7   : > { %5196 = vrot.lane.b32.xlu1 %v5059_v17, %s8112_s25  ;;  %v5575_v62 = vrot.slane %v5059_v17, 1  ;;  %v4903_v50 = vmax.f32 %v4901_v21, %v4902_v33  ;;  %v4960_v45 = vrot.slane %v4959_v51, 1  ;;  %v11306_v12 = vcombine.low %v8791_v47, %v8797_v10 }
 0x2b8   : > { %v5573_v61 = vrot.slane %v5003_v0, 2  ;;  %5194 = vrot.lane.b32.xlu0 %v5003_v0, %s8112_s25  ;;  %v5013_v14 = vmax.f32 %v5011_v7, %v5012_v55  ;;  %v9448_v26 = vrot.slane %v11305_v48, %v8660_v34  ;;  %v5070_v35 = vrot.slane %v5069_v43, 2 }
 0x2b9   : > { %v9454_v59 = vrot.slane %v11306_v12, %v8660_v34  ;;  %v4904_v6 = vrot.slane %v4903_v50, 1  ;;  %v4961_v21 = vmax.f32 %v4959_v51, %v4960_v45  ;;  %v9471_v55 = vpop.permute.xlu1 %5268 }
 0x2ba   : > { %v5574_v1 = vsel %vm5502_vm11, %v5573_v61, %v5572_v29  ;;  %v5014_v17 = vrot.slane %v5013_v14, 2  ;;  %v4290_v57 = vsel %vm4205_vm5, %v9448_v26, -inf  ;;  %v5071_v33 = vmax.f32 %v5069_v43, %v5070_v35 }
 0x2bb   : > { %v9460_v49 = vsel %vm5505_vm12, %v5575_v62, %v5574_v1  ;;  %v4905_v0 = vmax.f32 %v4903_v50, %v4904_v6  ;;  %v5683_v41 = vrot.slane %v4961_v21, 3  ;;  %5288 = vrot.lane.b32.xlu1 %v4961_v21, %s8112_s25  ;;  %v4291_v7 = vrot.slane %v4290_v57, 4  ;;  %v9473_v62 = vpop.permute.xlu0 %5266 }
 0x2bc   : > { %11307 = vst [vmem:[#allocation23_spill] sm:$0xff] %v9460_v49  ;;  %v5015_v29 = vmax.f32 %v5013_v14, %v5014_v17  ;;  %v4234_v51 = vsel %vm4205_vm5, %v9454_v59, -inf  ;;  %v7864_v61 = vcombine.high %v8797_v10, %v8797_v10  ;;  %v5072_v50 = vrot.slane %v5071_v33, 1 }
 0x2bd   : > { %v5681_v45 = vrot.slane %v4905_v0, 4  ;;  %5286 = vrot.lane.b32.xlu0 %v4905_v0, %s8112_s25  ;;  %v4235_v43 = vrot.slane %v4234_v51, 4  ;;  %v4292_v12 = vmax.f32 %v4290_v57, %v4291_v7  ;;  %v11308_v14 = vcombine.high %v8794_v9, %v8800_v56  ;;  %v9497_v16 = vpop.permute.xlu1 %5128 }
 0x2be   : > { %v5016_v48 = vrot.slane %v5015_v29, 1  ;;  %v11309_v6 = vcombine.low %v8794_v9, %v8800_v56  ;;  %v7868_v21 = vcombine.high %v8800_v56, %v8800_v56  ;;  %v5073_v0 = vmax.f32 %v5071_v33, %v5072_v50 }
 0x2bf   : > { %v9482_v1 = vrot.slane %v11308_v14, %v8660_v34  ;;  %v5682_v17 = vsel %vm5496_vm9, %v5681_v45, %v9424_v4  ;;  %v4236_v57 = vmax.f32 %v4234_v51, %v4235_v43  ;;  %v4293_v23 = vrot.slane %v4292_v12, 2 }
 0x2c0   : > { %v9488_v35 = vrot.slane %v11309_v6, %v8660_v34  ;;  %v5017_v7 = vmax.f32 %v5015_v29, %v5016_v48  ;;  %v5684_v47 = vsel %vm5499_vm10, %v5683_v41, %v5682_v17  ;;  %5292 = vrot.lane.b32.xlu1 %v5073_v0, %s8112_s25  ;;  %v9505_v51 = vpop.permute.xlu0 %5126  ;;  %v5687_v45 = vrot.slane %v5073_v0, 1 }
 0x2c1   : > { %v4402_v14 = vsel %vm4205_vm5, %v9482_v1, -inf  ;;  %v4237_v9 = vrot.slane %v4236_v57, 2  ;;  %v4294_v41 = vmax.f32 %v4292_v12, %v4293_v23  ;;  %v9508_v48 = vrot.slane %v7864_v61, %v8660_v34 }
 0x2c2   : > { %v4403_v6 = vrot.slane %v4402_v14, 4  ;;  %v4346_v37 = vsel %vm4205_vm5, %v9488_v35, -inf  ;;  %v5685_v33 = vrot.slane %v5017_v7, 2  ;;  %5290 = vrot.lane.b32.xlu0 %v5017_v7, %s8112_s25  ;;  %v9512_v8 = vrot.slane %v7868_v21, %v8660_v34 }
 0x2c3   : > { %v4347_v29 = vrot.slane %v4346_v37, 4  ;;  %v4238_v50 = vmax.f32 %v4236_v57, %v4237_v9  ;;  %v4295_v19 = vrot.slane %v4294_v41, 1  ;;  %v7866_v7 = vcombine.low %v8800_v56, %v8800_v56  ;;  %v9519_v57 = vpop.permute.xlu1 %5132 }
 0x2c4   : > { %v4404_v43 = vmax.f32 %v4402_v14, %v4403_v6  ;;  %v5686_v17 = vsel %vm5502_vm11, %v5685_v33, %v5684_v47  ;;  %v9525_v21 = vpop.permute.xlu0 %5130  ;;  %v4304_v56 = vsel %vm4205_vm5, %v9508_v48, -inf  ;;  %v4416_v33 = vsel %vm4205_vm5, %v9512_v8, -inf }
 0x2c5   : > { %v4348_v49 = vmax.f32 %v4346_v37, %v4347_v29  ;;  %v9517_v23 = vsel %vm5505_vm12, %v5687_v45, %v5686_v17  ;;  %v4239_v12 = vrot.slane %v4238_v50, 1  ;;  %v4296_v37 = vmax.f32 %v4294_v41, %v4295_v19 }
 0x2c6   : > { %11310 = vst [vmem:[#allocation24_spill] sm:$0xff] %v9517_v23  ;;  %v4405_v0 = vrot.slane %v4404_v43, 2  ;;  %v4305_v17 = vrot.slane %v4304_v56, 4  ;;  %v4417_v61 = vrot.slane %v4416_v33, 4 }
 0x2c7   : > { %v4349_v14 = vrot.slane %v4348_v49, 2  ;;  %v4240_v9 = vmax.f32 %v4238_v50, %v4239_v12  ;;  %v5717_v29 = vrot.slane %v4296_v37, 7  ;;  %5312 = vrot.lane.b32.xlu1 %v4296_v37, %s8112_s25  ;;  %v9536_v50 = vrot.slane %v7866_v7, %v8660_v34  ;;  %v9540_v12 = vpop.permute.xlu1 %5224 }
 0x2c8   : > { %v4406_v6 = vmax.f32 %v4404_v43, %v4405_v0  ;;  %v3667_v43 = vcombine.high %v9482_v1, %v9482_v1  ;;  %v9543_v47 = vpop.permute.xlu0 %5222 }
 0x2c9   : > { %v4350_v45 = vmax.f32 %v4348_v49, %v4349_v14  ;;  %5310 = vrot.lane.b32.xlu0 %v4240_v9, %s8112_s25  ;;  %v5718_v0 = vsel %vm5487_vm6, %v5717_v29, %v4240_v9  ;;  %v4306_v49 = vmax.f32 %v4304_v56, %v4305_v17  ;;  %v4418_v14 = vmax.f32 %v4416_v33, %v4417_v61 }
 0x2ca   : > { %v4407_v41 = vrot.slane %v4406_v6, 1  ;;  %v4360_v7 = vsel %vm4205_vm5, %v9536_v50, -inf  ;;  %v4409_v23 = vsel %vm4205_vm5, %v3667_v43, -inf  ;;  %v11311_v9 = vcombine.low %v8797_v10, %v8797_v10 }
 0x2cb   : > { %v4351_v37 = vrot.slane %v4350_v45, 1  ;;  %v4307_v1 = vrot.slane %v4306_v49, 2  ;;  %v4419_v46 = vrot.slane %v4418_v14, 2  ;;  %v4361_v2 = vrot.slane %v4360_v7, 4  ;;  %v9557_v33 = vpop.permute.xlu1 %5228 }
 0x2cc   : > { %v4408_v4 = vmax.f32 %v4406_v6, %v4407_v41  ;;  %v4410_v6 = vrot.slane %v4409_v23, 4  ;;  %v9566_v56 = vrot.slane %v11311_v9, %v8660_v34  ;;  %v3668_v61 = vcombine.high %v9512_v8, %v9512_v8 }
 0x2cd   : > { %v4352_v42 = vmax.f32 %v4350_v45, %v4351_v37  ;;  %v4308_v45 = vmax.f32 %v4306_v49, %v4307_v1  ;;  %v4420_v17 = vmax.f32 %v4418_v14, %v4419_v46  ;;  %v4362_v41 = vmax.f32 %v4360_v7, %v4361_v2  ;;  %v9571_v46 = vpop.permute.xlu0 %5226 }
 0x2ce   : > { %5316 = vrot.lane.b32.xlu1 %v4408_v4, %s8112_s25  ;;  %v4411_v37 = vmax.f32 %v4409_v23, %v4410_v6  ;;  %v4248_v14 = vsel %vm4205_vm5, %v9566_v56, -inf  ;;  %v4423_v10 = vsel %vm4205_vm5, %v3668_v61, -inf  ;;  %v5721_v61 = vrot.slane %v4408_v4, 5 }
 0x2cf   : > { %v5719_v29 = vrot.slane %v4352_v42, 6  ;;  %5314 = vrot.lane.b32.xlu0 %v4352_v42, %s8112_s25  ;;  %v4309_v36 = vrot.slane %v4308_v45, 1  ;;  %v4421_v42 = vrot.slane %v4420_v17, 1  ;;  %v4363_v49 = vrot.slane %v4362_v41, 2  ;;  %v9588_v44 = vpop.permute.xlu1 %5176 }
 0x2d0   : > { %v4412_v23 = vrot.slane %v4411_v37, 2  ;;  %v4249_v9 = vrot.slane %v4248_v14, 4  ;;  %v4424_v43 = vrot.slane %v4423_v10, 4  ;;  %v11314_v4 = vcombine.low %v8824_v31, %v8834_v27 }
 0x2d1   : > { %v5720_v19 = vsel %vm5490_vm7, %v5719_v29, %v5718_v0  ;;  %v4310_v7 = vmax.f32 %v4308_v45, %v4309_v36  ;;  %v9578_v1 = vmax.f32 %v4420_v17, %v4421_v42  ;;  %v4364_v8 = vmax.f32 %v4362_v41, %v4363_v49 }
 0x2d2   : > { %v11312_v0 = vcombine.high %v8866_v28, %v8872_v54  ;;  %v4413_v2 = vmax.f32 %v4411_v37, %v4412_v23  ;;  %v4250_v17 = vmax.f32 %v4248_v14, %v4249_v9  ;;  %v4425_v49 = vmax.f32 %v4423_v10, %v4424_v43 }
 0x2d3   : > { %5408 = vrot.lane.b32.xlu1 %v4310_v7, %s8112_s25  ;;  %5412 = vrot.lane.b32.xlu0 %v9578_v1, %s8112_s25  ;;  %v4365_v45 = vrot.slane %v4364_v8, 1  ;;  %v3599_v37 = vcombine.high %v9448_v26, %v9448_v26  ;;  %v9603_v36 = vrot.slane %v11314_v4, %v8660_v34  ;;  %v9606_v29 = vsel %vm5493_vm8, %v5721_v61, %v5720_v19 }
 0x2d4   : > { %v9584_v6 = vrot.slane %v11312_v0, %v8660_v34  ;;  %v4414_v42 = vrot.slane %v4413_v2, 1  ;;  %v4251_v0 = vrot.slane %v4250_v17, 2  ;;  %v4426_v10 = vrot.slane %v4425_v49, 2 }
 0x2d5   : > { %v4366_v23 = vmax.f32 %v4364_v8, %v4365_v45  ;;  %11315 = vst [vmem:[#allocation26_spill] sm:$0xff] %v9603_v36  ;;  %v9608_v14 = vpop.permute.xlu0 %5174  ;;  %v4297_v26 = vsel %vm4205_vm5, %v3599_v37, -inf  ;;  %v4458_v19 = vsel %vm4205_vm5, %v9603_v36, -inf  ;;  %v5523_v61 = vrot.slane %v9325_v11, 6 }
 0x2d6   : > { %11313 = vst [vmem:[#allocation25_spill] sm:$0xff] %v9584_v6  ;;  %v9612_v43 = vmax.f32 %v4413_v2, %v4414_v42  ;;  %v4252_v45 = vmax.f32 %v4250_v17, %v4251_v0  ;;  %v4298_v4 = vrot.slane %v4297_v26, 4  ;;  %v5521_v41 = vrot.slane %v9347_v60, 7 }
 0x2d7   : > { %5410 = vrot.lane.b32.xlu1 %v4366_v23, %s8112_s25  ;;  %v4427_v2 = vmax.f32 %v4425_v49, %v4426_v10  ;;  %v4459_v42 = vrot.slane %v4458_v19, 4  ;;  %v9624_v37 = vpop.permute.xlu1 %5180  ;;  %v5829_v9 = vrot.slane %v4310_v7, 7  ;;  %v3600_v17 = vcombine.high %v9508_v48, %v9508_v48 }
 0x2d8   : > { %5364 = vrot.lane.b32.xlu0 %v9612_v43, %s8112_s25  ;;  %v4253_v8 = vrot.slane %v4252_v45, 1  ;;  %v4299_v20 = vmax.f32 %v4297_v26, %v4298_v4  ;;  %v5831_v30 = vrot.slane %v4366_v23, 6  ;;  %v11316_v60 = vcombine.low %v8827_v24, %v8837_v25 }
 0x2d9   : > { %v9628_v0 = vpop.permute.xlu0 %5178  ;;  %v4428_v6 = vrot.slane %v4427_v2, 1  ;;  %v4460_v11 = vmax.f32 %v4458_v19, %v4459_v42  ;;  %v5633_v49 = vrot.slane %v9377_v22, 7  ;;  %v4311_v26 = vsel %vm4205_vm5, %v3600_v17, -inf }
 0x2da   : > { %v9634_v36 = vrot.slane %v11316_v60, %v8660_v34  ;;  %v4254_v10 = vmax.f32 %v4252_v45, %v4253_v8  ;;  %v4300_v7 = vrot.slane %v4299_v20, 2  ;;  %v5522_v48 = vsel %vm5487_vm6, %v5521_v41, %v9314_v38 }
 0x2db   : > { %v9640_v4 = vmax.f32 %v4427_v2, %v4428_v6  ;;  %v4461_v23 = vrot.slane %v4460_v11, 2  ;;  %v4312_v3 = vrot.slane %v4311_v26, 4  ;;  %v9642_v19 = vpop.permute.xlu1 %5272  ;;  %v5635_v42 = vrot.slane %v9390_v18, 6 }
 0x2dc   : > { %v5830_v60 = vsel %vm5487_vm6, %v5829_v9, %v4254_v10  ;;  %5406 = vrot.lane.b32.xlu1 %v4254_v10, %s8112_s25  ;;  %v4301_v22 = vmax.f32 %v4299_v20, %v4300_v7  ;;  %v4570_v8 = vsel %vm4205_vm5, %v9634_v36, -inf  ;;  %v9658_v18 = vsel %vm5490_vm7, %v5523_v61, %v5522_v48 }
 0x2dd   : > { %v9651_v38 = vsel %vm5490_vm7, %v5831_v30, %v5830_v60  ;;  %5460 = vrot.lane.b32.xlu0 %v9640_v4, %s8112_s25  ;;  %v4462_v6 = vmax.f32 %v4460_v11, %v4461_v23  ;;  %v4313_v41 = vmax.f32 %v4311_v26, %v4312_v3  ;;  %v9655_v2 = vpop.permute.xlu0 %5270  ;;  %v5634_v20 = vsel %vm5487_vm6, %v5633_v49, %v9372_v58 }
 0x2de   : > { %11317 = vst [vmem:[#allocation27_spill] sm:$0xff] %v9655_v2  ;;  %v4302_v9 = vrot.slane %v4301_v22, 1  ;;  %v4571_v17 = vrot.slane %v4570_v8, 4  ;;  %v3633_v30 = vcombine.high %v9488_v35, %v9488_v35  ;;  %v11318_v11 = vcombine.high %v8834_v27, %v8834_v27 }
 0x2df   : > { %v4463_v10 = vrot.slane %v4462_v6, 1  ;;  %v4314_v7 = vrot.slane %v4313_v41, 2  ;;  %v9674_v48 = vsel %vm5490_vm7, %v5635_v42, %v5634_v20  ;;  %v5579_v42 = vrot.slane %v9431_v13, 6 }
 0x2e0   : > { %v9668_v3 = vrot.slane %v11318_v11, %v8660_v34  ;;  %v9670_v26 = vpop.permute.xlu1 %5276  ;;  %v9676_v58 = vmax.f32 %v4301_v22, %v4302_v9  ;;  %v4572_v49 = vmax.f32 %v4570_v8, %v4571_v17  ;;  %v4353_v35 = vsel %vm4205_vm5, %v3633_v30, -inf }
 0x2e1   : > { %11319 = vst [vmem:[#allocation28_spill] sm:$0xff] %v9670_v26  ;;  %v4464_v23 = vmax.f32 %v4462_v6, %v4463_v10  ;;  %v4315_v60 = vmax.f32 %v4313_v41, %v4314_v7  ;;  %v5577_v11 = vrot.slane %v9415_v63, 7  ;;  %v4354_v61 = vrot.slane %v4353_v35, 4  ;;  %v9687_v41 = vpop.permute.xlu0 %5274 }
 0x2e2   : > { %v4528_v45 = vsel %vm4205_vm5, %v9668_v3, -inf  ;;  %5360 = vrot.lane.b32.xlu1 %v9676_v58, %s8112_s25  ;;  %v4573_v26 = vrot.slane %v4572_v49, 2  ;;  %v5689_v22 = vrot.slane %v9456_v15, 7  ;;  %v3634_v63 = vcombine.high %v9536_v50, %v9536_v50 }
 0x2e3   : > { %v4529_v2 = vrot.slane %v4528_v45, 4  ;;  %v5723_v8 = vrot.slane %v4464_v23, 4  ;;  %5318 = vrot.lane.b32.xlu0 %v4464_v23, %s8112_s25  ;;  %v4316_v6 = vrot.slane %v4315_v60, 1  ;;  %v4355_v9 = vmax.f32 %v4353_v35, %v4354_v61 }
 0x2e4   : > { %v4574_v20 = vmax.f32 %v4572_v49, %v4573_v26  ;;  %v5691_v10 = vrot.slane %v9473_v62, 6  ;;  %v11320_v15 = vcombine.high %v8837_v25, %v8837_v25  ;;  %v4367_v49 = vsel %vm4205_vm5, %v3634_v63, -inf }
 0x2e5   : > { %v4530_v17 = vmax.f32 %v4528_v45, %v4529_v2  ;;  %v9694_v7 = vsel %vm5496_vm9, %v5723_v8, %v9606_v29  ;;  %v9696_v13 = vmax.f32 %v4315_v60, %v4316_v6  ;;  %v5578_v45 = vsel %vm5487_vm6, %v5577_v11, %v9408_v32 }
 0x2e6   : > { %v9702_v30 = vrot.slane %v11320_v15, %v8660_v34  ;;  %v9704_v26 = vpop.permute.xlu1 %5136  ;;  %v4575_v50 = vrot.slane %v4574_v20, 1  ;;  %v4356_v2 = vrot.slane %v4355_v9, 2  ;;  %v5690_v29 = vsel %vm5487_vm6, %v5689_v22, %v9442_v52 }
 0x2e7   : > { %v4531_v62 = vrot.slane %v4530_v17, 2  ;;  %5456 = vrot.lane.b32.xlu1 %v9696_v13, %s8112_s25  ;;  %v4368_v11 = vrot.slane %v4367_v49, 4  ;;  %v9719_v8 = vsel %vm5490_vm7, %v5579_v42, %v5578_v45  ;;  %v9723_v52 = vsel %vm5490_vm7, %v5691_v10, %v5690_v29 }
 0x2e8   : > { %11321 = vst [vmem:[#allocation29_spill] sm:$0xff] %v9702_v30  ;;  %v4640_v23 = vsel %vm4205_vm5, %v9702_v30, -inf  ;;  %v9716_v60 = vmax.f32 %v4574_v20, %v4575_v50  ;;  %v4357_v35 = vmax.f32 %v4355_v9, %v4356_v2  ;;  %v5527_v63 = vrot.slane %v9505_v51, 4 }
 0x2e9   : > { %v4532_v32 = vmax.f32 %v4530_v17, %v4531_v62  ;;  %v4641_v22 = vrot.slane %v4640_v23, 4  ;;  %v4369_v17 = vmax.f32 %v4367_v49, %v4368_v11  ;;  %v5529_v42 = vrot.slane %v9497_v16, 3 }
 0x2ea   : > { %5322 = vrot.lane.b32.xlu0 %v9716_v60, %s8112_s25  ;;  %v4358_v20 = vrot.slane %v4357_v35, 1  ;;  %v3565_v10 = vcombine.high %v9454_v59, %v9454_v59  ;;  %v11323_v2 = vcombine.high %v8824_v31, %v8834_v27  ;;  %v11324_v51 = vrot.slane %v9360_v53, 5 }
 0x2eb   : > { %v9725_v15 = vpop.permute.xlu0 %5134  ;;  %v4533_v9 = vrot.slane %v4532_v32, 1  ;;  %v9730_v50 = vpop.permute.xlu1 %5140  ;;  %v4642_v45 = vmax.f32 %v4640_v23, %v4641_v22  ;;  %v4370_v11 = vrot.slane %v4369_v17, 2 }
 0x2ec   : > { %11322 = vst [vmem:[#allocation30_spill] sm:$0xff] %v9730_v50  ;;  %v3727_v62 = vrot.slane %v11323_v2, %v8660_v34  ;;  %v5526_v29 = vsel %vm5493_vm8, %v11324_v51, %v9658_v18  ;;  %v9743_v61 = vmax.f32 %v4357_v35, %v4358_v20  ;;  %v4241_v59 = vsel %vm4205_vm5, %v3565_v10, -inf }
 0x2ed   : > { %v9745_v49 = vmax.f32 %v4532_v32, %v4533_v9  ;;  %v4643_v23 = vrot.slane %v4642_v45, 2  ;;  %v5528_v31 = vsel %vm5496_vm9, %v5527_v63, %v5526_v29  ;;  %v5531_v2 = vrot.slane %v9525_v21, 2 }
 0x2ee   : > { %v3735_v22 = vcombine.high %v3727_v62, %v3727_v62  ;;  %5362 = vrot.lane.b32.xlu1 %v9743_v61, %s8112_s25  ;;  %v4371_v53 = vmax.f32 %v4369_v17, %v4370_v11  ;;  %v4242_v18 = vrot.slane %v4241_v59, 4  ;;  %v5533_v32 = vrot.slane %v9519_v57, 1 }
 0x2ef   : > { %v9749_v6 = vpop.permute.xlu0 %5138  ;;  %5416 = vrot.lane.b32.xlu0 %v9745_v49, %s8112_s25  ;;  %v4644_v20 = vmax.f32 %v4642_v45, %v4643_v23  ;;  %v3566_v63 = vcombine.high %v9566_v56, %v9566_v56  ;;  %v3736_v29 = vcombine.high %v9668_v3, %v9668_v3  ;;  %v5530_v16 = vsel %vm5499_vm10, %v5529_v42, %v5528_v31 }
 0x2f0   : > { %v9757_v35 = vpop.permute.xlu1 %5232  ;;  %v4521_v9 = vsel %vm4205_vm5, %v3735_v22, -inf  ;;  %v4372_v10 = vrot.slane %v4371_v53, 1  ;;  %v4243_v21 = vmax.f32 %v4241_v59, %v4242_v18  ;;  %v5639_v17 = vrot.slane %v9543_v47, 4 }
 0x2f1   : > { %v4522_v51 = vrot.slane %v4521_v9, 4  ;;  %v4645_v11 = vrot.slane %v4644_v20, 1  ;;  %v4255_v50 = vsel %vm4205_vm5, %v3566_v63, -inf  ;;  %v5532_v57 = vsel %vm5502_vm11, %v5531_v2, %v5530_v16 }
 0x2f2   : > { %v9769_v45 = vmax.f32 %v4371_v53, %v4372_v10  ;;  %v4244_v23 = vrot.slane %v4243_v21, 2  ;;  %v5777_v59 = vrot.slane %v9612_v43, 5  ;;  %v5641_v18 = vrot.slane %v9540_v12, 3 }
 0x2f3   : > { %v4523_v22 = vmax.f32 %v4521_v9, %v4522_v51  ;;  %v9775_v3 = vmax.f32 %v4644_v20, %v4645_v11  ;;  %v4256_v42 = vrot.slane %v4255_v50, 4  ;;  %v11325_v47 = vrot.slane %v9397_v40, 5 }
 0x2f4   : > { %v9771_v56 = vpop.permute.xlu0 %5230  ;;  %5458 = vrot.lane.b32.xlu1 %v9769_v45, %s8112_s25  ;;  %v4245_v2 = vmax.f32 %v4243_v21, %v4244_v23  ;;  %v4535_v9 = vsel %vm4205_vm5, %v3736_v29, -inf  ;;  %v5773_v63 = vrot.slane %v9676_v58, 7  ;;  %v9788_v12 = vsel %vm5505_vm12, %v5533_v32, %v5532_v57 }
 0x2f5   : > { %v9777_v31 = vpop.permute.xlu1 %5236  ;;  %v5638_v16 = vsel %vm5493_vm8, %v11325_v47, %v9674_v48  ;;  %v4524_v53 = vrot.slane %v4523_v22, 2  ;;  %5420 = vrot.lane.b32.xlu0 %v9775_v3, %s8112_s25  ;;  %v4257_v40 = vmax.f32 %v4255_v50, %v4256_v42  ;;  %v4536_v51 = vrot.slane %v4535_v9, 4 }
 0x2f6   : > { %v5640_v20 = vsel %vm5496_vm9, %v5639_v17, %v5638_v16  ;;  %v4246_v10 = vrot.slane %v4245_v2, 1  ;;  %v11326_v21 = vrot.slane %v9471_v55, 5  ;;  %v5775_v58 = vrot.slane %v9743_v61, 6 }
 0x2f7   : > { %v4525_v48 = vmax.f32 %v4523_v22, %v4524_v53  ;;  %v4258_v32 = vrot.slane %v4257_v40, 2  ;;  %v4514_v17 = vsel %vm4205_vm5, %v3727_v62, -inf  ;;  %v11327_v50 = vcombine.high %v8827_v24, %v8837_v25 }
 0x2f8   : > { %v9797_v11 = vsel %vm5493_vm8, %v11326_v21, %v9723_v52  ;;  %v9799_v29 = vpop.permute.xlu0 %5234  ;;  %v4247_v23 = vmax.f32 %v4245_v2, %v4246_v10  ;;  %v4537_v42 = vmax.f32 %v4535_v9, %v4536_v51  ;;  %v4515_v47 = vrot.slane %v4514_v17, 4 }
 0x2f9   : > { %v3795_v57 = vrot.slane %v11327_v50, %v8660_v34  ;;  %v4526_v22 = vrot.slane %v4525_v48, 1  ;;  %v9807_v55 = vpop.permute.xlu1 %5184  ;;  %v5642_v52 = vsel %vm5499_vm10, %v5641_v18, %v5640_v20  ;;  %v5643_v16 = vrot.slane %v9571_v46, 2 }
 0x2fa   : > { %v4259_v53 = vmax.f32 %v4257_v40, %v4258_v32  ;;  %v5774_v21 = vsel %vm5487_vm6, %v5773_v63, %v4247_v23  ;;  %5358 = vrot.lane.b32.xlu1 %v4247_v23, %s8112_s25  ;;  %v4538_v24 = vrot.slane %v4537_v42, 2  ;;  %v4516_v50 = vmax.f32 %v4514_v17, %v4515_v47 }
 0x2fb   : > { %v3803_v61 = vcombine.high %v3795_v57, %v3795_v57  ;;  %v9813_v62 = vmax.f32 %v4525_v48, %v4526_v22  ;;  %v5885_v2 = vrot.slane %v9696_v13, 7  ;;  %v9817_v9 = vsel %vm5490_vm7, %v5775_v58, %v5774_v21 }
 0x2fc   : > { %v4260_v10 = vrot.slane %v4259_v53, 1  ;;  %v9820_v20 = vpop.permute.xlu0 %5182  ;;  %v5887_v46 = vrot.slane %v9769_v45, 6  ;;  %v4539_v63 = vmax.f32 %v4537_v42, %v4538_v24  ;;  %v4517_v40 = vrot.slane %v4516_v50, 2 }
 0x2fd   : > { %v4633_v18 = vsel %vm4205_vm5, %v3803_v61, -inf  ;;  %5368 = vrot.lane.b32.xlu0 %v9813_v62, %s8112_s25  ;;  %v5583_v13 = vrot.slane %v9608_v14, 4  ;;  %v4626_v58 = vsel %vm4205_vm5, %v3795_v57, -inf  ;;  %v11328_v17 = vcombine.low %v8866_v28, %v8872_v54 }
 0x2fe   : > { %v4634_v48 = vrot.slane %v4633_v18, 4  ;;  %v9825_v51 = vpop.permute.xlu1 %5188  ;;  %v4261_v32 = vmax.f32 %v4259_v53, %v4260_v10  ;;  %v4540_v45 = vrot.slane %v4539_v63, 1  ;;  %v4518_v22 = vmax.f32 %v4516_v50, %v4517_v40 }
 0x2ff   : > { %v9833_v23 = vrot.slane %v11328_v17, %v8660_v34  ;;  %v4627_v61 = vrot.slane %v4626_v58, 4  ;;  %v5585_v42 = vrot.slane %v9588_v44, 3  ;;  %v11329_v21 = vrot.slane %v9437_v5, 5 }
 0x300   : > { %v4635_v47 = vmax.f32 %v4633_v18, %v4634_v48  ;;  %v5886_v53 = vsel %vm5487_vm6, %v5885_v2, %v4261_v32  ;;  %5454 = vrot.lane.b32.xlu1 %v4261_v32, %s8112_s25  ;;  %v9847_v24 = vmax.f32 %v4539_v63, %v4540_v45  ;;  %v4519_v50 = vrot.slane %v4518_v22, 1 }
 0x301   : > { %v5582_v14 = vsel %vm5493_vm8, %v11329_v21, %v9719_v8  ;;  %v4682_v28 = vsel %vm4205_vm5, %v9833_v23, -inf  ;;  %v9845_v57 = vsel %vm5490_vm7, %v5887_v46, %v5886_v53  ;;  %v5587_v8 = vrot.slane %v9628_v0, 2 }
 0x302   : > { %v4636_v10 = vrot.slane %v4635_v47, 2  ;;  %v9849_v44 = vpop.permute.xlu0 %5186  ;;  %v5584_v5 = vsel %vm5496_vm9, %v5583_v13, %v5582_v14  ;;  %v4628_v18 = vmax.f32 %v4626_v58, %v4627_v61  ;;  %v4683_v2 = vrot.slane %v4682_v28, 4  ;;  %5464 = vrot.lane.b32.xlu0 %v9847_v24, %s8112_s25 }
 0x303   : > { %v9853_v40 = vpop.permute.xlu1 %5280  ;;  %v5645_v48 = vrot.slane %v9557_v33, 1  ;;  %v5644_v32 = vsel %vm5502_vm11, %v5643_v16, %v5642_v52  ;;  %v4520_v46 = vmax.f32 %v4518_v22, %v4519_v50  ;;  %v5727_v17 = vrot.slane %v9716_v60, 2  ;;  %v11332_v50 = vld [vmem:[#allocation12_spill] sm:$0xff] }
 0x304   : > { %v4637_v63 = vmax.f32 %v4635_v47, %v4636_v10  ;;  %v5589_v45 = vrot.slane %v9624_v37, 1  ;;  %v4629_v13 = vrot.slane %v4628_v18, 2  ;;  %v4684_v21 = vmax.f32 %v4682_v28, %v4683_v2 }
 0x305   : > { %v5586_v0 = vsel %vm5499_vm10, %v5585_v42, %v5584_v5  ;;  %v5725_v58 = vrot.slane %v4520_v46, 3  ;;  %5320 = vrot.lane.b32.xlu1 %v4520_v46, %s8112_s25  ;;  %v11330_v33 = vcombine.low %v8834_v27, %v8834_v27  ;;  %v11331_v37 = vrot.slane %v9578_v1, 5 }
 0x306   : > { %v4638_v61 = vrot.slane %v4637_v63, 1  ;;  %v5588_v16 = vsel %vm5502_vm11, %v5587_v8, %v5586_v0  ;;  %v4630_v22 = vmax.f32 %v4628_v18, %v4629_v13  ;;  %v4685_v60 = vrot.slane %v4684_v21, 2 }
 0x307   : > { %v9867_v52 = vrot.slane %v11330_v33, %v8660_v34  ;;  %v9874_v47 = vsel %vm5493_vm8, %v11331_v37, %v9651_v38  ;;  %v9876_v42 = vpop.permute.xlu0 %5278  ;;  %v9878_v14 = vpop.permute.xlu1 %5284  ;;  %v5726_v53 = vsel %vm5499_vm10, %v5725_v58, %v9694_v7  ;;  %v11333_v10 = vcombine.low %v8869_v39, %v11332_v50 }
 0x308   : > { %v9882_v27 = vmax.f32 %v4637_v63, %v4638_v61  ;;  %v4631_v38 = vrot.slane %v4630_v22, 1  ;;  %v5728_v5 = vsel %vm5502_vm11, %v5727_v17, %v5726_v53  ;;  %v4686_v8 = vmax.f32 %v4684_v21, %v4685_v60 }
 0x309   : > { %v4472_v28 = vsel %vm4205_vm5, %v9867_v52, -inf  ;;  %v9890_v1 = vrot.slane %v11333_v10, %v8660_v34  ;;  %v5889_v2 = vrot.slane %v9640_v4, 5  ;;  %v5590_v46 = vsel %vm5505_vm12, %v5589_v45, %v5588_v16 }
 0x30a   : > { %v4473_v18 = vrot.slane %v4472_v28, 4  ;;  %5372 = vrot.lane.b32.xlu0 %v9882_v27, %s8112_s25  ;;  %v4632_v13 = vmax.f32 %v4630_v22, %v4631_v38  ;;  %v4687_v0 = vrot.slane %v4686_v8, 1  ;;  %v9904_v21 = vsel %vm5505_vm12, %v5645_v48, %v5644_v32 }
 0x30b   : > { %v4794_v63 = vsel %vm4205_vm5, %v9890_v1, -inf  ;;  %v11334_v45 = vcombine.low %v8837_v25, %v8837_v25  ;;  %v11335_v16 = vcombine.high %v8872_v54, %v8872_v54  ;;  %v5989_v25 = vcombine.low %v9788_v12, %v5590_v46 }
 0x30c   : > { %v4474_v58 = vmax.f32 %v4472_v28, %v4473_v18  ;;  %v4795_v61 = vrot.slane %v4794_v63, 4  ;;  %v9901_v17 = vpop.permute.xlu0 %5282  ;;  %v9920_v60 = vpop.permute.xlu1 %5144  ;;  %v5729_v37 = vrot.slane %v4632_v13, 1  ;;  %5324 = vrot.lane.b32.xlu1 %v4632_v13, %s8112_s25  ;;  %v9923_v48 = vmax.f32 %v4686_v8, %v4687_v0 }
 0x30d   : > { %v9912_v33 = vrot.slane %v11334_v45, %v8660_v34  ;;  %v9918_v22 = vrot.slane %v11335_v16, %v8660_v34  ;;  %v5837_v28 = vrot.slane %v9745_v49, 3  ;;  %v5697_v10 = vrot.slane %v9642_v19, 3 }
 0x30e   : > { %v4475_v32 = vrot.slane %v4474_v58, 2  ;;  %v4796_v53 = vmax.f32 %v4794_v63, %v4795_v61  ;;  %v9931_v18 = vsel %vm5505_vm12, %v5729_v37, %v5728_v5  ;;  %5326 = vrot.lane.b32.xlu0 %v9923_v48, %s8112_s25  ;;  %v5990_v63 = vcombine.high %v9788_v12, %v5590_v46  ;;  %v11337_v61 = vld [vmem:[#allocation26_spill] sm:$0xff]  ;;  %v11338_v46 = vld [vmem:[#allocation27_spill] sm:$0xff] }
 0x30f   : > { %v4584_v38 = vsel %vm4205_vm5, %v9912_v33, -inf  ;;  %11336 = vst [vmem:[#allocation12_spill] sm:$0xff] %v9931_v18  ;;  %v4752_v49 = vsel %vm4205_vm5, %v9918_v22, -inf  ;;  %v3701_v19 = vcombine.high %v11337_v61, %v11337_v61  ;;  %v9944_v5 = vsel %vm5493_vm8, %v5777_v59, %v9817_v9 }
 0x310   : > { %v4476_v13 = vmax.f32 %v4474_v58, %v4475_v32  ;;  %v4797_v8 = vrot.slane %v4796_v53, 2  ;;  %v4585_v0 = vrot.slane %v4584_v38, 4  ;;  %v4753_v32 = vrot.slane %v4752_v49, 4 }
 0x311   : > { %v9946_v45 = vpop.permute.xlu0 %5142  ;;  %v5841_v12 = vrot.slane %v9775_v3, 1  ;;  %v5695_v7 = vrot.slane %v11338_v46, 4  ;;  %v4465_v61 = vsel %vm4205_vm5, %v3701_v19, -inf  ;;  %v11339_v43 = vcombine.low %v11332_v50, %v11332_v50 }
 0x312   : > { %v4477_v16 = vrot.slane %v4476_v13, 1  ;;  %v4798_v58 = vmax.f32 %v4796_v53, %v4797_v8  ;;  %v4586_v37 = vmax.f32 %v4584_v38, %v4585_v0  ;;  %v4754_v53 = vmax.f32 %v4752_v49, %v4753_v32 }
 0x313   : > { %v9948_v4 = vpop.permute.xlu1 %5148  ;;  %v9957_v59 = vrot.slane %v11339_v43, %v8660_v34  ;;  %v9960_v38 = vrot.slane %v5989_v25, %v8660_v34  ;;  %v9963_v8 = vrot.slane %v5990_v63, %v8660_v34  ;;  %v4466_v3 = vrot.slane %v4465_v61, 4 }
 0x314   : > { %v4478_v9 = vmax.f32 %v4476_v13, %v4477_v16  ;;  %v4799_v18 = vrot.slane %v4798_v58, 1  ;;  %v4587_v30 = vrot.slane %v4586_v37, 2  ;;  %v4755_v13 = vrot.slane %v4754_v53, 2 }
 0x315   : > { %11340 = vst [vmem:[#allocation26_spill] sm:$0xff] %v9960_v38  ;;  %11341 = vst [vmem:[#allocation27_spill] sm:$0xff] %v9963_v8  ;;  %v4808_v0 = vsel %vm4205_vm5, %v9957_v59, -inf  ;;  %v4467_v49 = vmax.f32 %v4465_v61, %v4466_v3  ;;  %v3702_v25 = vcombine.high %v9867_v52, %v9867_v52  ;;  %v9976_v63 = vsel %vm5493_vm8, %v5889_v2, %v9845_v57 }
 0x316   : > { %v5835_v19 = vrot.slane %v4478_v9, 4  ;;  %5414 = vrot.lane.b32.xlu1 %v4478_v9, %s8112_s25  ;;  %v9968_v46 = vmax.f32 %v4798_v58, %v4799_v18  ;;  %v4588_v43 = vmax.f32 %v4586_v37, %v4587_v30  ;;  %v9970_v16 = vpop.permute.xlu0 %5146  ;;  %v4809_v32 = vrot.slane %v4808_v0, 4 }
 0x317   : > { %v9978_v8 = vpop.permute.xlu1 %5240  ;;  %v5696_v9 = vsel %vm5496_vm9, %v5695_v7, %v9797_v11  ;;  %v4756_v58 = vmax.f32 %v4754_v53, %v4755_v13  ;;  %v4468_v52 = vrot.slane %v4467_v49, 2  ;;  %v4479_v57 = vsel %vm4205_vm5, %v3702_v25, -inf }
 0x318   : > { %11342 = vst [vmem:[#allocation31_spill] sm:$0xff] %v9978_v8  ;;  %v5836_v30 = vsel %vm5496_vm9, %v5835_v19, %v9874_v47  ;;  %5330 = vrot.lane.b32.xlu0 %v9968_v46, %s8112_s25  ;;  %v4589_v18 = vrot.slane %v4588_v43, 1  ;;  %v4810_v61 = vmax.f32 %v4808_v0, %v4809_v32  ;;  %v4480_v38 = vrot.slane %v4479_v57, 4  ;;  %v11344_v47 = vld [vmem:[#allocation28_spill] sm:$0xff] }
 0x319   : > { %v5838_v37 = vsel %vm5499_vm10, %v5837_v28, %v5836_v30  ;;  %v4757_v3 = vrot.slane %v4756_v58, 1  ;;  %v11343_v11 = vcombine.high %v11332_v50, %v11332_v50  ;;  %v5698_v8 = vsel %vm5499_vm10, %v5697_v10, %v5696_v9 }
 0x31a   : > { %v4590_v2 = vmax.f32 %v4588_v43, %v4589_v18  ;;  %v4469_v53 = vmax.f32 %v4467_v49, %v4468_v52  ;;  %v4811_v13 = vrot.slane %v4810_v61, 2  ;;  %v4481_v32 = vmax.f32 %v4479_v57, %v4480_v38 }
 0x31b   : > { %v9992_v7 = vrot.slane %v11343_v11, %v8660_v34  ;;  %v9996_v28 = vpop.permute.xlu0 %5238  ;;  %v9999_v43 = vmax.f32 %v4756_v58, %v4757_v3  ;;  %v11346_v25 = vcombine.high %v9634_v36, %v9634_v36  ;;  %v5699_v18 = vrot.slane %v9687_v41, 2 }
 0x31c   : > { %11345 = vst [vmem:[#allocation28_spill] sm:$0xff] %v9996_v28  ;;  %v5839_v0 = vrot.slane %v4590_v2, 2  ;;  %5418 = vrot.lane.b32.xlu1 %v4590_v2, %s8112_s25  ;;  %v4470_v11 = vrot.slane %v4469_v53, 1  ;;  %v4812_v19 = vmax.f32 %v4810_v61, %v4811_v13  ;;  %v10008_v49 = vpop.permute.xlu1 %5244  ;;  %v3770_v9 = vcombine.high %v9912_v33, %v9912_v33  ;;  %v11350_v33 = vld [vmem:[#allocation25_spill] sm:$0xff] }
 0x31d   : > { %v4577_v30 = vsel %vm4205_vm5, %v11346_v25, -inf  ;;  %v4864_v10 = vsel %vm4205_vm5, %v9992_v7, -inf  ;;  %11347 = vst [vmem:[#allocation32_spill] sm:$0xff] %v10008_v49  ;;  %5424 = vrot.lane.b32.xlu0 %v9999_v43, %s8112_s25  ;;  %v4482_v36 = vrot.slane %v4481_v32, 2  ;;  %v5781_v3 = vrot.slane %v9813_v62, 3 }
 0x31e   : > { %v5840_v58 = vsel %vm5502_vm11, %v5839_v0, %v5838_v37  ;;  %v4865_v38 = vrot.slane %v4864_v10, 4  ;;  %v4471_v41 = vmax.f32 %v4469_v53, %v4470_v11  ;;  %v4813_v61 = vrot.slane %v4812_v19, 1 }
 0x31f   : > { %v10016_v52 = vsel %vm5505_vm12, %v5841_v12, %v5840_v58  ;;  %v4578_v57 = vrot.slane %v4577_v30, 4  ;;  %v10018_v2 = vpop.permute.xlu0 %5242  ;;  %v4483_v13 = vmax.f32 %v4481_v32, %v4482_v36  ;;  %v3871_v37 = vcombine.high %v11350_v33, %v11350_v33 }
 0x320   : > { %11348 = vst [vmem:[#allocation33_spill] sm:$0xff] %v10016_v52  ;;  %11349 = vst [vmem:[#allocation34_spill] sm:$0xff] %v10018_v2  ;;  %v4866_v25 = vmax.f32 %v4864_v10, %v4865_v38  ;;  %v3872_v0 = vcombine.high %v9918_v22, %v9918_v22  ;;  %v5779_v49 = vrot.slane %v4471_v41, 4  ;;  %5366 = vrot.lane.b32.xlu1 %v4471_v41, %s8112_s25  ;;  %v4591_v62 = vsel %vm4205_vm5, %v3770_v9, -inf }
 0x321   : > { %v10026_v12 = vmax.f32 %v4812_v19, %v4813_v61  ;;  %v4579_v53 = vmax.f32 %v4577_v30, %v4578_v57  ;;  %v4484_v11 = vrot.slane %v4483_v13, 1  ;;  %v4745_v52 = vsel %vm4205_vm5, %v3871_v37, -inf  ;;  %v10035_v38 = vpop.permute.xlu1 %5192 }
 0x322   : > { %v4867_v58 = vrot.slane %v4866_v25, 2  ;;  %v5700_v32 = vsel %vm5502_vm11, %v5699_v18, %v5698_v8  ;;  %v5780_v10 = vsel %vm5496_vm9, %v5779_v49, %v9944_v5  ;;  %v4746_v36 = vrot.slane %v4745_v52, 4  ;;  %11351 = vst [vmem:[#allocation25_spill] sm:$0xff] %v10035_v38 }
 0x323   : > { %5426 = vrot.lane.b32.xlu0 %v10026_v12, %s8112_s25  ;;  %v4580_v22 = vrot.slane %v4579_v53, 2  ;;  %v5893_v19 = vrot.slane %v9847_v24, 3  ;;  %v5782_v30 = vsel %vm5499_vm10, %v5781_v3, %v5780_v10  ;;  %v4485_v41 = vmax.f32 %v4483_v13, %v4484_v11 }
 0x324   : > { %v4868_v61 = vmax.f32 %v4866_v25, %v4867_v58  ;;  %v10039_v57 = vpop.permute.xlu0 %5190  ;;  %v4747_v8 = vmax.f32 %v4745_v52, %v4746_v36  ;;  %v4592_v18 = vrot.slane %v4591_v62, 4  ;;  %v4759_v5 = vsel %vm4205_vm5, %v3872_v0, -inf }
 0x325   : > { %v4581_v9 = vmax.f32 %v4579_v53, %v4580_v22  ;;  %v3905_v49 = vcombine.high %v9890_v1, %v9890_v1  ;;  %v5891_v37 = vrot.slane %v4485_v41, 4  ;;  %5462 = vrot.lane.b32.xlu1 %v4485_v41, %s8112_s25  ;;  %v4760_v38 = vrot.slane %v4759_v5, 4 }
 0x326   : > { %v4869_v2 = vrot.slane %v4868_v61, 1  ;;  %v4748_v28 = vrot.slane %v4747_v8, 2  ;;  %v4593_v3 = vmax.f32 %v4591_v62, %v4592_v18  ;;  %v4738_v13 = vsel %vm4205_vm5, %v11350_v33, -inf }
 0x327   : > { %v4582_v24 = vrot.slane %v4581_v9, 1  ;;  %v11352_v25 = vrot.slane %v11344_v47, 1  ;;  %v5892_v0 = vsel %vm5496_vm9, %v5891_v37, %v9976_v63  ;;  %v4761_v1 = vmax.f32 %v4759_v5, %v4760_v38 }
 0x328   : > { %v10052_v53 = vmax.f32 %v4868_v61, %v4869_v2  ;;  %v5894_v11 = vsel %vm5499_vm10, %v5893_v19, %v5892_v0  ;;  %v4749_v10 = vmax.f32 %v4747_v8, %v4748_v28  ;;  %v4594_v22 = vrot.slane %v4593_v3, 2 }
 0x329   : > { %v5702_v52 = vsel %vm5505_vm12, %v11352_v25, %v5700_v32  ;;  %v4583_v58 = vmax.f32 %v4581_v9, %v4582_v24  ;;  %v10055_v36 = vpop.permute.xlu1 %5196  ;;  %v5535_v62 = vrot.slane %v9704_v26, 7  ;;  %v4762_v47 = vrot.slane %v4761_v1, 2 }
 0x32a   : > { %5428 = vrot.lane.b32.xlu0 %v10052_v53, %s8112_s25  ;;  %v4739_v33 = vrot.slane %v4738_v13, 4  ;;  %v4801_v32 = vsel %vm4205_vm5, %v3905_v49, -inf  ;;  %v10061_v63 = vpop.permute.xlu0 %5194  ;;  %v4750_v38 = vrot.slane %v4749_v10, 1  ;;  %v4595_v19 = vmax.f32 %v4593_v3, %v4594_v22 }
 0x32b   : > { %v5783_v2 = vrot.slane %v4583_v58, 2  ;;  %5370 = vrot.lane.b32.xlu1 %v4583_v58, %s8112_s25  ;;  %v4802_v28 = vrot.slane %v4801_v32, 4  ;;  %v5785_v41 = vrot.slane %v9882_v27, 1  ;;  %v3906_v26 = vcombine.high %v9957_v59, %v9957_v59 }
 0x32c   : > { %v4763_v61 = vmax.f32 %v4761_v1, %v4762_v47  ;;  %v4740_v9 = vmax.f32 %v4738_v13, %v4739_v33  ;;  %v10068_v18 = vmax.f32 %v4749_v10, %v4750_v38  ;;  %v4596_v5 = vrot.slane %v4595_v19, 1 }
 0x32d   : > { %v5784_v8 = vsel %vm5502_vm11, %v5783_v2, %v5782_v30  ;;  %v4803_v49 = vmax.f32 %v4801_v32, %v4802_v28  ;;  %v6021_v37 = vcombine.low %v9904_v21, %v5702_v52  ;;  %v6022_v27 = vcombine.high %v9904_v21, %v5702_v52  ;;  %v10081_v1 = vpop.permute.xlu1 %5288 }
 0x32e   : > { %v10072_v24 = vsel %vm5505_vm12, %v5785_v41, %v5784_v8  ;;  %v4764_v3 = vrot.slane %v4763_v61, 1  ;;  %v4741_v25 = vrot.slane %v4740_v9, 2  ;;  %5376 = vrot.lane.b32.xlu0 %v10068_v18, %s8112_s25  ;;  %v4597_v59 = vmax.f32 %v4595_v19, %v4596_v5 }
 0x32f   : > { %v4804_v13 = vrot.slane %v4803_v49, 2  ;;  %v11353_v30 = vcombine.high %v8869_v39, %v11332_v50  ;;  %v3837_v58 = vcombine.high %v9833_v23, %v9833_v23  ;;  %v4815_v21 = vsel %vm4205_vm5, %v3906_v26, -inf  ;;  %v10088_v52 = vpop.permute.xlu0 %5286 }
 0x330   : > { %v10085_v10 = vmax.f32 %v4763_v61, %v4764_v3  ;;  %v4742_v22 = vmax.f32 %v4740_v9, %v4741_v25  ;;  %v5895_v47 = vrot.slane %v4597_v59, 2  ;;  %5466 = vrot.lane.b32.xlu1 %v4597_v59, %s8112_s25  ;;  %v4816_v39 = vrot.slane %v4815_v21, 4 }
 0x331   : > { %v3931_v0 = vrot.slane %v11353_v30, %v8660_v34  ;;  %v4805_v33 = vmax.f32 %v4803_v49, %v4804_v13  ;;  %v10093_v50 = vrot.slane %v6021_v37, %v8660_v34  ;;  %v5536_v23 = vsel %vm5487_vm6, %v5535_v62, %v9725_v15 }
 0x332   : > { %v4743_v2 = vrot.slane %v4742_v22, 1  ;;  %v10098_v19 = vrot.slane %v6022_v27, %v8660_v34  ;;  %v10101_v28 = vsel %vm5502_vm11, %v5895_v47, %v5894_v11  ;;  %5472 = vrot.lane.b32.xlu0 %v10085_v10, %s8112_s25  ;;  %v4817_v26 = vmax.f32 %v4815_v21, %v4816_v39  ;;  %v10114_v3 = vpop.permute.xlu1 %5292 }
 0x333   : > { %v4850_v32 = vsel %vm4205_vm5, %v3931_v0, -inf  ;;  %v4806_v41 = vrot.slane %v4805_v33, 1  ;;  %v11354_v8 = vcombine.low %v8872_v54, %v8872_v54  ;;  %v3939_v62 = vcombine.high %v3931_v0, %v3931_v0 }
 0x334   : > { %v4851_v38 = vrot.slane %v4850_v32, 4  ;;  %v4744_v61 = vmax.f32 %v4742_v22, %v4743_v2  ;;  %v5733_v5 = vrot.slane %v9968_v46, 6  ;;  %v3940_v49 = vcombine.high %v9992_v7, %v9992_v7  ;;  %v10119_v13 = vpop.permute.xlu0 %5290 }
 0x335   : > { %v3836_v15 = vrot.slane %v11354_v8, %v8660_v34  ;;  %v10112_v11 = vmax.f32 %v4805_v33, %v4806_v41  ;;  %v4818_v37 = vrot.slane %v4817_v26, 2  ;;  %v4857_v54 = vsel %vm4205_vm5, %v3939_v62, -inf }
 0x336   : > { %v4852_v9 = vmax.f32 %v4850_v32, %v4851_v38  ;;  %v5731_v25 = vrot.slane %v4744_v61, 7  ;;  %5328 = vrot.lane.b32.xlu1 %v4744_v61, %s8112_s25  ;;  %v5537_v46 = vrot.slane %v9749_v6, 6  ;;  %v4858_v0 = vrot.slane %v4857_v54, 4  ;;  %v11355_v6 = vld [vmem:[#allocation30_spill] sm:$0xff] }
 0x337   : > { %v4696_v59 = vsel %vm4205_vm5, %v3836_v15, -inf  ;;  %5378 = vrot.lane.b32.xlu0 %v10112_v11, %s8112_s25  ;;  %v4819_v7 = vmax.f32 %v4817_v26, %v4818_v37  ;;  %v5647_v22 = vrot.slane %v9757_v35, 7  ;;  %v5649_v21 = vrot.slane %v9799_v29, 6 }
 0x338   : > { %v4853_v27 = vrot.slane %v4852_v9, 2  ;;  %v4697_v30 = vrot.slane %v4696_v59, 4  ;;  %v5732_v47 = vsel %vm5487_vm6, %v5731_v25, %v9923_v48  ;;  %v4859_v38 = vmax.f32 %v4857_v54, %v4858_v0 }
 0x339   : > { %v5734_v32 = vsel %vm5490_vm7, %v5733_v5, %v5732_v47  ;;  %v4820_v39 = vrot.slane %v4819_v7, 1  ;;  %v4689_v26 = vsel %vm4205_vm5, %v3837_v58, -inf  ;;  %v4871_v8 = vsel %vm4205_vm5, %v3940_v49, -inf }
 0x33a   : > { %v4854_v33 = vmax.f32 %v4852_v9, %v4853_v27  ;;  %v4698_v2 = vmax.f32 %v4696_v59, %v4697_v30  ;;  %v10133_v35 = vsel %vm5490_vm7, %v5537_v46, %v5536_v23  ;;  %v4860_v48 = vrot.slane %v4859_v38, 2  ;;  %v10137_v9 = vpop.permute.xlu1 %5312 }
 0x33b   : > { %v10135_v29 = vmax.f32 %v4819_v7, %v4820_v39  ;;  %v5648_v5 = vsel %vm5487_vm6, %v5647_v22, %v9771_v56  ;;  %v4690_v25 = vrot.slane %v4689_v26, 4  ;;  %v4872_v27 = vrot.slane %v4871_v8, 4  ;;  %v10141_v59 = vpop.permute.xlu0 %5310  ;;  %v11357_v39 = vld [vmem:[#allocation15_spill] sm:$0xff] }
 0x33c   : > { %v4855_v61 = vrot.slane %v4854_v33, 1  ;;  %v4699_v62 = vrot.slane %v4698_v2, 2  ;;  %v10145_v49 = vsel %vm5490_vm7, %v5649_v21, %v5648_v5  ;;  %v4861_v54 = vmax.f32 %v4859_v38, %v4860_v48 }
 0x33d   : > { %5474 = vrot.lane.b32.xlu0 %v10135_v29, %s8112_s25  ;;  %v5843_v46 = vrot.slane %v9999_v43, 7  ;;  %v4691_v56 = vmax.f32 %v4689_v26, %v4690_v25  ;;  %v4873_v30 = vmax.f32 %v4871_v8, %v4872_v27  ;;  %v3838_v47 = vcombine.high %v3836_v15, %v3836_v15 }
 0x33e   : > { %v4856_v37 = vmax.f32 %v4854_v33, %v4855_v61  ;;  %v4700_v23 = vmax.f32 %v4698_v2, %v4699_v62  ;;  %v4862_v22 = vrot.slane %v4861_v54, 1  ;;  %v11356_v33 = vld [vmem:[#allocation13_spill] sm:$0xff]  ;;  %v5845_v5 = vrot.slane %v10026_v12, 6 }
 0x33f   : > { %v11358_v21 = vcombine.low %v11356_v33, %v11357_v39  ;;  %v4692_v43 = vrot.slane %v4691_v56, 2  ;;  %v4874_v38 = vrot.slane %v4873_v30, 2  ;;  %v4703_v26 = vsel %vm4205_vm5, %v3838_v47, -inf }
 0x340   : > { %v5735_v7 = vrot.slane %v4856_v37, 5  ;;  %5332 = vrot.lane.b32.xlu1 %v4856_v37, %s8112_s25  ;;  %v4701_v0 = vrot.slane %v4700_v23, 1  ;;  %v10161_v48 = vmax.f32 %v4861_v54, %v4862_v22  ;;  %v10166_v8 = vpop.permute.xlu1 %5316  ;;  %v4704_v27 = vrot.slane %v4703_v26, 4 }
 0x341   : > { %v10155_v61 = vrot.slane %v11358_v21, %v8660_v34  ;;  %v4693_v37 = vmax.f32 %v4691_v56, %v4692_v43  ;;  %v4875_v25 = vmax.f32 %v4873_v30, %v4874_v38  ;;  %v10168_v12 = vpop.permute.xlu0 %5314  ;;  %v5789_v47 = vrot.slane %v10112_v11, 6 }
 0x342   : > { %v10159_v2 = vsel %vm5493_vm8, %v5735_v7, %v5734_v32  ;;  %v4702_v62 = vmax.f32 %v4700_v23, %v4701_v0  ;;  %v5847_v32 = vrot.slane %v10052_v53, 5  ;;  %v5591_v7 = vrot.slane %v9807_v55, 7  ;;  %5380 = vrot.lane.b32.xlu0 %v10161_v48, %s8112_s25 }
 0x343   : > { %v4906_v15 = vsel %vm4205_vm5, %v10155_v61, -inf  ;;  %v5787_v23 = vrot.slane %v10068_v18, 7  ;;  %v4694_v30 = vrot.slane %v4693_v37, 1  ;;  %v4876_v0 = vrot.slane %v4875_v25, 1 }
 0x344   : > { %v4907_v21 = vrot.slane %v4906_v15, 4  ;;  %v5844_v54 = vsel %vm5487_vm6, %v5843_v46, %v4702_v62  ;;  %5422 = vrot.lane.b32.xlu1 %v4702_v62, %s8112_s25  ;;  %v4705_v22 = vmax.f32 %v4703_v26, %v4704_v27  ;;  %v11359_v18 = vcombine.high %v11356_v33, %v11357_v39 }
 0x345   : > { %v5846_v56 = vsel %vm5490_vm7, %v5845_v5, %v5844_v54  ;;  %v4695_v43 = vmax.f32 %v4693_v37, %v4694_v30  ;;  %v10188_v38 = vmax.f32 %v4875_v25, %v4876_v0  ;;  %v11360_v5 = vcombine.low %v11357_v39, %v11357_v39 }
 0x346   : > { %v10180_v53 = vsel %vm5493_vm8, %v5847_v32, %v5846_v56  ;;  %v4908_v55 = vmax.f32 %v4906_v15, %v4907_v21  ;;  %v10186_v46 = vrot.slane %v11359_v18, %v8660_v34  ;;  %v4706_v62 = vrot.slane %v4705_v22, 2  ;;  %v10201_v21 = vpop.permute.xlu1 %5408 }
 0x347   : > { %v10194_v26 = vrot.slane %v11360_v5, %v8660_v34  ;;  %v5592_v11 = vsel %vm5487_vm6, %v5591_v7, %v9820_v20  ;;  %11361 = vst [vmem:[#allocation30_spill] sm:$0xff] %v10201_v21  ;;  %v5593_v37 = vrot.slane %v9849_v44, 6  ;;  %v5703_v25 = vrot.slane %v9853_v40, 7  ;;  %5476 = vrot.lane.b32.xlu0 %v10188_v38, %s8112_s25  ;;  %v10209_v7 = vpop.permute.xlu0 %5412 }
 0x348   : > { %v4909_v27 = vrot.slane %v4908_v55, 2  ;;  %v4962_v33 = vsel %vm4205_vm5, %v10186_v46, -inf  ;;  %v5788_v32 = vsel %vm5487_vm6, %v5787_v23, %v4695_v43  ;;  %5374 = vrot.lane.b32.xlu1 %v4695_v43, %s8112_s25  ;;  %v4707_v20 = vmax.f32 %v4705_v22, %v4706_v62  ;;  %11362 = vst [vmem:[#allocation13_spill] sm:$0xff] %v10209_v7 }
 0x349   : > { %v10212_v54 = vsel %vm5490_vm7, %v5789_v47, %v5788_v32  ;;  %v4963_v30 = vrot.slane %v4962_v33, 4  ;;  %v4920_v44 = vsel %vm4205_vm5, %v10194_v26, -inf  ;;  %v5899_v40 = vrot.slane %v10085_v10, 7  ;;  %v11364_v47 = vld [vmem:[#allocation14_spill] sm:$0xff] }
 0x34a   : > { %v4910_v56 = vmax.f32 %v4908_v55, %v4909_v27  ;;  %v5901_v23 = vrot.slane %v10135_v29, 6  ;;  %v4708_v0 = vrot.slane %v4707_v20, 1  ;;  %v4921_v18 = vrot.slane %v4920_v44, 4  ;;  %v11365_v55 = vld [vmem:[#allocation16_spill] sm:$0xff] }
 0x34b   : > { %v4964_v5 = vmax.f32 %v4962_v33, %v4963_v30  ;;  %v11363_v22 = vcombine.high %v11357_v39, %v11357_v39  ;;  %v11366_v27 = vcombine.low %v11364_v47, %v11365_v55  ;;  %v10231_v10 = vsel %vm5490_vm7, %v5593_v37, %v5592_v11  ;;  %v10235_v30 = vpop.permute.xlu1 %5410 }
 0x34c   : > { %v4911_v43 = vrot.slane %v4910_v56, 1  ;;  %v5704_v29 = vsel %vm5487_vm6, %v5703_v25, %v9876_v42  ;;  %v4709_v15 = vmax.f32 %v4707_v20, %v4708_v0  ;;  %v4922_v33 = vmax.f32 %v4920_v44, %v4921_v18  ;;  %11367 = vst [vmem:[#allocation15_spill] sm:$0xff] %v10235_v30  ;;  %v10243_v42 = vpop.permute.xlu0 %5364 }
 0x34d   : > { %v10222_v62 = vrot.slane %v11363_v22, %v8660_v34  ;;  %v10228_v32 = vrot.slane %v11366_v27, %v8660_v34  ;;  %v4965_v39 = vrot.slane %v4964_v5, 2  ;;  %v5705_v25 = vrot.slane %v9901_v17, 6 }
 0x34e   : > { %v4912_v58 = vmax.f32 %v4910_v56, %v4911_v43  ;;  %v5900_v27 = vsel %vm5487_vm6, %v5899_v40, %v4709_v15  ;;  %5470 = vrot.lane.b32.xlu1 %v4709_v15, %s8112_s25  ;;  %v4923_v11 = vrot.slane %v4922_v33, 2  ;;  %v11368_v17 = vcombine.high %v11364_v47, %v11365_v55 }
 0x34f   : > { %v4976_v22 = vsel %vm4205_vm5, %v10222_v62, -inf  ;;  %v5018_v41 = vsel %vm4205_vm5, %v10228_v32, -inf  ;;  %v10247_v20 = vsel %vm5490_vm7, %v5901_v23, %v5900_v27  ;;  %v4966_v44 = vmax.f32 %v4964_v5, %v4965_v39  ;;  %v10266_v39 = vpop.permute.xlu1 %5406 }
 0x350   : > { %v4977_v37 = vrot.slane %v4976_v22, 4  ;;  %v5019_v7 = vrot.slane %v5018_v41, 4  ;;  %v5737_v56 = vrot.slane %v4912_v58, 4  ;;  %5334 = vrot.lane.b32.xlu0 %v4912_v58, %s8112_s25  ;;  %v4924_v18 = vmax.f32 %v4922_v33, %v4923_v11  ;;  %11370 = vst [vmem:[#allocation14_spill] sm:$0xff] %v10266_v39 }
 0x351   : > { %v4967_v30 = vrot.slane %v4966_v44, 1  ;;  %v10257_v21 = vrot.slane %v11368_v17, %v8660_v34  ;;  %v11369_v58 = vcombine.low %v11365_v55, %v11365_v55  ;;  %v5541_v5 = vrot.slane %v9946_v45, 4  ;;  %v10276_v17 = vpop.permute.xlu0 %5460 }
 0x352   : > { %v4978_v40 = vmax.f32 %v4976_v22, %v4977_v37  ;;  %v5020_v43 = vmax.f32 %v5018_v41, %v5019_v7  ;;  %v5738_v15 = vsel %vm5496_vm9, %v5737_v56, %v10159_v2  ;;  %v4925_v33 = vrot.slane %v4924_v18, 1  ;;  %11371 = vst [vmem:[#allocation16_spill] sm:$0xff] %v10276_v17 }
 0x353   : > { %v10263_v23 = vrot.slane %v11369_v58, %v8660_v34  ;;  %v10269_v2 = vsel %vm5490_vm7, %v5705_v25, %v5704_v29  ;;  %v4968_v22 = vmax.f32 %v4966_v44, %v4967_v30  ;;  %v5074_v47 = vsel %vm4205_vm5, %v10257_v21, -inf }
 0x354   : > { %v4979_v41 = vrot.slane %v4978_v40, 2  ;;  %v5021_v7 = vrot.slane %v5020_v43, 2  ;;  %v5543_v11 = vrot.slane %v9920_v60, 3  ;;  %v4926_v37 = vmax.f32 %v4924_v18, %v4925_v33 }
 0x355   : > { %v5032_v27 = vsel %vm4205_vm5, %v10263_v23, -inf  ;;  %v11372_v58 = vrot.slane %v11355_v6, 5  ;;  %v5739_v25 = vrot.slane %v4968_v22, 3  ;;  %5336 = vrot.lane.b32.xlu1 %v4968_v22, %s8112_s25  ;;  %v5075_v30 = vrot.slane %v5074_v47, 4 }
 0x356   : > { %v4980_v56 = vmax.f32 %v4978_v40, %v4979_v41  ;;  %v5022_v45 = vmax.f32 %v5020_v43, %v5021_v7  ;;  %v5033_v44 = vrot.slane %v5032_v27, 4  ;;  %v5849_v39 = vrot.slane %v4926_v37, 4  ;;  %5430 = vrot.lane.b32.xlu0 %v4926_v37, %s8112_s25 }
 0x357   : > { %v5540_v29 = vsel %vm5493_vm8, %v11372_v58, %v10133_v35  ;;  %v5545_v40 = vrot.slane %v9970_v16, 2  ;;  %v5740_v43 = vsel %vm5499_vm10, %v5739_v25, %v5738_v15  ;;  %v5076_v33 = vmax.f32 %v5074_v47, %v5075_v30  ;;  %v10290_v58 = vpop.permute.xlu1 %5360 }
 0x358   : > { %v5542_v0 = vsel %vm5496_vm9, %v5541_v5, %v5540_v29  ;;  %v4981_v60 = vrot.slane %v4980_v56, 1  ;;  %v5023_v18 = vrot.slane %v5022_v45, 1  ;;  %v5034_v6 = vmax.f32 %v5032_v27, %v5033_v44 }
 0x359   : > { %v5850_v41 = vsel %vm5496_vm9, %v5849_v39, %v10180_v53  ;;  %v5791_v5 = vrot.slane %v10161_v48, 5  ;;  %v5544_v37 = vsel %vm5499_vm10, %v5543_v11, %v5542_v0  ;;  %v5077_v29 = vrot.slane %v5076_v33, 2  ;;  %v10304_v48 = vpop.permute.xlu0 %5318 }
 0x35a   : > { %v4982_v7 = vmax.f32 %v4980_v56, %v4981_v60  ;;  %v5024_v22 = vmax.f32 %v5022_v45, %v5023_v18  ;;  %v5035_v17 = vrot.slane %v5034_v6, 2  ;;  %v11373_v53 = vcombine.high %v11365_v55, %v11365_v55 }
 0x35b   : > { %v3973_v47 = vcombine.high %v10155_v61, %v10155_v61  ;;  %v10307_v0 = vsel %vm5502_vm11, %v5545_v40, %v5544_v37  ;;  %v5078_v27 = vmax.f32 %v5076_v33, %v5077_v29  ;;  %v10311_v56 = vsel %vm5493_vm8, %v5791_v5, %v10212_v54 }
 0x35c   : > { %v5851_v16 = vrot.slane %v4982_v7, 3  ;;  %5432 = vrot.lane.b32.xlu1 %v4982_v7, %s8112_s25  ;;  %v5741_v15 = vrot.slane %v5024_v22, 2  ;;  %5338 = vrot.lane.b32.xlu0 %v5024_v22, %s8112_s25  ;;  %v10300_v39 = vrot.slane %v11373_v53, %v8660_v34  ;;  %v5036_v11 = vmax.f32 %v5034_v6, %v5035_v17  ;;  %v11374_v17 = vld [vmem:[#allocation31_spill] sm:$0xff]  ;;  %v11375_v6 = vld [vmem:[#allocation28_spill] sm:$0xff]  ;;  %v10323_v7 = vpop.permute.xlu1 %5456 }
 0x35d   : > { %v4913_v61 = vsel %vm4205_vm5, %v3973_v47, -inf  ;;  %v5079_v30 = vrot.slane %v5078_v27, 1  ;;  %v5903_v40 = vrot.slane %v10188_v38, 5  ;;  %v5653_v54 = vrot.slane %v11375_v6, 4  ;;  %v11378_v6 = vld [vmem:[#allocation25_spill] sm:$0xff] }
 0x35e   : > { %v5852_v45 = vsel %vm5499_vm10, %v5851_v16, %v5850_v41  ;;  %v5742_v55 = vsel %vm5502_vm11, %v5741_v15, %v5740_v43  ;;  %v5088_v25 = vsel %vm4205_vm5, %v10300_v39, -inf  ;;  %v5037_v44 = vrot.slane %v5036_v11, 1 }
 0x35f   : > { %v5089_v60 = vrot.slane %v5088_v25, 4  ;;  %v4914_v18 = vrot.slane %v4913_v61, 4  ;;  %v4007_v41 = vcombine.high %v10186_v46, %v10186_v46  ;;  %v5080_v43 = vmax.f32 %v5078_v27, %v5079_v30  ;;  %v10336_v46 = vpop.permute.xlu0 %5322 }
 0x360   : > { %v5038_v22 = vmax.f32 %v5036_v11, %v5037_v44  ;;  %v11376_v29 = vrot.slane %v9777_v31, 5  ;;  %v3974_v15 = vcombine.high %v10194_v26, %v10194_v26  ;;  %v10334_v53 = vsel %vm5493_vm8, %v5903_v40, %v10247_v20 }
 0x361   : > { %v5090_v5 = vmax.f32 %v5088_v25, %v5089_v60  ;;  %v4915_v37 = vmax.f32 %v4913_v61, %v4914_v18  ;;  %v4969_v38 = vsel %vm4205_vm5, %v4007_v41, -inf  ;;  %v5743_v47 = vrot.slane %v5080_v43, 1  ;;  %5340 = vrot.lane.b32.xlu1 %v5080_v43, %s8112_s25  ;;  %v11377_v18 = vld [vmem:[#allocation32_spill] sm:$0xff] }
 0x362   : > { %v5652_v16 = vsel %vm5493_vm8, %v11376_v29, %v10145_v49  ;;  %v5853_v27 = vrot.slane %v5038_v22, 2  ;;  %5434 = vrot.lane.b32.xlu0 %v5038_v22, %s8112_s25  ;;  %v5597_v25 = vrot.slane %v10039_v57, 4  ;;  %v4970_v26 = vrot.slane %v4969_v38, 4 }
 0x363   : > { %v5091_v31 = vrot.slane %v5090_v5, 2  ;;  %v4916_v11 = vrot.slane %v4915_v37, 2  ;;  %v10341_v49 = vsel %vm5496_vm9, %v5653_v54, %v5652_v16  ;;  %v4927_v61 = vsel %vm4205_vm5, %v3974_v15, -inf  ;;  %v10351_v54 = vpop.permute.xlu1 %5362 }
 0x364   : > { %v10346_v20 = vsel %vm5505_vm12, %v5743_v47, %v5742_v55  ;;  %v5854_v30 = vsel %vm5502_vm11, %v5853_v27, %v5852_v45  ;;  %v5599_v41 = vrot.slane %v11378_v6, 3  ;;  %v4971_v43 = vmax.f32 %v4969_v38, %v4970_v26  ;;  %v10361_v38 = vpop.permute.xlu0 %5416 }
 0x365   : > { %v5092_v44 = vmax.f32 %v5090_v5, %v5091_v31  ;;  %v4917_v60 = vmax.f32 %v4915_v37, %v4916_v11  ;;  %v4928_v22 = vrot.slane %v4927_v61, 4  ;;  %v11379_v57 = vrot.slane %v9825_v51, 5  ;;  %v11380_v5 = vld [vmem:[#allocation34_spill] sm:$0xff] }
 0x366   : > { %v4008_v45 = vcombine.high %v10222_v62, %v10222_v62  ;;  %v4972_v47 = vrot.slane %v4971_v43, 2  ;;  %v4041_v51 = vcombine.high %v10228_v32, %v10228_v32 }
 0x367   : > { %v5596_v29 = vsel %vm5493_vm8, %v11379_v57, %v10231_v10  ;;  %v5093_v16 = vrot.slane %v5092_v44, 1  ;;  %v4918_v55 = vrot.slane %v4917_v60, 1  ;;  %v4929_v27 = vmax.f32 %v4927_v61, %v4928_v22 }
 0x368   : > { %v5598_v15 = vsel %vm5496_vm9, %v5597_v25, %v5596_v29  ;;  %v4983_v26 = vsel %vm4205_vm5, %v4008_v45, -inf  ;;  %v4973_v6 = vmax.f32 %v4971_v43, %v4972_v47  ;;  %v4075_v45 = vcombine.high %v10257_v21, %v10257_v21 }
 0x369   : > { %v5094_v31 = vmax.f32 %v5092_v44, %v5093_v16  ;;  %v4919_v11 = vmax.f32 %v4917_v60, %v4918_v55  ;;  %v4930_v57 = vrot.slane %v4929_v27, 2  ;;  %v4984_v62 = vrot.slane %v4983_v26, 4  ;;  %v10373_v16 = vpop.permute.xlu1 %5458 }
 0x36a   : > { %v10368_v40 = vsel %vm5499_vm10, %v5599_v41, %v5598_v15  ;;  %v5025_v44 = vsel %vm4205_vm5, %v4041_v51, -inf  ;;  %v4974_v60 = vrot.slane %v4973_v6, 1  ;;  %v5709_v51 = vrot.slane %v10088_v52, 4 }
 0x36b   : > { %v5855_v25 = vrot.slane %v5094_v31, 1  ;;  %5436 = vrot.lane.b32.xlu1 %v5094_v31, %s8112_s25  ;;  %v5793_v61 = vrot.slane %v4919_v11, 4  ;;  %5382 = vrot.lane.b32.xlu0 %v4919_v11, %s8112_s25  ;;  %v4931_v22 = vmax.f32 %v4929_v27, %v4930_v57  ;;  %v4985_v29 = vmax.f32 %v4983_v26, %v4984_v62  ;;  %v10383_v27 = vpop.permute.xlu0 %5420 }
 0x36c   : > { %v5026_v32 = vrot.slane %v5025_v44, 4  ;;  %v4975_v15 = vmax.f32 %v4973_v6, %v4974_v60  ;;  %11381 = vst [vmem:[#allocation31_spill] sm:$0xff] %v10383_v27  ;;  %v5711_v26 = vrot.slane %v10081_v1, 3  ;;  %v5081_v57 = vsel %vm4205_vm5, %v4075_v45, -inf  ;;  %v11382_v1 = vld [vmem:[#allocation29_spill] sm:$0xff] }
 0x36d   : > { %v10377_v55 = vsel %vm5505_vm12, %v5855_v25, %v5854_v30  ;;  %v5794_v41 = vsel %vm5496_vm9, %v5793_v61, %v10311_v56  ;;  %v4932_v47 = vrot.slane %v4931_v22, 1  ;;  %v4986_v31 = vrot.slane %v4985_v29, 2 }
 0x36e   : > { %v5027_v11 = vmax.f32 %v5025_v44, %v5026_v32  ;;  %v4042_v30 = vcombine.high %v10263_v23, %v10263_v23  ;;  %v5795_v62 = vrot.slane %v4975_v15, 3  ;;  %v5082_v25 = vrot.slane %v5081_v57, 4 }
 0x36f   : > { %5384 = vrot.lane.b32.xlu1 %v4975_v15, %s8112_s25  ;;  %v4933_v56 = vmax.f32 %v4931_v22, %v4932_v47  ;;  %v4987_v21 = vmax.f32 %v4985_v29, %v4986_v31  ;;  %v4076_v44 = vcombine.high %v10300_v39, %v10300_v39  ;;  %v11383_v52 = vcombine.high %v11382_v1, %v11382_v1  ;;  %v10400_v29 = vpop.permute.xlu1 %5358  ;;  %v10405_v10 = vpop.permute.xlu0 %5368 }
 0x370   : > { %v5028_v6 = vrot.slane %v5027_v11, 2  ;;  %v5039_v61 = vsel %vm4205_vm5, %v4042_v30, -inf  ;;  %v5796_v32 = vsel %vm5499_vm10, %v5795_v62, %v5794_v41  ;;  %v5083_v15 = vmax.f32 %v5081_v57, %v5082_v25 }
 0x371   : > { %v4647_v60 = vsel %vm4205_vm5, %v11383_v52, -inf  ;;  %v5905_v23 = vrot.slane %v4933_v56, 4  ;;  %5478 = vrot.lane.b32.xlu0 %v4933_v56, %s8112_s25  ;;  %v4988_v45 = vrot.slane %v4987_v21, 1  ;;  %v5040_v47 = vrot.slane %v5039_v61, 4 }
 0x372   : > { %v5029_v22 = vmax.f32 %v5027_v11, %v5028_v6  ;;  %v5095_v31 = vsel %vm4205_vm5, %v4076_v44, -inf  ;;  %v4648_v30 = vrot.slane %v4647_v60, 4  ;;  %v11384_v41 = vrot.slane %v9878_v14, 5 }
 0x373   : > { %v5906_v39 = vsel %vm5496_vm9, %v5905_v23, %v10334_v53  ;;  %v4989_v1 = vmax.f32 %v4987_v21, %v4988_v45  ;;  %v5096_v52 = vrot.slane %v5095_v31, 4  ;;  %v5084_v62 = vrot.slane %v5083_v15, 2 }
 0x374   : > { %v5030_v35 = vrot.slane %v5029_v22, 1  ;;  %v5708_v11 = vsel %vm5493_vm8, %v11384_v41, %v10269_v2  ;;  %v5041_v56 = vmax.f32 %v5039_v61, %v5040_v47  ;;  %v4649_v57 = vmax.f32 %v4647_v60, %v4648_v30  ;;  %v11385_v61 = vld [vmem:[#allocation18_spill] sm:$0xff]  ;;  %v11386_v60 = vld [vmem:[#allocation20_spill] sm:$0xff]  ;;  %v10420_v30 = vpop.permute.xlu1 %5454 }
 0x375   : > { %v5710_v6 = vsel %vm5496_vm9, %v5709_v51, %v5708_v11  ;;  %v5907_v25 = vrot.slane %v4989_v1, 3  ;;  %5480 = vrot.lane.b32.xlu1 %v4989_v1, %s8112_s25  ;;  %v5097_v53 = vmax.f32 %v5095_v31, %v5096_v52  ;;  %v5713_v21 = vrot.slane %v10119_v13, 2  ;;  %v11388_v13 = vld [vmem:[#allocation17_spill] sm:$0xff] }
 0x376   : > { %v5031_v44 = vmax.f32 %v5029_v22, %v5030_v35  ;;  %v5085_v23 = vmax.f32 %v5083_v15, %v5084_v62  ;;  %v5042_v45 = vrot.slane %v5041_v56, 2  ;;  %v4650_v37 = vrot.slane %v4649_v57, 2  ;;  %v11389_v15 = vld [vmem:[#allocation19_spill] sm:$0xff]  ;;  %v10428_v62 = vpop.permute.xlu0 %5464 }
 0x377   : > { %v5908_v33 = vsel %vm5499_vm10, %v5907_v25, %v5906_v39  ;;  %v5098_v2 = vrot.slane %v5097_v53, 2  ;;  %v11387_v51 = vcombine.low %v11385_v61, %v11386_v60  ;;  %v11390_v1 = vcombine.low %v11388_v13, %v11389_v15  ;;  %11391 = vst [vmem:[#allocation28_spill] sm:$0xff] %v10428_v62 }
 0x378   : > { %v5797_v14 = vrot.slane %v5031_v44, 2  ;;  %5386 = vrot.lane.b32.xlu0 %v5031_v44, %s8112_s25  ;;  %v5086_v35 = vrot.slane %v5085_v23, 1  ;;  %v5043_v22 = vmax.f32 %v5041_v56, %v5042_v45  ;;  %v4651_v31 = vmax.f32 %v4649_v57, %v4650_v37 }
 0x379   : > { %v6013_v47 = vrot.slane %v11387_v51, %v8660_v34  ;;  %v5981_v52 = vrot.slane %v11390_v1, %v8660_v34  ;;  %v5099_v41 = vmax.f32 %v5097_v53, %v5098_v2  ;;  %v8113_v43 = vmov 1934713408   ;;  %v11393_v1 = vld [vmem:[#allocation26_spill] sm:$0xff] }
 0x37a   : > { %v5798_v39 = vsel %vm5502_vm11, %v5797_v14, %v5796_v32  ;;  %v5087_v25 = vmax.f32 %v5085_v23, %v5086_v35  ;;  %v5044_v44 = vrot.slane %v5043_v22, 1  ;;  %v4652_v51 = vrot.slane %v4651_v31, 1 }
 0x37b   : > { %v6069_v11 = vcombine.low %v6013_v47, %v10093_v50  ;;  %v6040_v27 = vunpack.c.l.s4 %v8113_v43  ;;  %v11392_v37 = vrot.slane %v10061_v63, 2  ;;  %v5712_v57 = vsel %vm5499_vm10, %v5711_v26, %v5710_v6  ;;  %v10443_v26 = vpop.permute.xlu1 %5320 }
 0x37c   : > { %v5100_v45 = vrot.slane %v5099_v41, 1  ;;  %v6037_v32 = vcombine.low %v5981_v52, %v11393_v1  ;;  %v5799_v53 = vrot.slane %v5087_v25, 1  ;;  %5388 = vrot.lane.b32.xlu1 %v5087_v25, %s8112_s25  ;;  %v5045_v14 = vmax.f32 %v5043_v22, %v5044_v44 }
 0x37d   : > { %v5602_v56 = vsel %vm5502_vm11, %v11392_v37, %v10368_v40  ;;  %v4653_v2 = vmax.f32 %v4651_v31, %v4652_v51  ;;  %v6041_v23 = vunpack.c.0.s8 %v6040_v27  ;;  %v11394_v35 = vrot.slane %v11374_v17, 3  ;;  %v11395_v27 = vld [vmem:[#allocation11_spill] sm:$0xff] }
 0x37e   : > { %v5715_v63 = vrot.slane %v10114_v3, 1  ;;  %v5714_v40 = vsel %vm5502_vm11, %v5713_v21, %v5712_v57  ;;  %v5101_v37 = vmax.f32 %v5099_v41, %v5100_v45  ;;  %v10446_v6 = vsel %vm5505_vm12, %v5799_v53, %v5798_v39  ;;  %5482 = vrot.lane.b32.xlu0 %v5045_v14, %s8112_s25  ;;  %v10459_v39 = vpop.permute.xlu0 %5372 }
 0x37f   : > { %v5656_v43 = vsel %vm5499_vm10, %v11394_v35, %v10341_v49  ;;  %v5909_v62 = vrot.slane %v5045_v14, 2  ;;  %v5897_v22 = vrot.slane %v4653_v2, 1  ;;  %v10450_v31 = vsub.s32 %v6041_v23, %v11395_v27  ;;  %v10496_v14 = vpop.permute.xlu1 %5324 }
 0x380   : > { %v11396_v17 = vrot.slane %v11380_v5, 2  ;;  %v11397_v3 = vrot.slane %v10055_v36, 1  ;;  %v5911_v41 = vrot.slane %v5101_v37, 1  ;;  %v6038_v25 = vcombine.high %v5981_v52, %v11393_v1  ;;  %5484 = vrot.lane.b32.xlu1 %v5101_v37, %s8112_s25 }
 0x381   : > { %v5910_v44 = vsel %vm5502_vm11, %v5909_v62, %v5908_v33  ;;  %v10465_v51 = vsel %vm5505_vm12, %v5897_v22, %v10101_v28  ;;  %v6045_v5 = vrot.slane %v6037_v32, %v10450_v31  ;;  %v6077_v57 = vrot.slane %v6069_v11, %v10450_v31 }
 0x382   : > { %v5658_v49 = vsel %vm5502_vm11, %v11396_v17, %v5656_v43  ;;  %v5604_v21 = vsel %vm5505_vm12, %v11397_v3, %v5602_v56  ;;  %v11398_v36 = vrot.slane %v9948_v4, 1  ;;  %v5716_v52 = vsel %vm5505_vm12, %v5715_v63, %v5714_v40  ;;  %5468 = vrot.lane.b32.xlu0 %v4653_v2, %s8112_s25  ;;  %v11402_v43 = vld [vmem:[#allocation27_spill] sm:$0xff]  ;;  %v10504_v37 = vpop.permute.xlu0 %5326 }
 0x383   : > { %v10475_v45 = vsel %vm5505_vm12, %v5911_v41, %v5910_v44  ;;  %v6070_v33 = vcombine.high %v6013_v47, %v10093_v50  ;;  %v11399_v62 = vrot.slane %v11377_v18, 1  ;;  %v10482_v11 = vcombine.low %v6045_v5, %v6077_v57 }
 0x384   : > { %v5548_v56 = vsel %vm5505_vm12, %v11398_v36, %v10307_v0  ;;  %v10484_v32 = vcombine.high %v6045_v5, %v6077_v57  ;;  %v6052_v4 = vrot.slane %v6038_v25, %v10450_v31  ;;  %v11400_v53 = vcombine.high %v11388_v13, %v11389_v15  ;;  %v11403_v36 = vld [vmem:[#allocation21_spill] sm:$0xff] }
 0x385   : > { %v5660_v28 = vsel %vm5505_vm12, %v11399_v62, %v5658_v49  ;;  %v6261_v1 = vcombine.low %v5548_v56, %v5604_v21  ;;  %v6084_v0 = vrot.slane %v6070_v33, %v10450_v31  ;;  %v11401_v18 = vcombine.high %v11385_v61, %v11386_v60  ;;  %v11406_v62 = vld [vmem:[#allocation22_spill] sm:$0xff] }
 0x386   : > { %v5988_v50 = vrot.slane %v11400_v53, %v8660_v34  ;;  %v6293_v2 = vcombine.low %v5660_v28, %v5716_v52  ;;  %6549 = vrot.lane.b32.xlu0 %v10482_v11, %s8114_s26  ;;  %v6262_v13 = vcombine.high %v5548_v56, %v5604_v21  ;;  %v6294_v49 = vcombine.high %v5660_v28, %v5716_v52  ;;  %v11404_v56 = vld [vmem:[#allocation23_spill] sm:$0xff]  ;;  %v11407_v28 = vld [vmem:[#allocation24_spill] sm:$0xff] }
 0x387   : > { %v6020_v47 = vrot.slane %v11401_v18, %v8660_v34  ;;  %v10498_v23 = vcombine.low %v6052_v4, %v6084_v0  ;;  %v10500_v35 = vcombine.high %v6052_v4, %v6084_v0  ;;  %v6269_v15 = vrot.slane %v6261_v1, %v8660_v34 }
 0x388   : > { %v6053_v63 = vcombine.low %v5988_v50, %v11402_v43  ;;  %v6054_v61 = vcombine.high %v5988_v50, %v11402_v43  ;;  %v6301_v3 = vrot.slane %v6293_v2, %v8660_v34  ;;  %v10520_v57 = vpop.permute.xlu1 %5414  ;;  %v11405_v52 = vcombine.low %v11403_v36, %v11404_v56 }
 0x389   : > { %v6085_v40 = vcombine.low %v6020_v47, %v10098_v19  ;;  %v6086_v60 = vcombine.high %v6020_v47, %v10098_v19  ;;  %v11408_v1 = vcombine.low %v11406_v62, %v11407_v28  ;;  %v6276_v0 = vrot.slane %v6262_v13, %v8660_v34 }
 0x38a   : > { %v6061_v22 = vrot.slane %v6053_v63, %v10450_v31  ;;  %v6068_v41 = vrot.slane %v6054_v61, %v10450_v31  ;;  %6553 = vrot.lane.b32.xlu0 %v10484_v32, %s8114_s26  ;;  %v6253_v33 = vrot.slane %v11405_v52, %v8660_v34  ;;  %v10537_v53 = vpop.permute.xlu0 %5330  ;;  %v6308_v50 = vrot.slane %v6294_v49, %v8660_v34 }
 0x38b   : > { %v6093_v17 = vrot.slane %v6085_v40, %v10450_v31  ;;  %v6100_v25 = vrot.slane %v6086_v60, %v10450_v31  ;;  %v6285_v4 = vrot.slane %v11408_v1, %v8660_v34  ;;  %v11409_v63 = vcombine.high %v11403_v36, %v11404_v56 }
 0x38c   : > { %v6309_v18 = vcombine.low %v6253_v33, %v6269_v15  ;;  %v6310_v2 = vcombine.high %v6253_v33, %v6269_v15  ;;  %v11410_v13 = vcombine.high %v11406_v62, %v11407_v28  ;;  %v5745_v52 = vrot.slane %v10137_v9, 7 }
 0x38d   : > { %v10516_v44 = vcombine.low %v6061_v22, %v6093_v17  ;;  %v10518_v5 = vcombine.high %v6061_v22, %v6093_v17  ;;  %v10524_v19 = vcombine.low %v6068_v41, %v6100_v25  ;;  %v10526_v21 = vcombine.high %v6068_v41, %v6100_v25 }
 0x38e   : > { %v6341_v47 = vcombine.low %v6285_v4, %v6301_v3  ;;  %v6342_v43 = vcombine.high %v6285_v4, %v6301_v3  ;;  %v6260_v40 = vrot.slane %v11409_v63, %v8660_v34  ;;  %6557 = vrot.lane.b32.xlu0 %v10498_v23, %s8114_s26  ;;  %v6317_v61 = vrot.slane %v6309_v18, %v10450_v31  ;;  %v10554_v49 = vpop.permute.xlu1 %5418 }
 0x38f   : > { %v6292_v22 = vrot.slane %v11410_v13, %v8660_v34  ;;  %v6324_v15 = vrot.slane %v6310_v2, %v10450_v31  ;;  %v10563_v1 = vpop.permute.xlu0 %5424  ;;  %v5801_v28 = vrot.slane %v10290_v58, 7  ;;  %v5913_v2 = vrot.slane %v10323_v7, 7  ;;  %v11419_v7 = vld [vmem:[#allocation16_spill] sm:$0xff] }
 0x390   : > { %v6349_v60 = vrot.slane %v6341_v47, %v10450_v31  ;;  %v6356_v17 = vrot.slane %v6342_v43, %v10450_v31  ;;  %v6325_v3 = vcombine.low %v6260_v40, %v6276_v0  ;;  %v6326_v56 = vcombine.high %v6260_v40, %v6276_v0 }
 0x391   : > { %v6357_v36 = vcombine.low %v6292_v22, %v6308_v50  ;;  %v6358_v47 = vcombine.high %v6292_v22, %v6308_v50  ;;  %v5802_v13 = vsel %vm5487_vm6, %v5801_v28, %v10400_v29  ;;  %v5746_v29 = vsel %vm5487_vm6, %v5745_v52, %v10141_v59 }
 0x392   : > { %v10556_v41 = vcombine.low %v6317_v61, %v6349_v60  ;;  %v10558_v25 = vcombine.high %v6317_v61, %v6349_v60  ;;  %v10561_v33 = vcombine.low %v6324_v15, %v6356_v17  ;;  %v10565_v62 = vcombine.high %v6324_v15, %v6356_v17  ;;  %6561 = vrot.lane.b32.xlu0 %v10500_v35, %s8114_s26  ;;  %v5367_v43 = vpop.permute.xlu1 %5366  ;;  %v11413_v17 = vld [vmem:[#allocation33_spill] sm:$0xff] }
 0x393   : > { %v6333_v4 = vrot.slane %v6325_v3, %v10450_v31  ;;  %v6365_v18 = vrot.slane %v6357_v36, %v10450_v31  ;;  %v6340_v61 = vrot.slane %v6326_v56, %v10450_v31  ;;  %v6372_v50 = vrot.slane %v6358_v47, %v10450_v31 }
 0x394   : > { %v5747_v60 = vrot.slane %v10168_v12, 6  ;;  %v5803_v36 = vrot.slane %v10351_v54, 6  ;;  %v5749_v28 = vrot.slane %v10166_v8, 5  ;;  %v5751_v54 = vrot.slane %v10304_v48, 4 }
 0x395   : > { %v10580_v63 = vcombine.low %v6333_v4, %v6365_v18  ;;  %v10582_v40 = vcombine.high %v6333_v4, %v6365_v18  ;;  %v10591_v22 = vcombine.low %v6340_v61, %v6372_v50  ;;  %v10593_v15 = vcombine.high %v6340_v61, %v6372_v50  ;;  %v10598_v56 = vpop.permute.xlu0 %5426  ;;  %v11414_v4 = vld [vmem:[#allocation12_spill] sm:$0xff] }
 0x396   : > { %6565 = vrot.lane.b32.xlu0 %v10516_v44, %s8114_s26  ;;  %v6109_v18 = vcombine.low %v11414_v4, %v10072_v24  ;;  %v6110_v47 = vcombine.high %v11414_v4, %v10072_v24  ;;  %v5748_v61 = vsel %vm5490_vm7, %v5747_v60, %v5746_v29  ;;  %v5804_v50 = vsel %vm5490_vm7, %v5803_v36, %v5802_v13 }
 0x397   : > { %11411 = vst [vmem:[#allocation32_spill] sm:$0xff] %v10582_v40  ;;  %11412 = vst [vmem:[#allocation25_spill] sm:$0xff] %v10593_v15  ;;  %v5807_v3 = vrot.slane %v5367_v43, 4  ;;  %v10612_v58 = vpop.permute.xlu1 %5462  ;;  %v5805_v12 = vrot.slane %v10243_v42, 5  ;;  %v5753_v59 = vrot.slane %v10443_v26, 3  ;;  %v5750_v8 = vsel %vm5493_vm8, %v5749_v28, %v5748_v61 }
 0x398   : > { %v5752_v52 = vsel %vm5496_vm9, %v5751_v54, %v5750_v8  ;;  %v5809_v43 = vrot.slane %v10405_v10, 3  ;;  %v5757_v13 = vrot.slane %v10496_v14, 1  ;;  %v5755_v26 = vrot.slane %v10336_v46, 2 }
 0x399   : > { %v5806_v24 = vsel %vm5493_vm8, %v5805_v12, %v5804_v50  ;;  %v5754_v42 = vsel %vm5499_vm10, %v5753_v59, %v5752_v52  ;;  %v5813_v12 = vrot.slane %v10459_v39, 1  ;;  %v10645_v8 = vrot.slane %v6109_v18, %v8660_v34 }
 0x39a   : > { %6569 = vrot.lane.b32.xlu0 %v10518_v5, %s8114_s26  ;;  %v5808_v48 = vsel %vm5496_vm9, %v5807_v3, %v5806_v24  ;;  %v5756_v3 = vsel %vm5502_vm11, %v5755_v26, %v5754_v42  ;;  %v10650_v24 = vrot.slane %v6110_v47, %v8660_v34  ;;  %v5761_v47 = vrot.slane %v10537_v53, 6 }
 0x39b   : > { %v5810_v29 = vsel %vm5499_vm10, %v5809_v43, %v5808_v48  ;;  %v5758_v10 = vsel %vm5505_vm12, %v5757_v13, %v5756_v3  ;;  %v5873_v53 = vrot.slane %v10598_v56, 6  ;;  %v5863_v42 = vrot.slane %v10520_v57, 4  ;;  %v11418_v43 = vld [vmem:[#allocation13_spill] sm:$0xff] }
 0x39c   : > { %v5429_v60 = vpop.permute.xlu0 %5428  ;;  %v5861_v48 = vrot.slane %v11418_v43, 5  ;;  %v5865_v27 = vrot.slane %v10361_v38, 3 }
 0x39d   : > { %v5371_v36 = vpop.permute.xlu1 %5370 }
 0x39e   : > { %6573 = vrot.lane.b32.xlu0 %v10524_v19, %s8114_s26  ;;  %v5811_v4 = vrot.slane %v5371_v36, 2 }
 0x3a0   : > { %v5812_v28 = vsel %vm5502_vm11, %v5811_v4, %v5810_v29  ;;  %v5377_v14 = vpop.permute.xlu0 %5376 }
 0x3a1   : > { %v5814_v61 = vsel %vm5505_vm12, %v5813_v12, %v5812_v28  ;;  %v5871_v28 = vrot.slane %v10563_v1, 7 }
 0x3a2   : > { %6577 = vrot.lane.b32.xlu0 %v10526_v21, %s8114_s26  ;;  %v6125_v54 = vcombine.low %v5758_v10, %v5814_v61  ;;  %v6126_v50 = vcombine.high %v5758_v10, %v5814_v61  ;;  %v10636_v46 = vpop.permute.xlu1 %5466  ;;  %v5875_v10 = vrot.slane %v5429_v60, 5 }
 0x3a4   : > { %v10639_v39 = vrot.slane %v6125_v54, %v8660_v34  ;;  %v10642_v59 = vrot.slane %v6126_v50, %v8660_v34  ;;  %v5473_v52 = vpop.permute.xlu0 %5472 }
 0x3a6   : > { %6581 = vrot.lane.b32.xlu0 %v10556_v41, %s8114_s26 }
 0x3a8   : > { %v5329_v13 = vpop.permute.xlu1 %5328 }
 0x3a9   : > { %v5759_v36 = vrot.slane %v5329_v13, 7  ;;  %v5379_v4 = vpop.permute.xlu0 %5378 }
 0x3aa   : > { %6585 = vrot.lane.b32.xlu0 %v10558_v25, %s8114_s26  ;;  %v5817_v1 = vrot.slane %v5379_v4, 6 }
 0x3ab   : > { %v5760_v26 = vsel %vm5487_vm6, %v5759_v36, %v10504_v37  ;;  %v5815_v36 = vrot.slane %v5377_v14, 7 }
 0x3ac   : > { %v10666_v12 = vsel %vm5490_vm7, %v5761_v47, %v5760_v26 }
 0x3ae   : > { %6589 = vrot.lane.b32.xlu0 %v10561_v33, %s8114_s26 }
 0x3af   : > { %v5475_v3 = vpop.permute.xlu0 %5474 }
 0x3b2   : > { %v10670_v29 = vpop.permute.xlu1 %5332  ;;  %6593 = vrot.lane.b32.xlu0 %v10565_v62, %s8114_s26 }
 0x3b4   : > { %v5381_v13 = vpop.permute.xlu0 %5380 }
 0x3b5   : > { %v5819_v56 = vrot.slane %v5381_v13, 5 }
 0x3b6   : > { %6597 = vrot.lane.b32.xlu0 %v10580_v63, %s8114_s26  ;;  %v5423_v37 = vpop.permute.xlu1 %5422 }
 0x3b7   : > { %v5872_v61 = vsel %vm5487_vm6, %v5871_v28, %v5423_v37  ;;  %v5929_v37 = vrot.slane %v5475_v3, 6 }
 0x3b8   : > { %v5874_v54 = vsel %vm5490_vm7, %v5873_v53, %v5872_v61  ;;  %v5927_v53 = vrot.slane %v5473_v52, 7 }
 0x3b9   : > { %v10681_v50 = vsel %vm5493_vm8, %v5875_v10, %v5874_v54  ;;  %v5477_v28 = vpop.permute.xlu0 %5476 }
 0x3ba   : > { %6601 = vrot.lane.b32.xlu0 %v10582_v40, %s8114_s26  ;;  %v5375_v47 = vpop.permute.xlu1 %5374  ;;  %v5931_v14 = vrot.slane %v5477_v28, 5  ;;  %v11416_v28 = vld [vmem:[#allocation14_spill] sm:$0xff] }
 0x3bb   : > { %v5816_v26 = vsel %vm5487_vm6, %v5815_v36, %v5375_v47 }
 0x3bc   : > { %v5818_v18 = vsel %vm5490_vm7, %v5817_v1, %v5816_v26 }
 0x3bd   : > { %v10690_v60 = vsel %vm5493_vm8, %v5819_v56, %v5818_v18  ;;  %v11415_v56 = vld [vmem:[#allocation30_spill] sm:$0xff] }
 0x3be   : > { %6605 = vrot.lane.b32.xlu0 %v10591_v22, %s8114_s26  ;;  %v5857_v26 = vrot.slane %v11415_v56, 7  ;;  %v5914_v56 = vsel %vm5487_vm6, %v5913_v2, %v10420_v30  ;;  %v5763_v30 = vrot.slane %v10670_v29, 5  ;;  %v5919_v2 = vrot.slane %v10612_v58, 4 }
 0x3bf   : > { %v11423_v58 = vcombine.high %v10346_v20, %v10446_v6 }
 0x3c0   : > { %v5471_v10 = vpop.permute.xlu1 %5470 }
 0x3c1   : > { %v5928_v4 = vsel %vm5487_vm6, %v5927_v53, %v5471_v10  ;;  %v5858_v53 = vsel %vm5487_vm6, %v5857_v26, %v11416_v28  ;;  %v5867_v28 = vrot.slane %v10554_v49, 2 }
 0x3c2   : > { %6609 = vrot.lane.b32.xlu0 %v10593_v15, %s8114_s26  ;;  %v5930_v61 = vsel %vm5490_vm7, %v5929_v37, %v5928_v4  ;;  %v5335_v13 = vpop.permute.xlu0 %5334  ;;  %v11417_v37 = vld [vmem:[#allocation15_spill] sm:$0xff] }
 0x3c3   : > { %v10697_v54 = vsel %vm5493_vm8, %v5931_v14, %v5930_v61  ;;  %v5859_v14 = vrot.slane %v11417_v37, 6  ;;  %v5765_v38 = vrot.slane %v5335_v13, 4  ;;  %v10744_v13 = vrot.slane %v11423_v58, %v8660_v34 }
 0x3c5   : > { %v5860_v61 = vsel %vm5490_vm7, %v5859_v14, %v5858_v53  ;;  %v5915_v53 = vrot.slane %v10373_v16, 6  ;;  %v5917_v14 = vrot.slane %v11419_v7, 5  ;;  %v11421_v16 = vld [vmem:[#allocation28_spill] sm:$0xff] }
 0x3c6   : > { %v5862_v9 = vsel %vm5493_vm8, %v5861_v48, %v5860_v61  ;;  %v11420_v61 = vld [vmem:[#allocation31_spill] sm:$0xff]  ;;  %v5921_v40 = vrot.slane %v11421_v16, 3 }
 0x3c7   : > { %v5337_v36 = vpop.permute.xlu1 %5336  ;;  %v5864_v26 = vsel %vm5496_vm9, %v5863_v42, %v5862_v9  ;;  %v5916_v57 = vsel %vm5490_vm7, %v5915_v53, %v5914_v56  ;;  %v5869_v15 = vrot.slane %v11420_v61, 1 }
 0x3c8   : > { %v10699_v1 = vpop.permute.xlu0 %5430  ;;  %v5866_v43 = vsel %vm5499_vm10, %v5865_v27, %v5864_v26  ;;  %v5918_v49 = vsel %vm5493_vm8, %v5917_v14, %v5916_v57  ;;  %v5767_v56 = vrot.slane %v5337_v36, 3  ;;  %v11424_v36 = vcombine.low %v10377_v55, %v10475_v45 }
 0x3c9   : > { %v5868_v48 = vsel %vm5502_vm11, %v5867_v28, %v5866_v43  ;;  %v11422_v28 = vcombine.low %v10346_v20, %v10446_v6  ;;  %v11425_v43 = vcombine.high %v10377_v55, %v10475_v45  ;;  %v5920_v20 = vsel %vm5496_vm9, %v5919_v2, %v5918_v49 }
 0x3ca   : > { %v10732_v27 = vsel %vm5505_vm12, %v5869_v15, %v5868_v48  ;;  %v11426_v48 = vcombine.low %v11413_v17, %v10465_v51 }
 0x3cb   : > { %v10738_v29 = vrot.slane %v11422_v28, %v8660_v34  ;;  %v10758_v7 = vrot.slane %v11425_v43, %v8660_v34 }
 0x3cc   : > { %v10766_v61 = vrot.slane %v11426_v48, %v8660_v34 }
 0x3ce   : > { %v10701_v18 = vpop.permute.xlu1 %5432  ;;  %v5339_v52 = vpop.permute.xlu0 %5338 }
 0x3cf   : > { %v5769_v15 = vrot.slane %v5339_v52, 2  ;;  %v5877_v52 = vrot.slane %v10699_v1, 4  ;;  %v5879_v49 = vrot.slane %v10701_v18, 3 }
 0x3d3   : > { %v5341_v3 = vpop.permute.xlu1 %5340 }
 0x3d4   : > { %v10703_v47 = vpop.permute.xlu0 %5434  ;;  %v5771_v14 = vrot.slane %v5341_v3, 1 }
 0x3d5   : > { %v5881_v28 = vrot.slane %v10703_v47, 2  ;;  %v5922_v47 = vsel %vm5499_vm10, %v5921_v40, %v5920_v20 }
 0x3dd   : > { %v10708_v10 = vpop.permute.xlu1 %5436  ;;  %v5383_v4 = vpop.permute.xlu0 %5382 }
 0x3de   : > { %v5821_v53 = vrot.slane %v5383_v4, 4  ;;  %v10750_v4 = vrot.slane %v11424_v36, %v8660_v34 }
 0x3e0   : > { %v5822_v55 = vsel %vm5496_vm9, %v5821_v53, %v10690_v60  ;;  %v5883_v60 = vrot.slane %v10708_v10, 1 }
 0x3e1   : > { %v5385_v0 = vpop.permute.xlu1 %5384 }
 0x3e2   : > { %v5823_v26 = vrot.slane %v5385_v0, 3  ;;  %v5764_v0 = vsel %vm5493_vm8, %v5763_v30, %v10666_v12 }
 0x3e3   : > { %v5479_v37 = vpop.permute.xlu0 %5478  ;;  %v5766_v6 = vsel %vm5496_vm9, %v5765_v38, %v5764_v0 }
 0x3e4   : > { %v5768_v12 = vsel %vm5499_vm10, %v5767_v56, %v5766_v6  ;;  %v5933_v45 = vrot.slane %v5479_v37, 4  ;;  %v5824_v2 = vsel %vm5499_vm10, %v5823_v26, %v5822_v55 }
 0x3e5   : > { %v5770_v16 = vsel %vm5502_vm11, %v5769_v15, %v5768_v12 }
 0x3e6   : > { %v5772_v58 = vsel %vm5505_vm12, %v5771_v14, %v5770_v16 }
 0x3e7   : > { %v5481_v9 = vpop.permute.xlu1 %5480 }
 0x3e8   : > { %v5935_v3 = vrot.slane %v5481_v9, 3  ;;  %v5878_v9 = vsel %vm5496_vm9, %v5877_v52, %v10681_v50 }
 0x3e9   : > { %v5880_v0 = vsel %vm5499_vm10, %v5879_v49, %v5878_v9 }
 0x3ea   : > { %v5387_v42 = vpop.permute.xlu0 %5386  ;;  %v5882_v10 = vsel %vm5502_vm11, %v5881_v28, %v5880_v0 }
 0x3eb   : > { %v5825_v57 = vrot.slane %v5387_v42, 2  ;;  %v5923_v42 = vrot.slane %v10636_v46, 2  ;;  %v5934_v46 = vsel %vm5496_vm9, %v5933_v45, %v10697_v54  ;;  %v5884_v48 = vsel %vm5505_vm12, %v5883_v60, %v5882_v10 }
 0x3ec   : > { %v5936_v15 = vsel %vm5499_vm10, %v5935_v3, %v5934_v46  ;;  %v11431_v60 = vcombine.high %v10650_v24, %v10642_v59 }
 0x3ed   : > { %v5826_v56 = vsel %vm5502_vm11, %v5825_v57, %v5824_v2  ;;  %v5924_v54 = vsel %vm5502_vm11, %v5923_v42, %v5922_v47  ;;  %v11427_v2 = vcombine.high %v11413_v17, %v10465_v51 }
 0x3ee   : > { %v5389_v30 = vpop.permute.xlu1 %5388 }
 0x3ef   : > { %v5827_v38 = vrot.slane %v5389_v30, 1  ;;  %v6156_v3 = vrot.slane %v11427_v2, %v8660_v34 }
 0x3f0   : > { %v5483_v1 = vpop.permute.xlu0 %5482 }
 0x3f1   : > { %v5828_v37 = vsel %vm5505_vm12, %v5827_v38, %v5826_v56  ;;  %v5937_v18 = vrot.slane %v5483_v1, 2 }
 0x3f2   : > { %v6397_v53 = vcombine.low %v5772_v58, %v5828_v37  ;;  %v6398_v26 = vcombine.high %v5772_v58, %v5828_v37  ;;  %v5485_v36 = vpop.permute.xlu1 %5484  ;;  %v11430_v58 = vcombine.low %v10650_v24, %v10642_v59  ;;  %v6204_v37 = vrot.slane %v11431_v60, %v10450_v31 }
 0x3f3   : > { %v5939_v57 = vrot.slane %v5485_v36, 1  ;;  %v5938_v50 = vsel %vm5502_vm11, %v5937_v18, %v5936_v15 }
 0x3f4   : > { %v6405_v43 = vrot.slane %v6397_v53, %v8660_v34  ;;  %v6412_v6 = vrot.slane %v6398_v26, %v8660_v34  ;;  %v5469_v14 = vpop.permute.xlu0 %5468 }
 0x3f5   : > { %v5940_v40 = vsel %vm5505_vm12, %v5939_v57, %v5938_v50  ;;  %v5925_v20 = vrot.slane %v5469_v14, 1 }
 0x3f6   : > { %v6445_v12 = vcombine.low %v10738_v29, %v6405_v43  ;;  %v6446_v52 = vcombine.high %v10738_v29, %v6405_v43  ;;  %v6461_v55 = vcombine.low %v10744_v13, %v6412_v6  ;;  %v6462_v45 = vcombine.high %v10744_v13, %v6412_v6 }
 0x3f7   : > { %v6429_v30 = vcombine.low %v5884_v48, %v5940_v40  ;;  %v6430_v49 = vcombine.high %v5884_v48, %v5940_v40  ;;  %v5926_v38 = vsel %vm5505_vm12, %v5925_v20, %v5924_v54  ;;  %v11428_v29 = vcombine.low %v10645_v8, %v10639_v39 }
 0x3f8   : > { %v6157_v42 = vcombine.low %v10732_v27, %v5926_v38  ;;  %v6158_v16 = vcombine.high %v10732_v27, %v5926_v38  ;;  %v6550_v28 = vpop.permute.xlu0 %6549  ;;  %v11429_v13 = vcombine.high %v10645_v8, %v10639_v39  ;;  %v6197_v27 = vrot.slane %v11430_v58, %v10450_v31 }
 0x3f9   : > { %v6181_v56 = vrot.slane %v11428_v29, %v10450_v31  ;;  %v6437_v51 = vrot.slane %v6429_v30, %v8660_v34  ;;  %v6444_v17 = vrot.slane %v6430_v49, %v8660_v34  ;;  %v6453_v39 = vrot.slane %v6445_v12, %v10450_v31 }
 0x3fa   : > { %v6188_v1 = vrot.slane %v11429_v13, %v10450_v31  ;;  %v6165_v18 = vrot.slane %v6157_v42, %v8660_v34  ;;  %v6172_v9 = vrot.slane %v6158_v16, %v8660_v34  ;;  %v6460_v8 = vrot.slane %v6446_v52, %v10450_v31 }
 0x3fb   : > { %v6477_v46 = vcombine.low %v10750_v4, %v6437_v51  ;;  %v6478_v53 = vcombine.high %v10750_v4, %v6437_v51  ;;  %v6493_v26 = vcombine.low %v10758_v7, %v6444_v17  ;;  %v6494_v36 = vcombine.high %v10758_v7, %v6444_v17 }
 0x3fc   : > { %v6205_v47 = vcombine.low %v10766_v61, %v6165_v18  ;;  %v6206_v59 = vcombine.high %v10766_v61, %v6165_v18  ;;  %v6221_v24 = vcombine.low %v6156_v3, %v6172_v9  ;;  %v6222_v0 = vcombine.high %v6156_v3, %v6172_v9  ;;  %v6554_v15 = vpop.permute.xlu0 %6553 }
 0x3fd   : > { %v6485_v57 = vrot.slane %v6477_v46, %v10450_v31  ;;  %v6492_v10 = vrot.slane %v6478_v53, %v10450_v31  ;;  %v6469_v43 = vrot.slane %v6461_v55, %v10450_v31  ;;  %v6501_v6 = vrot.slane %v6493_v26, %v10450_v31 }
 0x3fe   : > { %v6213_v4 = vrot.slane %v6205_v47, %v10450_v31  ;;  %v6220_v50 = vrot.slane %v6206_v59, %v10450_v31  ;;  %v6229_v7 = vrot.slane %v6221_v24, %v10450_v31  ;;  %v6236_v14 = vrot.slane %v6222_v0, %v10450_v31 }
 0x3ff   : > { %v10842_v61 = vcombine.low %v6453_v39, %v6485_v57  ;;  %v10844_v54 = vcombine.high %v6453_v39, %v6485_v57  ;;  %v10846_v48 = vcombine.low %v6460_v8, %v6492_v10  ;;  %v10848_v40 = vcombine.high %v6460_v8, %v6492_v10 }
 0x400   : > { %v6558_v20 = vpop.permute.xlu0 %6557  ;;  %v10850_v12 = vcombine.low %v6181_v56, %v6213_v4  ;;  %v10852_v52 = vcombine.high %v6181_v56, %v6213_v4  ;;  %v10854_v55 = vcombine.low %v6188_v1, %v6220_v50  ;;  %v10856_v30 = vcombine.high %v6188_v1, %v6220_v50 }
 0x401   : > { %v10858_v49 = vcombine.low %v6197_v27, %v6229_v7  ;;  %v10860_v2 = vcombine.high %v6197_v27, %v6229_v7  ;;  %v10862_v3 = vcombine.low %v6204_v37, %v6236_v14  ;;  %v6476_v38 = vrot.slane %v6462_v45, %v10450_v31 }
 0x402   : > { %6551 = vrot.lane.b32.xlu1 %v10850_v12, %s8114_s26  ;;  %v10867_v42 = vcombine.high %v6204_v37, %v6236_v14  ;;  %v10869_v16 = vcombine.low %v6469_v43, %v6501_v6  ;;  %v10871_v29 = vcombine.high %v6469_v43, %v6501_v6  ;;  %v6508_v56 = vrot.slane %v6494_v36, %v10450_v31 }
 0x403   : > { %v6647_v27 = vmax.f32 %v10484_v32, %v6554_v15  ;;  %v6649_v60 = vmax.f32 %v10498_v23, %v6558_v20  ;;  %v6645_v37 = vmax.f32 %v10482_v11, %v6550_v28 }
 0x404   : > { %v6562_v13 = vpop.permute.xlu0 %6561  ;;  %v10874_v1 = vcombine.low %v6476_v38, %v6508_v56  ;;  %v10876_v51 = vcombine.high %v6476_v38, %v6508_v56 }
 0x405   : > { %v6651_v17 = vmax.f32 %v10500_v35, %v6562_v13  ;;  %v6677_v8 = vcombine.low %v6645_v37, %v6649_v60  ;;  %v6678_v53 = vcombine.high %v6645_v37, %v6649_v60 }
 0x406   : > { %6555 = vrot.lane.b32.xlu1 %v10852_v52, %s8114_s26 }
 0x407   : > { %v6693_v18 = vcombine.low %v6647_v27, %v6651_v17  ;;  %v6694_v46 = vcombine.high %v6647_v27, %v6651_v17  ;;  %v6685_v28 = vrot.slane %v6677_v8, %v8660_v34 }
 0x408   : > { %v6566_v45 = vpop.permute.xlu0 %6565 }
 0x409   : > { %v6653_v35 = vmax.f32 %v10516_v44, %v6566_v45  ;;  %v6701_v32 = vrot.slane %v6693_v18, %v8660_v34  ;;  %v6692_v44 = vrot.slane %v6678_v53, %v8660_v34 }
 0x40a   : > { %6559 = vrot.lane.b32.xlu1 %v10854_v55, %s8114_s26 }
 0x40b   : > { %v6741_v0 = vcombine.low %v6685_v28, %v6701_v32  ;;  %v6742_v27 = vcombine.high %v6685_v28, %v6701_v32 }
 0x40c   : > { %v6570_v58 = vpop.permute.xlu0 %6569 }
 0x40d   : > { %v6655_v26 = vmax.f32 %v10518_v5, %v6570_v58  ;;  %v10907_v7 = vrot.slane %v6741_v0, %v10450_v31 }
 0x40e   : > { %6563 = vrot.lane.b32.xlu1 %v10856_v30, %s8114_s26 }
 0x410   : > { %v6574_v9 = vpop.permute.xlu0 %6573 }
 0x411   : > { %v6657_v39 = vmax.f32 %v10524_v19, %v6574_v9  ;;  %v6708_v19 = vrot.slane %v6694_v46, %v8660_v34 }
 0x412   : > { %6567 = vrot.lane.b32.xlu1 %v10858_v49, %s8114_s26 }
 0x413   : > { %v6709_v36 = vcombine.low %v6653_v35, %v6657_v39  ;;  %v6710_v47 = vcombine.high %v6653_v35, %v6657_v39  ;;  %v6757_v43 = vcombine.low %v6692_v44, %v6708_v19  ;;  %v6756_v39 = vrot.slane %v6742_v27, %v10450_v31 }
 0x414   : > { %v6578_v23 = vpop.permute.xlu0 %6577  ;;  %v6758_v8 = vcombine.high %v6692_v44, %v6708_v19 }
 0x415   : > { %v6659_v11 = vmax.f32 %v10526_v21, %v6578_v23  ;;  %v6717_v57 = vrot.slane %v6709_v36, %v8660_v34  ;;  %v6724_v5 = vrot.slane %v6710_v47, %v8660_v34  ;;  %v10916_v38 = vrot.slane %v6757_v43, %v10450_v31 }
 0x416   : > { %6571 = vrot.lane.b32.xlu1 %v10860_v2, %s8114_s26  ;;  %v6772_v32 = vrot.slane %v6758_v8, %v10450_v31 }
 0x417   : > { %v6725_v59 = vcombine.low %v6655_v26, %v6659_v11  ;;  %v6726_v24 = vcombine.high %v6655_v26, %v6659_v11 }
 0x418   : > { %v6582_v15 = vpop.permute.xlu0 %6581 }
 0x419   : > { %v6733_v10 = vrot.slane %v6725_v59, %v8660_v34  ;;  %v6740_v21 = vrot.slane %v6726_v24, %v8660_v34  ;;  %v6661_v19 = vmax.f32 %v10556_v41, %v6582_v15 }
 0x41a   : > { %6575 = vrot.lane.b32.xlu1 %v10862_v3, %s8114_s26 }
 0x41b   : > { %v6773_v6 = vcombine.low %v6717_v57, %v6733_v10  ;;  %v6789_v4 = vcombine.low %v6724_v5, %v6740_v21  ;;  %v6774_v56 = vcombine.high %v6717_v57, %v6733_v10  ;;  %v6790_v37 = vcombine.high %v6724_v5, %v6740_v21  ;;  %v11432_v21 = vld [vmem:[#allocation32_spill] sm:$0xff] }
 0x41c   : > { %v6586_v50 = vpop.permute.xlu0 %6585 }
 0x41d   : > { %v10910_v14 = vrot.slane %v6773_v6, %v10450_v31  ;;  %v10913_v20 = vrot.slane %v6789_v4, %v10450_v31  ;;  %v6788_v60 = vrot.slane %v6774_v56, %v10450_v31  ;;  %v6804_v46 = vrot.slane %v6790_v37, %v10450_v31  ;;  %v11433_v6 = vld [vmem:[#allocation25_spill] sm:$0xff] }
 0x41e   : > { %6579 = vrot.lane.b32.xlu1 %v10867_v42, %s8114_s26  ;;  %v6663_v47 = vmax.f32 %v10558_v25, %v6586_v50 }
 0x41f   : > { %v6806_v13 = vcombine.high %v10907_v7, %v10910_v14  ;;  %v6805_v17 = vcombine.low %v10907_v7, %v10910_v14  ;;  %v6809_v58 = vcombine.low %v10916_v38, %v10913_v20  ;;  %v6810_v18 = vcombine.high %v10916_v38, %v10913_v20 }
 0x420   : > { %v6590_v45 = vpop.permute.xlu0 %6589  ;;  %v6807_v35 = vcombine.low %v6756_v39, %v6788_v60  ;;  %v6811_v23 = vcombine.low %v6772_v32, %v6804_v46  ;;  %v6808_v28 = vcombine.high %v6756_v39, %v6788_v60 }
 0x421   : > { %7223 = vrot.lane.b32.xlu0 %v6806_v13, %s8115_s27  ;;  %v6665_v11 = vmax.f32 %v10561_v33, %v6590_v45  ;;  %v6812_v33 = vcombine.high %v6772_v32, %v6804_v46 }
 0x422   : > { %6583 = vrot.lane.b32.xlu1 %v10842_v61, %s8114_s26 }
 0x423   : > { %v6814_v57 = vcombine.high %v6661_v19, %v6665_v11 }
 0x424   : > { %v6594_v9 = vpop.permute.xlu0 %6593 }
 0x425   : > { %7247 = vrot.lane.b32.xlu0 %v6810_v18, %s8115_s27  ;;  %v6667_v26 = vmax.f32 %v10565_v62, %v6594_v9  ;;  %v6813_v62 = vcombine.low %v6661_v19, %v6665_v11  ;;  %v6828_v13 = vrot.slane %v6814_v57, %v8660_v34 }
 0x426   : > { %6587 = vrot.lane.b32.xlu1 %v10844_v54, %s8114_s26 }
 0x427   : > { %v6829_v59 = vcombine.low %v6663_v47, %v6667_v26  ;;  %v6830_v0 = vcombine.high %v6663_v47, %v6667_v26  ;;  %v6821_v4 = vrot.slane %v6813_v62, %v8660_v34 }
 0x428   : > { %v6598_v53 = vpop.permute.xlu0 %6597 }
 0x429   : > { %7231 = vrot.lane.b32.xlu0 %v6807_v35, %s8112_s25  ;;  %v6669_v25 = vmax.f32 %v10580_v63, %v6598_v53  ;;  %v6837_v5 = vrot.slane %v6829_v59, %v8660_v34  ;;  %v6844_v50 = vrot.slane %v6830_v0, %v8660_v34 }
 0x42a   : > { %6591 = vrot.lane.b32.xlu1 %v10846_v48, %s8114_s26 }
 0x42b   : > { %v6877_v45 = vcombine.low %v6821_v4, %v6837_v5  ;;  %v6893_v9 = vcombine.low %v6828_v13, %v6844_v50  ;;  %v6878_v11 = vcombine.high %v6821_v4, %v6837_v5 }
 0x42c   : > { %v6602_v36 = vpop.permute.xlu0 %6601 }
 0x42d   : > { %7255 = vrot.lane.b32.xlu0 %v6811_v23, %s8112_s25  ;;  %v6671_v41 = vmax.f32 %v11432_v21, %v6602_v36  ;;  %v10969_v46 = vrot.slane %v6877_v45, %v10450_v31  ;;  %v10978_v32 = vrot.slane %v6893_v9, %v10450_v31 }
 0x42e   : > { %6595 = vrot.lane.b32.xlu1 %v10848_v40, %s8114_s26 }
 0x430   : > { %v6606_v24 = vpop.permute.xlu0 %6605 }
 0x431   : > { %v6673_v44 = vmax.f32 %v10591_v22, %v6606_v24  ;;  %7239 = vrot.lane.b32.xlu0 %v6808_v28, %s8114_s26  ;;  %v6892_v24 = vrot.slane %v6878_v11, %v10450_v31 }
 0x432   : > { %6599 = vrot.lane.b32.xlu1 %v10869_v16, %s8114_s26 }
 0x433   : > { %v6845_v15 = vcombine.low %v6669_v25, %v6673_v44  ;;  %v6846_v43 = vcombine.high %v6669_v25, %v6673_v44  ;;  %v6894_v44 = vcombine.high %v6828_v13, %v6844_v50 }
 0x434   : > { %v6610_v10 = vpop.permute.xlu0 %6609 }
 0x435   : > { %v6675_v22 = vmax.f32 %v11433_v6, %v6610_v10  ;;  %7263 = vrot.lane.b32.xlu0 %v6812_v33, %s8114_s26  ;;  %v6853_v27 = vrot.slane %v6845_v15, %v8660_v34  ;;  %v6860_v60 = vrot.slane %v6846_v43, %v8660_v34  ;;  %v6908_v25 = vrot.slane %v6894_v44, %v10450_v31 }
 0x436   : > { %6603 = vrot.lane.b32.xlu1 %v10871_v29, %s8114_s26 }
 0x437   : > { %v6861_v63 = vcombine.low %v6671_v41, %v6675_v22  ;;  %v6862_v56 = vcombine.high %v6671_v41, %v6675_v22 }
 0x439   : > { %v6869_v37 = vrot.slane %v6861_v63, %v8660_v34  ;;  %v6876_v18 = vrot.slane %v6862_v56, %v8660_v34 }
 0x43a   : > { %6607 = vrot.lane.b32.xlu1 %v10874_v1, %s8114_s26 }
 0x43b   : > { %v6909_v39 = vcombine.low %v6853_v27, %v6869_v37  ;;  %v6925_v8 = vcombine.low %v6860_v60, %v6876_v18  ;;  %v6910_v26 = vcombine.high %v6853_v27, %v6869_v37  ;;  %v6926_v19 = vcombine.high %v6860_v60, %v6876_v18 }
 0x43d   : > { %v10972_v35 = vrot.slane %v6909_v39, %v10450_v31  ;;  %v10975_v53 = vrot.slane %v6925_v8, %v10450_v31  ;;  %v6924_v28 = vrot.slane %v6910_v26, %v10450_v31  ;;  %v6940_v62 = vrot.slane %v6926_v19, %v10450_v31 }
 0x43e   : > { %6611 = vrot.lane.b32.xlu1 %v10876_v51, %s8114_s26 }
 0x43f   : > { %v6942_v23 = vcombine.high %v10969_v46, %v10972_v35  ;;  %v6941_v36 = vcombine.low %v10969_v46, %v10972_v35  ;;  %v6945_v47 = vcombine.low %v10978_v32, %v10975_v53  ;;  %v6946_v59 = vcombine.high %v10978_v32, %v10975_v53 }
 0x440   : > { %v6943_v0 = vcombine.low %v6892_v24, %v6924_v28  ;;  %v6947_v33 = vcombine.low %v6908_v25, %v6940_v62  ;;  %v6944_v57 = vcombine.high %v6892_v24, %v6924_v28  ;;  %v6948_v5 = vcombine.high %v6908_v25, %v6940_v62 }
 0x442   : > { %7225 = vrot.lane.b32.xlu1 %v6942_v23, %s8115_s27 }
 0x446   : > { %7249 = vrot.lane.b32.xlu1 %v6946_v59, %s8115_s27 }
 0x44a   : > { %7233 = vrot.lane.b32.xlu1 %v6943_v0, %s8112_s25 }
 0x44e   : > { %7257 = vrot.lane.b32.xlu1 %v6947_v33, %s8112_s25 }
 0x452   : > { %7241 = vrot.lane.b32.xlu1 %v6944_v57, %s8114_s26 }
 0x456   : > { %7265 = vrot.lane.b32.xlu1 %v6948_v5, %s8114_s26 }
 0x474   : > { %v6552_v10 = vpop.permute.xlu1 %6551 }
 0x475   : > { %v6646_v63 = vmax.f32 %v10850_v12, %v6552_v10 }
 0x478   : > { %v6556_v21 = vpop.permute.xlu1 %6555 }
 0x479   : > { %v6648_v4 = vmax.f32 %v10852_v52, %v6556_v21 }
 0x47c   : > { %v6560_v41 = vpop.permute.xlu1 %6559 }
 0x47d   : > { %v6650_v50 = vmax.f32 %v10854_v55, %v6560_v41 }
 0x47f   : > { %v6949_v27 = vcombine.low %v6646_v63, %v6650_v50  ;;  %v6950_v18 = vcombine.high %v6646_v63, %v6650_v50 }
 0x480   : > { %v6564_v15 = vpop.permute.xlu1 %6563 }
 0x481   : > { %v6652_v6 = vmax.f32 %v10856_v30, %v6564_v15  ;;  %v6957_v12 = vrot.slane %v6949_v27, %v8660_v34  ;;  %v6964_v28 = vrot.slane %v6950_v18, %v8660_v34 }
 0x483   : > { %v6965_v56 = vcombine.low %v6648_v4, %v6652_v6  ;;  %v6966_v60 = vcombine.high %v6648_v4, %v6652_v6 }
 0x484   : > { %v6568_v43 = vpop.permute.xlu1 %6567 }
 0x485   : > { %v6654_v37 = vmax.f32 %v10858_v49, %v6568_v43  ;;  %v6973_v9 = vrot.slane %v6965_v56, %v8660_v34  ;;  %v6980_v23 = vrot.slane %v6966_v60, %v8660_v34  ;;  %v11434_v60 = vld [vmem:[#allocation11_spill] sm:$0xff] }
 0x487   : > { %v7013_v49 = vcombine.low %v6957_v12, %v6973_v9  ;;  %v7014_v4 = vcombine.high %v6957_v12, %v6973_v9  ;;  %v11041_v9 = vld [vmem:[#allocation5] sm:$0xf] }
 0x488   : > { %v6572_v22 = vpop.permute.xlu1 %6571 }
 0x489   : > { %v6656_v30 = vmax.f32 %v10860_v2, %v6572_v22  ;;  %v11017_v57 = vrot.slane %v7013_v49, %v10450_v31  ;;  %v7028_v18 = vrot.slane %v7014_v4, %v10450_v31 }
 0x48c   : > { %v6576_v13 = vpop.permute.xlu1 %6575 }
 0x48d   : > { %v6658_v45 = vmax.f32 %v10862_v3, %v6576_v13 }
 0x48f   : > { %v6981_v8 = vcombine.low %v6654_v37, %v6658_v45  ;;  %v6982_v52 = vcombine.high %v6654_v37, %v6658_v45  ;;  %v7348_v37 = vsub.s32 0, %v11434_v60 }
 0x490   : > { %v6580_v39 = vpop.permute.xlu1 %6579 }
 0x491   : > { %v6660_v55 = vmax.f32 %v10867_v42, %v6580_v39  ;;  %v6989_v59 = vrot.slane %v6981_v8, %v8660_v34  ;;  %v6996_v24 = vrot.slane %v6982_v52, %v8660_v34  ;;  %v7029_v42 = vcombine.low %v6964_v28, %v6980_v23 }
 0x492   : > { %v7030_v39 = vcombine.high %v6964_v28, %v6980_v23 }
 0x493   : > { %v6997_v26 = vcombine.low %v6656_v30, %v6660_v55  ;;  %v6998_v3 = vcombine.high %v6656_v30, %v6660_v55  ;;  %v7224_v11 = vpop.permute.xlu0 %7223  ;;  %v11026_v21 = vrot.slane %v7029_v42, %v10450_v31  ;;  %v7352_v30 = vsub.s32 1, %v11434_v60 }
 0x494   : > { %v6584_v19 = vpop.permute.xlu1 %6583  ;;  %v7318_v52 = vsel %vm7317_vm13, %v6805_v17, %v7224_v11  ;;  %v7044_v28 = vrot.slane %v7030_v39, %v10450_v31 }
 0x495   : > { %v7005_v2 = vrot.slane %v6997_v26, %v8660_v34  ;;  %v7012_v44 = vrot.slane %v6998_v3, %v8660_v34  ;;  %v11051_v26 = vrot.slane %v11041_v9, %v7348_v37  ;;  %v11061_v14 = vrot.slane %v11041_v9, %v7352_v30 }
 0x497   : > { %v7045_v62 = vcombine.low %v6989_v59, %v7005_v2  ;;  %v7061_v0 = vcombine.low %v6996_v24, %v7012_v44  ;;  %v7248_v25 = vpop.permute.xlu0 %7247  ;;  %v7046_v41 = vcombine.high %v6989_v59, %v7005_v2  ;;  %v7062_v56 = vcombine.high %v6996_v24, %v7012_v44 }
 0x498   : > { %v6588_v33 = vpop.permute.xlu1 %6587  ;;  %v7326_v7 = vsel %vm7317_vm13, %v6809_v58, %v7248_v25 }
 0x499   : > { %v11020_v5 = vrot.slane %v7045_v62, %v10450_v31  ;;  %v11023_v10 = vrot.slane %v7061_v0, %v10450_v31  ;;  %v7060_v63 = vrot.slane %v7046_v41, %v10450_v31  ;;  %v7076_v8 = vrot.slane %v7062_v56, %v10450_v31 }
 0x49a   : > { %v6664_v20 = vmax.f32 %v10844_v54, %v6588_v33  ;;  %v6662_v0 = vmax.f32 %v10842_v61, %v6584_v19 }
 0x49b   : > { %v7232_v15 = vpop.permute.xlu0 %7231  ;;  %v7078_v43 = vcombine.high %v11017_v57, %v11020_v5  ;;  %v7077_v22 = vcombine.low %v11017_v57, %v11020_v5  ;;  %v7081_v50 = vcombine.low %v11026_v21, %v11023_v10  ;;  %v7082_v45 = vcombine.high %v11026_v21, %v11023_v10 }
 0x49c   : > { %v6592_v6 = vpop.permute.xlu1 %6591  ;;  %v7079_v12 = vcombine.low %v7028_v18, %v7060_v63  ;;  %v7321_v23 = vsel %vm7320_vm14, %v7318_v52, %v7232_v15  ;;  %v7083_v59 = vcombine.low %v7044_v28, %v7076_v8  ;;  %v7080_v62 = vcombine.high %v7028_v18, %v7060_v63 }
 0x49d   : > { %7271 = vrot.lane.b32.xlu0 %v7078_v43, %s8115_s27  ;;  %v6666_v38 = vmax.f32 %v10846_v48, %v6592_v6  ;;  %v7084_v33 = vcombine.high %v7044_v28, %v7076_v8 }
 0x49f   : > { %v7256_v13 = vpop.permute.xlu0 %7255  ;;  %v7085_v4 = vcombine.low %v6662_v0, %v6666_v38  ;;  %v7086_v6 = vcombine.high %v6662_v0, %v6666_v38 }
 0x4a0   : > { %v6596_v27 = vpop.permute.xlu1 %6595  ;;  %v7328_v17 = vsel %vm7320_vm14, %v7326_v7, %v7256_v13 }
 0x4a1   : > { %7295 = vrot.lane.b32.xlu0 %v7082_v45, %s8115_s27  ;;  %v6668_v24 = vmax.f32 %v10848_v40, %v6596_v27  ;;  %v7093_v27 = vrot.slane %v7085_v4, %v8660_v34  ;;  %v7100_v39 = vrot.slane %v7086_v6, %v8660_v34 }
 0x4a3   : > { %v7240_v55 = vpop.permute.xlu0 %7239  ;;  %v7101_v25 = vcombine.low %v6664_v20, %v6668_v24  ;;  %v7102_v56 = vcombine.high %v6664_v20, %v6668_v24 }
 0x4a4   : > { %v6600_v3 = vpop.permute.xlu1 %6599  ;;  %v7324_v49 = vsel %vm7323_vm15, %v7321_v23, %v7240_v55 }
 0x4a5   : > { %7279 = vrot.lane.b32.xlu0 %v7079_v12, %s8112_s25  ;;  %v7366_v2 = vadd.f32 %v11051_v26, %v7324_v49  ;;  %v6670_v48 = vmax.f32 %v10869_v16, %v6600_v3  ;;  %v7109_v13 = vrot.slane %v7101_v25, %v8660_v34  ;;  %v7116_v16 = vrot.slane %v7102_v56, %v8660_v34 }
 0x4a7   : > { %v7264_v11 = vpop.permute.xlu0 %7263  ;;  %v7374_v40 = vmax.f32 %v7366_v2, 0.0  ;;  %v7149_v30 = vcombine.low %v7093_v27, %v7109_v13  ;;  %v7165_v12 = vcombine.low %v7100_v39, %v7116_v16  ;;  %v7166_v25 = vcombine.high %v7100_v39, %v7116_v16 }
 0x4a8   : > { %v7330_v44 = vsel %vm7323_vm15, %v7328_v17, %v7264_v11  ;;  %v6604_v42 = vpop.permute.xlu1 %6603 }
 0x4a9   : > { %7303 = vrot.lane.b32.xlu0 %v7083_v59, %s8112_s25  ;;  %v7367_v58 = vadd.f32 %v11061_v14, %v7330_v44  ;;  %v6672_v19 = vmax.f32 %v10871_v29, %v6604_v42  ;;  %v11093_v49 = vrot.slane %v7149_v30, %v10450_v31  ;;  %v11102_v11 = vrot.slane %v7165_v12, %v10450_v31 }
 0x4aa   : > { %v7150_v42 = vcombine.high %v7093_v27, %v7109_v13  ;;  %v7180_v56 = vrot.slane %v7166_v25, %v10450_v31  ;;  %v7360_v27 = vsub.s32 3, %v11434_v60 }
 0x4ab   : > { %v7375_v41 = vmax.f32 %v7367_v58, 0.0 }
 0x4ac   : > { %v6608_v15 = vpop.permute.xlu1 %6607  ;;  %v7164_v0 = vrot.slane %v7150_v42, %v10450_v31  ;;  %v7361_v30 = vrot.slane %v11041_v9, %v7360_v27 }
 0x4ad   : > { %v6674_v43 = vmax.f32 %v10874_v1, %v6608_v15  ;;  %7287 = vrot.lane.b32.xlu0 %v7080_v62, %s8114_s26  ;;  %v7902_v54 = vpack.c.bf16 %v7375_v41, %v7374_v40 }
 0x4af   : > { %7406 = vst [vmem:[%s11079_s30] sm:$0xff] %v7902_v54  ;;  %v7117_v63 = vcombine.low %v6670_v48, %v6674_v43  ;;  %v7118_v1 = vcombine.high %v6670_v48, %v6674_v43 }
 0x4b0   : > { %v6612_v61 = vpop.permute.xlu1 %6611 }
 0x4b1   : > { %v6676_v45 = vmax.f32 %v10876_v51, %v6612_v61  ;;  %7311 = vrot.lane.b32.xlu0 %v7084_v33, %s8114_s26  ;;  %v7125_v52 = vrot.slane %v7117_v63, %v8660_v34  ;;  %v7132_v29 = vrot.slane %v7118_v1, %v8660_v34 }
 0x4b3   : > { %v7133_v37 = vcombine.low %v6672_v19, %v6676_v45  ;;  %v7134_v18 = vcombine.high %v6672_v19, %v6676_v45  ;;  %v7356_v45 = vsub.s32 2, %v11434_v60 }
 0x4b4   : > { %v7226_v8 = vpop.permute.xlu1 %7225 }
 0x4b5   : > { %v7141_v55 = vrot.slane %v7133_v37, %v8660_v34  ;;  %v7148_v51 = vrot.slane %v7134_v18, %v8660_v34  ;;  %v7319_v41 = vsel %vm7317_vm13, %v6941_v36, %v7226_v8  ;;  %v7357_v37 = vrot.slane %v11041_v9, %v7356_v45 }
 0x4b7   : > { %v7181_v23 = vcombine.low %v7125_v52, %v7141_v55  ;;  %v7197_v3 = vcombine.low %v7132_v29, %v7148_v51  ;;  %v7182_v59 = vcombine.high %v7125_v52, %v7141_v55  ;;  %v7198_v38 = vcombine.high %v7132_v29, %v7148_v51 }
 0x4b8   : > { %v7250_v28 = vpop.permute.xlu1 %7249 }
 0x4b9   : > { %v11096_v7 = vrot.slane %v7181_v23, %v10450_v31  ;;  %v11099_v17 = vrot.slane %v7197_v3, %v10450_v31  ;;  %v7196_v20 = vrot.slane %v7182_v59, %v10450_v31  ;;  %v7212_v40 = vrot.slane %v7198_v38, %v10450_v31 }
 0x4ba   : > { %v7327_v48 = vsel %vm7317_vm13, %v6945_v47, %v7250_v28 }
 0x4bb   : > { %v7214_v34 = vcombine.high %v11093_v49, %v11096_v7  ;;  %v7213_v2 = vcombine.low %v11093_v49, %v11096_v7  ;;  %v7217_v44 = vcombine.low %v11102_v11, %v11099_v17  ;;  %v7218_v58 = vcombine.high %v11102_v11, %v11099_v17 }
 0x4bc   : > { %v7234_v24 = vpop.permute.xlu1 %7233  ;;  %v7215_v15 = vcombine.low %v7164_v0, %v7196_v20  ;;  %v7219_v33 = vcombine.low %v7180_v56, %v7212_v40  ;;  %v7216_v13 = vcombine.high %v7164_v0, %v7196_v20  ;;  %v7220_v32 = vcombine.high %v7180_v56, %v7212_v40 }
 0x4bd   : > { %7273 = vrot.lane.b32.xlu1 %v7214_v34, %s8115_s27  ;;  %v7322_v43 = vsel %vm7320_vm14, %v7319_v41, %v7234_v24 }
 0x4c0   : > { %v7258_v62 = vpop.permute.xlu1 %7257 }
 0x4c1   : > { %7297 = vrot.lane.b32.xlu1 %v7218_v58, %s8115_s27  ;;  %v7329_v46 = vsel %vm7320_vm14, %v7327_v48, %v7258_v62 }
 0x4c4   : > { %v7242_v4 = vpop.permute.xlu1 %7241 }
 0x4c5   : > { %v7325_v54 = vsel %vm7323_vm15, %v7322_v43, %v7242_v4  ;;  %7281 = vrot.lane.b32.xlu1 %v7215_v15, %s8112_s25 }
 0x4c6   : > { %v7370_v35 = vadd.f32 %v11051_v26, %v7325_v54 }
 0x4c8   : > { %v7266_v36 = vpop.permute.xlu1 %7265  ;;  %v7378_v61 = vmax.f32 %v7370_v35, 0.0 }
 0x4c9   : > { %v7331_v6 = vsel %vm7323_vm15, %v7329_v46, %v7266_v36  ;;  %7305 = vrot.lane.b32.xlu1 %v7219_v33, %s8112_s25 }
 0x4ca   : > { %v7371_v31 = vadd.f32 %v11061_v14, %v7331_v6 }
 0x4cc   : > { %v7379_v19 = vmax.f32 %v7371_v31, 0.0 }
 0x4cd   : > { %7289 = vrot.lane.b32.xlu1 %v7216_v13, %s8114_s26 }
 0x4ce   : > { %v7904_v53 = vpack.c.bf16 %v7379_v19, %v7378_v61 }
 0x4d0   : > { %7408 = vst [vmem:[%s11079_s30 + $0x10] sm:$0xff] %v7904_v53 }
 0x4d1   : > { %7313 = vrot.lane.b32.xlu1 %v7220_v32, %s8114_s26 }
 0x50f   : > { %v7272_v47 = vpop.permute.xlu0 %7271 }
 0x510   : > { %v7332_v14 = vsel %vm7317_vm13, %v7077_v22, %v7272_v47 }
 0x513   : > { %v7296_v63 = vpop.permute.xlu0 %7295 }
 0x514   : > { %v7338_v60 = vsel %vm7317_vm13, %v7081_v50, %v7296_v63 }
 0x517   : > { %v7280_v26 = vpop.permute.xlu0 %7279 }
 0x518   : > { %v7334_v16 = vsel %vm7320_vm14, %v7332_v14, %v7280_v26 }
 0x51b   : > { %v7304_v1 = vpop.permute.xlu0 %7303 }
 0x51c   : > { %v7340_v8 = vsel %vm7320_vm14, %v7338_v60, %v7304_v1 }
 0x51f   : > { %v7288_v18 = vpop.permute.xlu0 %7287 }
 0x520   : > { %v7336_v39 = vsel %vm7323_vm15, %v7334_v16, %v7288_v18 }
 0x521   : > { %v7368_v57 = vadd.f32 %v7357_v37, %v7336_v39 }
 0x523   : > { %v7312_v5 = vpop.permute.xlu0 %7311  ;;  %v7376_v29 = vmax.f32 %v7368_v57, 0.0 }
 0x524   : > { %v7342_v22 = vsel %vm7323_vm15, %v7340_v8, %v7312_v5 }
 0x525   : > { %v7369_v52 = vadd.f32 %v7361_v30, %v7342_v22 }
 0x527   : > { %v7377_v55 = vmax.f32 %v7369_v52, 0.0 }
 0x529   : > { %v7903_v51 = vpack.c.bf16 %v7377_v55, %v7376_v29 }
 0x52b   : > { %7407 = vst [vmem:[%s11079_s30 + $0x8] sm:$0xff] %v7903_v51 }
 0x52f   : > { %v7274_v12 = vpop.permute.xlu1 %7273 }
 0x530   : > { %v7333_v10 = vsel %vm7317_vm13, %v7213_v2, %v7274_v12 }
 0x533   : > { %v7298_v9 = vpop.permute.xlu1 %7297 }
 0x534   : > { %v7339_v49 = vsel %vm7317_vm13, %v7217_v44, %v7298_v9 }
 0x537   : > { %v7282_v23 = vpop.permute.xlu1 %7281 }
 0x538   : > { %v7335_v21 = vsel %vm7320_vm14, %v7333_v10, %v7282_v23 }
 0x53b   : > { %v7306_v3 = vpop.permute.xlu1 %7305 }
 0x53c   : > { %v7341_v7 = vsel %vm7320_vm14, %v7339_v49, %v7306_v3 }
 0x53f   : > { %v7290_v50 = vpop.permute.xlu1 %7289 }
 0x540   : > { %v7337_v28 = vsel %vm7323_vm15, %v7335_v21, %v7290_v50 }
 0x541   : > { %v7372_v59 = vadd.f32 %v7357_v37, %v7337_v28 }
 0x543   : > { %v7314_v34 = vpop.permute.xlu1 %7313  ;;  %v7380_v42 = vmax.f32 %v7372_v59, 0.0 }
 0x544   : > { %v7343_v24 = vsel %vm7323_vm15, %v7341_v7, %v7314_v34 }
 0x545   : > { %v7373_v2 = vadd.f32 %v7361_v30, %v7343_v24 }
 0x547   : > { %v7381_v20 = vmax.f32 %v7373_v2, 0.0 }
 0x549   : > { %v7905_v17 = vpack.c.bf16 %v7381_v20, %v7380_v42 }
 0x54b   : > { %7409 = vst [vmem:[%s11079_s30 + $0x18] sm:$0xff] %v7905_v17 }
 0x54c   : > { %8049 = shalt.err (!%p8046_p3)
}
 0x54d   : > { %s8050_s19 = scalar_lea.hbm %s11170_s8, 512  ;;  %s8054_s25 = scalar_lea.hbm %s11218_s3, 1024 }
 0x54e   : > { %p8051_p2 = scmp.ne.s32.totalorder %s11170_s8, %s8050_s19  ;;  %p8055_p7 = scmp.lt.s32.totalorder %s11170_s8, %s11218_s3 }
 0x54f   : > { %p8056_p6 = scmp.lt.s32.totalorder %s8054_s25, %s8050_s19 }
 0x550   : > { %p8052_p4 = pnand %p8051_p2, %p8177_p5 }
 0x551   : > { %p8057_p9 = por %p8056_p6, %p8055_p7 }
 0x552   : > { %p8053_p13 = pneg %p8052_p4 }
 0x554   : > { %p8058_p10 = pnand %p8057_p9, %p8053_p13 }
 0x556   : > { %8061 = shalt.err (!%p8058_p10)
}
 0x557   : > { %s8117_s28 = smov 256   ;;  %s8118_s29 = smov 16  }
 0x558   : > { %7916 = dma.vmem_to_hbm [thread:$0]  (%p8177_p5), %s11165_s4, 512, %s11170_s8, %s11175_s9, %s8117_s28, %s8117_s28, %s8118_s29  }
 0x559 PF: > { %p7933_p12 = scmp.ge.s32.totalorder %s8104_s15, 2  ;;  %s7439_s30 = sand.u32 1, %s8092_s12  }
 0x55a   : > { %p11435_p8 = scmp.ne.s32.totalorder %s11264_s23, 0  ;;  %s7440_s5 = scalar_lea.sflag [#allocation4], %s7439_s30 }
 0x55c   : > { %p7926_p11 = pnand %p7933_p12, %p11435_p8 }
 0x55e   : > { %p7927_p0 = pneg %p7926_p11 }
 0x560   : > { %8087 = dma.done.wait (%p7927_p0), %s7440_s5, 512  }
 0x561   : > { %8089 = vsyncadd (%p7927_p0), %s7440_s5, 4294966784  ;;  %p15_p1 = scmp.ge.s32.totalorder %s8164_s18, 4   ;;  %s11436_s12 = smov %s8096_s13 }
 0x562   : > { %s11437_s13 = smov %s8100_s14  ;;  %s11438_s14 = smov %s8175_s21 }
 0x563   : > { %s11439_s15 = smov %s8164_s18  ;;  %17 = sbr.rel (!%p15_p1) target bundleno = 5 (0x5), region = 80 }
 0x568   :  { %7445 = vsyncpa [#allocation3], 1 }
 0x569   :  { %7447 = vsyncpa [#allocation3 + $0x1], 1 }
 0x56a   :  { %7448 = vsyncpa [#allocation6], 1 }
 0x56b   :  { %7449 = vsyncpa [#allocation4], 1 }
 0x56c   :  { %7451 = vsyncpa [#allocation4 + $0x1], 1 }

</bundles_post_ra>
